<compile_context>
chip_gen: v6e
topology: v6e:2x2x1
jax: 0.10.0
libtpu: 0.0.40
codegen_flags: <defaults>
</compile_context>

<pallas_src>
from typing import Callable, Optional, Tuple

import jax
import jax.numpy as jnp
from jax.experimental import pallas as pl
from jax.experimental.pallas import tpu as pltpu

LANES = 128
SUBLANES = 8
TILE_ELEMS = SUBLANES * LANES     # one (8,128) f32 vreg worth of elements
SMALL_NUMEL = 1 << 18             # below this, plain XLA beats a kernel launch


def _round_up(x: int, m: int) -> int:
    return (x + m - 1) // m * m


def _round_down8(x: int) -> int:
    return max(SUBLANES, (x // SUBLANES) * SUBLANES)


def _chip_defaults() -> Tuple[int, int]:
    """(tm_max, max_slices) per TPU generation.

    Pure HBM streaming: bigger tiles amortize the ~0.35us per-grid-step
    overhead; the 2-slice split only helps where there are 2 TensorCores.
    """
    try:
        kind = jax.devices()[0].device_kind.lower()
    except Exception:  # pragma: no cover - defensive
        kind = ""
    if "v7" in kind:
        return 8192, 2                      # 3.2 TB/s; feed both TCs
    if "v6" in kind or "v5p" in kind or "v4" in kind:
        return 4096, 1
    return 2048, 1                          # v5e / unknown: 6 MiB of buffers


def _make_kernel(weighted: bool, tm: int, spc: int, last_block: int,
                 edge_rows: int, needs_clamp: bool):
    """Weighted / unweighted squared-error streaming-reduction kernel."""
    rblocks = tm // SUBLANES
    needs_edge_mask = (edge_rows != tm)

    def _reduce(contrib):
        # (tm,128) -> (8,128): sublane-split reshape + vreg adds (pure VPU,
        # no XLU); keeps the running sum in a single vreg-sized block.
        return contrib.reshape(rblocks, SUBLANES, LANES).sum(axis=0)

    def kernel(*refs):
        if weighted:
            t_ref, p_ref, w_ref, out_ref = refs
        else:
            t_ref, p_ref, out_ref = refs

        c = pl.program_id(0)   # slice (parallel; both TCs on v7x)
        i = pl.program_id(1)   # sequential row-block index within the slice

        @pl.when(i == 0)
        def _init():
            out_ref[...] = jnp.zeros_like(out_ref)

        # Cast in-kernel (free VPU work); wrapper never upcasts in HBM.
        d = p_ref[...].astype(jnp.float32) - t_ref[...].astype(jnp.float32)
        contrib = d * d
        if weighted:
            contrib = contrib * w_ref[...].astype(jnp.float32)

        if needs_clamp or needs_edge_mask:
            blk = c * spc + i

            @pl.when(blk < last_block)
            def _interior():                      # steady state: unmasked
                out_ref[...] += _reduce(contrib)

            @pl.when(blk == last_block)
            def _edge():                          # one ragged block at most
                if needs_edge_mask:
                    row = jax.lax.broadcasted_iota(jnp.int32, (tm, LANES), 0)
                    # select (not multiply) so OOB garbage can't leak NaN/Inf
                    out_ref[...] += _reduce(
                        jnp.where(row < edge_rows, contrib, 0.0))
                else:
                    out_ref[...] += _reduce(contrib)
            # blk > last_block: clamp-duplicated blocks contribute nothing.
        else:
            out_ref[...] += _reduce(contrib)

    return kernel


def _as_rows(x: jax.Array, padded_numel: int) -> jax.Array:
    """Flatten to (rows, 128) in native dtype; zero-pad only if numel%128."""
    flat = jnp.ravel(x)
    pad = padded_numel - flat.shape[0]
    if pad > 0:
        # TODO(synk): only hit when numel % 128 != 0; a manual-DMA tail copy
        # would avoid this extra HBM read+write of the whole tensor.
        flat = jnp.pad(flat, (0, pad))
    return flat.reshape(padded_numel // LANES, LANES)


def _pallas_weighted_sq_sum(y_true: jax.Array,
                            y_pred: jax.Array,
                            weights: Optional[jax.Array],
                            *,
                            tm: Optional[int] = None,
                            n_slices: Optional[int] = None) -> jax.Array:
    """sum(w * (y_pred - y_true)^2) via a Pallas streaming reduction."""
    n_elem = y_true.size
    weighted = weights is not None

    padded_numel = _round_up(n_elem, LANES)
    rows = padded_numel // LANES               # >= 8 (caller guarantees)

    tm_max, max_slices = _chip_defaults()
    tm = tm_max if tm is None else tm
    tm = _round_down8(min(tm, rows))           # multiple of 8, <= rows

    nblocks = pl.cdiv(rows, tm)
    n_slices = max_slices if n_slices is None else n_slices
    n_slices = max(1, min(n_slices, nblocks))
    spc = pl.cdiv(nblocks, n_slices)           # steps per slice
    needs_clamp = (n_slices * spc > nblocks)
    last_block = nblocks - 1
    edge_rows = rows - last_block * tm         # rows in the final real block

    inputs = [_as_rows(y_true, padded_numel), _as_rows(y_pred, padded_numel)]
    if weighted:
        inputs.append(_as_rows(weights, padded_numel))

    if needs_clamp:
        def in_map(c, i):
            # Duplicated tail blocks re-read the last real block; the kernel
            # skips their accumulation, so this is safe.
            return (jnp.minimum(c * spc + i, last_block), 0)
    else:
        def in_map(c, i):
            return (c * spc + i, 0)

    in_specs = [pl.BlockSpec((tm, LANES), in_map) for _ in inputs]
    out_specs = pl.BlockSpec((SUBLANES, LANES), lambda c, i: (c, 0))

    # Double-buffered input tiles + margin; explicit so big tiles always fit.
    buf_bytes = sum(2 * tm * LANES * x.dtype.itemsize for x in inputs)
    vmem_limit = int(max(32 << 20, buf_bytes + (4 << 20)))

    partials = pl.pallas_call(
        _make_kernel(weighted, tm, spc, last_block, edge_rows, needs_clamp),
        out_shape=jax.ShapeDtypeStruct((n_slices * SUBLANES, LANES),
                                       jnp.float32),
        grid_spec=pltpu.PrefetchScalarGridSpec(
            num_scalar_prefetch=0,
            grid=(n_slices, spc),
            in_specs=in_specs,
            out_specs=out_specs),
        compiler_params=pltpu.CompilerParams(
            dimension_semantics=("parallel", "arbitrary"),
            vmem_limit_bytes=vmem_limit),
    )(*inputs)

    return jnp.sum(partials)


def _jnp_weighted_sq_sum(y_true, y_pred, weights):
    d = y_pred.astype(jnp.float32) - y_true.astype(jnp.float32)
    s = d * d
    if weights is not None:
        s = s * weights.astype(jnp.float32)
    return jnp.sum(s)


def pallas_weighted_mse(y_true: jax.Array,
                        y_pred: jax.Array,
                        weights: Optional[jax.Array] = None,
                        *,
                        tm: Optional[int] = None,
                        n_slices: Optional[int] = None,
                        min_pallas_numel: int = SMALL_NUMEL) -> jax.Array:
    """sub_loss: weighted MSE, mean over the ORIGINAL element count."""
    n_elem = y_true.size
    if n_elem < max(min_pallas_numel, TILE_ELEMS):
        # Small-input fast path: launch + pipeline prologue dominate below
        # ~256K elements; a fused XLA elementwise+reduce is strictly faster.
        total = _jnp_weighted_sq_sum(y_true, y_pred, weights)
    else:
        total = _pallas_weighted_sq_sum(y_true, y_pred, weights,
                                        tm=tm, n_slices=n_slices)
    return total / jnp.float32(n_elem)


PredictionMap = Tuple[jax.Array, jax.Array]


class WeightedBaseLoss:
    """JAX/Pallas port of the PyTorch WeightedBaseLoss module."""

    def __init__(self,
                 sub_loss: Callable[[jax.Array, jax.Array, Optional[jax.Array]],
                                    jax.Array] = pallas_weighted_mse):
        self._pred: Optional[jax.Array] = None
        self._ids: Optional[jax.Array] = None
        self._sub_loss = sub_loss

    def __call__(self,
                 y_true: jax.Array,
                 y_pred: jax.Array,
                 weights: Optional[jax.Array] = None,
                 ids: Optional[jax.Array] = None,
                 save: bool = False) -> jax.Array:
        if save:
            assert weights is not None and ids is not None, \
                "Must provide weights and ids if save is True"
            # torch device-juggling is a no-op under JAX; concat bookkeeping is
            # host-side glue, not kernel work.
            self._pred = y_pred if self._pred is None else jnp.concatenate(
                (self._pred, y_pred))
            self._ids = ids if self._ids is None else jnp.concatenate(
                (self._ids, ids))
        return self._sub_loss(y_true, y_pred, weights)

    def get_prediction_map(self) -> PredictionMap:
        pred = self._pred if self._pred is not None else jnp.array([])
        idx = self._ids if self._ids is not None else jnp.array([])
        return pred, idx


if __name__ == "__main__":
    key = jax.random.PRNGKey(0)
    ks = jax.random.split(key, 11)

    loss_mod = WeightedBaseLoss(pallas_weighted_mse)

    # --- small NCHW case matching the PyTorch usage (save path + fast path) --
    B, C, H, W = 2, 4, 16, 16
    y_true = jax.random.normal(ks[0], (B, C, H, W), jnp.float32)
    y_pred = jax.random.normal(ks[1], (B, C, H, W), jnp.float32)
    weights = jax.random.uniform(ks[2], (B, C, H, W), jnp.float32)
    ids = jnp.arange(B, dtype=jnp.int32)

    loss = jax.block_until_ready(
        loss_mod(y_true, y_pred, weights=weights, ids=ids, save=True))
    ref = jnp.sum(weights * (y_pred - y_true) ** 2) / y_true.size
    assert jnp.allclose(loss, ref, rtol=1e-5, atol=1e-5), (loss, ref)

    loss_unw = jax.block_until_ready(loss_mod(y_true, y_pred))
    ref_unw = jnp.mean((y_pred - y_true) ** 2)
    assert jnp.allclose(loss_unw, ref_unw, rtol=1e-5, atol=1e-5), \
        (loss_unw, ref_unw)

    # --- Pallas path with chip-default (auto) tiling ------------------------
    yt_m = jax.random.normal(ks[3], (3, 8, 100, 160), jnp.float32)  # 384000 el
    yp_m = jax.random.normal(ks[4], (3, 8, 100, 160), jnp.float32)
    w_m = jax.random.uniform(ks[5], (3, 8, 100, 160), jnp.float32)
    loss_m = jax.block_until_ready(pallas_weighted_mse(yt_m, yp_m, w_m))
    ref_m = jnp.sum(w_m * (yp_m - yt_m) ** 2) / yt_m.size
    assert jnp.allclose(loss_m, ref_m, rtol=1e-4, atol=1e-4), (loss_m, ref_m)

    loss_m_unw = jax.block_until_ready(pallas_weighted_mse(yt_m, yp_m))
    ref_m_unw = jnp.mean((yp_m - yt_m) ** 2)
    assert jnp.allclose(loss_m_unw, ref_m_unw, rtol=1e-4, atol=1e-4), \
        (loss_m_unw, ref_m_unw)

    # --- forced small tile: 2 slices, clamp-duplicated block + ragged edge --
    yt_f = jax.random.normal(ks[6], (2, 8, 40, 128), jnp.float32)   # rows=640
    yp_f = jax.random.normal(ks[7], (2, 8, 40, 128), jnp.float32)
    w_f = jax.random.uniform(ks[8], (2, 8, 40, 128), jnp.float32)
    loss_f = jax.block_until_ready(
        pallas_weighted_mse(yt_f, yp_f, w_f, tm=216, n_slices=2,
                            min_pallas_numel=0))
    ref_f = jnp.sum(w_f * (yp_f - yt_f) ** 2) / yt_f.size
    assert jnp.allclose(loss_f, ref_f, rtol=1e-4, atol=1e-4), (loss_f, ref_f)

    # --- numel % 128 != 0: zero-pad fallback + ragged edge, unweighted ------
    yt_p = jax.random.normal(ks[9], (3, 7, 11, 13), jnp.float32)    # 3003 el
    yp_p = jax.random.normal(ks[10], (3, 7, 11, 13), jnp.float32)
    loss_p = jax.block_until_ready(
        pallas_weighted_mse(yt_p, yp_p, None, tm=16, min_pallas_numel=0))
    ref_p = jnp.mean((yp_p - yt_p) ** 2)
    assert jnp.allclose(loss_p, ref_p, rtol=1e-5, atol=1e-5), (loss_p, ref_p)

    pred_map, id_map = loss_mod.get_prediction_map()
    assert pred_map.shape == (B, C, H, W) and id_map.shape == (B,)

    print("KERNEL_OK")
</pallas_src>

<mosaic_0001>
module attributes {stable_mosaic.version = 11 : i64} {
  func.func @kernel(%arg0: i32, %arg1: i32, %arg2: memref<2048x128xf32, #tpu.memory_space<vmem>>, %arg3: memref<2048x128xf32, #tpu.memory_space<vmem>>, %arg4: memref<2048x128xf32, #tpu.memory_space<vmem>>, %arg5: memref<8x128xf32, #tpu.memory_space<vmem>>) attributes {dimension_semantics = [#tpu.dimension_semantics<parallel>, #tpu.dimension_semantics<arbitrary>], iteration_bounds = array<i64: 1, 2>, scalar_prefetch = 0 : i64, scratch_operands = 0 : i64, tpu.core_type = #tpu.core_type<tc>, window_params = [{transform_indices = @transform_0, window_bounds = array<i64: 2048, 128>}, {transform_indices = @transform_1, window_bounds = array<i64: 2048, 128>}, {transform_indices = @transform_2, window_bounds = array<i64: 2048, 128>}, {transform_indices = @transform_3, window_bounds = array<i64: 8, 128>}]} {
    %c0_i32 = arith.constant 0 : i32
    %0 = arith.cmpi eq, %arg1, %c0_i32 : i32
    %1 = arith.extui %0 : i1 to i32
    %c0_i32_0 = arith.constant 0 : i32
    %2 = arith.cmpi ne, %1, %c0_i32_0 : i32
    scf.if %2 {
      %cst = arith.constant 0.000000e+00 : f32
      %17 = vector.broadcast %cst : f32 to vector<8x128xf32>
      %c0_9 = arith.constant 0 : index
      %c0_10 = arith.constant 0 : index
      %18 = vector.load %arg5[%c0_9, %c0_10] : memref<8x128xf32, #tpu.memory_space<vmem>>, vector<8x128xf32>
      tpu.vector_store %arg5[%c0_9, %c0_10], %17 {strides = array<i32>} : memref<8x128xf32, #tpu.memory_space<vmem>>, vector<8x128xf32>,
    } else {
    }
    %c0 = arith.constant 0 : index
    %c0_1 = arith.constant 0 : index
    %3 = vector.load %arg3[%c0, %c0_1] : memref<2048x128xf32, #tpu.memory_space<vmem>>, vector<2048x128xf32>
    %c0_2 = arith.constant 0 : index
    %c0_3 = arith.constant 0 : index
    %4 = vector.load %arg2[%c0_2, %c0_3] : memref<2048x128xf32, #tpu.memory_space<vmem>>, vector<2048x128xf32>
    %5 = arith.subf %3, %4 : vector<2048x128xf32>
    %6 = arith.mulf %5, %5 : vector<2048x128xf32>
    %c0_4 = arith.constant 0 : index
    %c0_5 = arith.constant 0 : index
    %7 = vector.load %arg4[%c0_4, %c0_5] : memref<2048x128xf32, #tpu.memory_space<vmem>>, vector<2048x128xf32>
    %8 = arith.mulf %6, %7 : vector<2048x128xf32>
    %c2_i32 = arith.constant 2 : i32
    %9 = arith.muli %arg0, %c2_i32 : i32
    %10 = arith.addi %9, %arg1 : i32
    %c1_i32 = arith.constant 1 : i32
    %11 = arith.cmpi slt, %10, %c1_i32 : i32
    %12 = arith.extui %11 : i1 to i32
    %c0_i32_6 = arith.constant 0 : i32
    %13 = arith.cmpi ne, %12, %c0_i32_6 : i32
    scf.if %13 {
      %c0_9 = arith.constant 0 : index
      %c0_10 = arith.constant 0 : index
      %17 = vector.load %arg5[%c0_9, %c0_10] : memref<8x128xf32, #tpu.memory_space<vmem>>, vector<8x128xf32>
      %18 = vector.shape_cast %8 : vector<2048x128xf32> to vector<256x8x128xf32>
      %cst = arith.constant dense<0.000000e+00> : vector<8x128xf32>
      %19 = vector.multi_reduction <add>, %18, %cst [0] : vector<256x8x128xf32> to vector<8x128xf32>
      %20 = arith.addf %17, %19 : vector<8x128xf32>
      %c0_11 = arith.constant 0 : index
      %c0_12 = arith.constant 0 : index
      %21 = vector.load %arg5[%c0_11, %c0_12] : memref<8x128xf32, #tpu.memory_space<vmem>>, vector<8x128xf32>
      tpu.vector_store %arg5[%c0_11, %c0_12], %20 {strides = array<i32>} : memref<8x128xf32, #tpu.memory_space<vmem>>, vector<8x128xf32>,
    } else {
    }
    %c1_i32_7 = arith.constant 1 : i32
    %14 = arith.cmpi eq, %10, %c1_i32_7 : i32
    %15 = arith.extui %14 : i1 to i32
    %c0_i32_8 = arith.constant 0 : i32
    %16 = arith.cmpi ne, %15, %c0_i32_8 : i32
    scf.if %16 {
      %17 = tpu.iota {dimensions = array<i32: 0>} : vector<2048x128xi32>
      %c0_9 = arith.constant 0 : index
      %c0_10 = arith.constant 0 : index
      %18 = vector.load %arg5[%c0_9, %c0_10] : memref<8x128xf32, #tpu.memory_space<vmem>>, vector<8x128xf32>
      %c952_i32 = arith.constant 952 : i32
      %19 = vector.broadcast %c952_i32 : i32 to vector<2048x128xi32>
      %20 = arith.cmpi slt, %17, %19 : vector<2048x128xi32>
      %cst = arith.constant 0.000000e+00 : f32
      %21 = vector.broadcast %cst : f32 to vector<2048x128xf32>
      %22 = arith.select %20, %8, %21 : vector<2048x128xi1>, vector<2048x128xf32>
      %23 = vector.shape_cast %22 : vector<2048x128xf32> to vector<256x8x128xf32>
      %cst_11 = arith.constant dense<0.000000e+00> : vector<8x128xf32>
      %24 = vector.multi_reduction <add>, %23, %cst_11 [0] : vector<256x8x128xf32> to vector<8x128xf32>
      %25 = arith.addf %18, %24 : vector<8x128xf32>
      %c0_12 = arith.constant 0 : index
      %c0_13 = arith.constant 0 : index
      %26 = vector.load %arg5[%c0_12, %c0_13] : memref<8x128xf32, #tpu.memory_space<vmem>>, vector<8x128xf32>
      tpu.vector_store %arg5[%c0_12, %c0_13], %25 {strides = array<i32>} : memref<8x128xf32, #tpu.memory_space<vmem>>, vector<8x128xf32>,
    } else {
    }
    return
  }
  func.func @transform_0(%arg0: i32, %arg1: i32) -> (i32, i32) {
    %c2_i32 = arith.constant 2 : i32
    %0 = arith.muli %arg0, %c2_i32 : i32
    %1 = arith.addi %0, %arg1 : i32
    %c0_i32 = arith.constant 0 : i32
    %c0_i32_0 = arith.constant 0 : i32
    return %1, %c0_i32 : i32, i32
  }
  func.func @transform_1(%arg0: i32, %arg1: i32) -> (i32, i32) {
    %c2_i32 = arith.constant 2 : i32
    %0 = arith.muli %arg0, %c2_i32 : i32
    %1 = arith.addi %0, %arg1 : i32
    %c0_i32 = arith.constant 0 : i32
    %c0_i32_0 = arith.constant 0 : i32
    return %1, %c0_i32 : i32, i32
  }
  func.func @transform_2(%arg0: i32, %arg1: i32) -> (i32, i32) {
    %c2_i32 = arith.constant 2 : i32
    %0 = arith.muli %arg0, %c2_i32 : i32
    %1 = arith.addi %0, %arg1 : i32
    %c0_i32 = arith.constant 0 : i32
    %c0_i32_0 = arith.constant 0 : i32
    return %1, %c0_i32 : i32, i32
  }
  func.func @transform_3(%arg0: i32, %arg1: i32) -> (i32, i32) {
    %c0_i32 = arith.constant 0 : i32
    %c0_i32_0 = arith.constant 0 : i32
    return %arg0, %c0_i32 : i32, i32
  }
}

</mosaic_0001>

<bundles_post_ra>
// kernel: tpu_custom_call.1
= control target key start
LH: loop header
LB: loop body
LE: loop exit
PB: predicated region body
PF: predicated region fallthrough
CT: control target
= control target key end

     0   :  { %8 = vsyncpa [#allocation3], 0  ;;  %s7222_s0 = inlined_call_operand.hbm [shape: f32[3000,128], index: 0, kind: input, shape index: {}]   ;;  %s7223_s1 = inlined_call_operand.hbm [shape: f32[3000,128], index: 1, kind: input, shape index: {}]   ;;  %s7224_s2 = inlined_call_operand.hbm [shape: f32[3000,128], index: 2, kind: input, shape index: {}]   ;;  %s7225_s3 = inlined_call_operand.hbm [shape: f32[8,128], index: 3, kind: output, shape index: {}]  }
   0x1   :  { %10 = vsyncpa [#allocation3 + $0x1], 0 }
   0x2   :  { %11 = vsyncpa [#allocation6], 0 }
   0x3   :  { %13 = vsyncpa [#allocation6 + $0x1], 0 }
   0x4   :  { %14 = vsyncpa [#allocation4], 0  ;;  %s3579_s12 = smov 0   ;;  %s3581_s13 = smov 0  }
   0x5   :  { %s3583_s14 = smov 0   ;;  %s3585_s15 = smov 0  }
   0x6   :  { %s3587_s16 = smov 0   ;;  %s3589_s17 = smov 0  }
   0x7 LB: > { %s3608_s18 = sadd.s32 4294967295, %s3546_s17   ;;  %s29_s19 = sadd.s32 1, %s3542_s16  ;;  %s3546_s17 = sphi %s3589_s17, %s20_s17   ;;  %s3542_s16 = sphi %s3587_s16, %s8519_s16   ;;  %s3538_s15 = sphi %s3585_s15, %s8518_s15   ;;  %s3534_s14 = sphi %s3583_s14, %s8517_s14   ;;  %s3530_s13 = sphi %s3581_s13, %s8516_s13   ;;  %s3526_s12 = sphi %s3579_s12, %s8515_s12  }
   0x8   : > { %p30_p0 = scmp.ge.s32.totalorder %s29_s19, 2  ;;  %s43_s20 = sadd.s32 1, %s3534_s14 }
   0x9   : > { %p50_p1 = scmp.ne.s32.totalorder %s3534_s14, %s3530_s13  ;;  %p51_p2 = scmp.eq.s32.totalorder %s3546_s17, 0 }
   0xa   : > { %s8521_s19 = smov (%p30_p0, %s29_s19), 0  ;;  %p56_p4 = scmp.ne.s32.totalorder %s3530_s13, %s3526_s12 }
   0xb   : > { %p3617_p3 = por %p51_p2, %p50_p1  ;;  %s40_s22 = ssub.s32 %s3542_s16, %s8521_s19 }
   0xc   : > { %p57_p5 = scmp.eq.s32.totalorder %s3608_s18, 0  ;;  %p41_p6 = scmp.eq.s32.totalorder %s40_s22, 0 }
   0xd   : > { %p3285_p8 = scmp.ge.s32.totalorder %s3546_s17, 2 }
   0xe   : > { %p3625_p7 = por %p57_p5, %p56_p4 }
   0xf   : > { %s3630_s24 = scalar_select %p41_p6, %s3534_s14, %s43_s20  }
  0x10   : > { %162 = sbr.rel (%p3285_p8) target bundleno = 117 (0x75), region = 16 }
  0x15   : > { %165 = sbr.rel (!%p3617_p3) target bundleno = 53 (0x35), region = 20  ;;  %s166_s25 = sand.u32 (%p3617_p3), 1, %s3534_s14  }
  0x16   : > { %s3287_s26 = sshll.u32 (%p3617_p3), %s3542_s16, 8  ;;  %s3286_s27 = sshll.u32 (%p3617_p3), %s166_s25, 11 }
  0x17   : > { %s174_s28 = ssub.s32 (%p3617_p3), 375, %s3287_s26  ;;  %s3640_s4 = scalar_lea.sflag (%p3617_p3), [#allocation3], %s166_s25 }
  0x18   : > { %p175_p9 = scmp.lt.s32.totalorder (%p3617_p3), %s174_s28, 256  ;;  %s170_s5 = scalar_lea.vmem (%p3617_p3), [#allocation2], %s3286_s27 }
  0x1a   : > { %s8523_s28 = smov (!%p175_p9, %s174_s28), 256 }
  0x1b   : > { %s3637_s29 = sshll.u32 %s8523_s28, 7 }
  0x1c   : > { %s179_s30 = ssub.s32 32768, %s3637_s29 }
  0x1d   : > { %180 = vsyncadd %s3640_s4, %s179_s30  ;;  %p3289_p10 = scmp.ne.s32.totalorder %s3637_s29, 0  ;;  %s3318_s6 = sshll.u32 %s3542_s16, 15 }
  0x1e   : > { %s3648_s9 = scalar_lea.hbm %s7222_s0, %s3318_s6  ;;  %s185_s10 = sshll.u32 %s170_s5, 4  ;;  %s3650_s10 = int_to_ptr.vmem [resolvable:$true] %s185_s10 }
  0x1f   : > { %s3386_s11 = scalar_lea.hbm %s3648_s9, %s3637_s29  ;;  %s3390_s22 = scalar_lea.hbm %s7222_s0, 48000 }
  0x20   : > { %p3387_p11 = scmp.ne.s32.totalorder %s3648_s9, %s3386_s11  ;;  %p3392_p0 = scmp.lt.s32.totalorder %s3390_s22, %s3386_s11 }
  0x22   : > { %p3388_p12 = pnand %p3387_p11, %p3289_p10 }
  0x24   : > { %p3389_p13 = pneg %p3388_p12 }
  0x26   : > { %p3394_p1 = pnand %p3392_p0, %p3389_p13 }
  0x28   : > { %3397 = shalt.err (!%p3394_p1)
}
  0x29   : > { %s3398_s25 = scalar_lea.vmem %s3650_s10, %s3637_s29  ;;  %s3548_s26 = smov [#allocation2]  }
  0x2a   : > { %p3399_p2 = scmp.ne.s32.totalorder %s3650_s10, %s3398_s25  ;;  %s3402_s27 = sshll.u32 %s3548_s26, 4  ;;  %s3403_s27 = int_to_ptr.vmem [resolvable:$false] %s3402_s27 }
  0x2b   : > { %s3404_s28 = scalar_lea.vmem %s3403_s27, 65536  ;;  %p3405_p6 = scmp.lt.s32.totalorder %s3650_s10, %s3403_s27 }
  0x2c   : > { %p3400_p4 = pnand %p3399_p2, %p3289_p10  ;;  %p3406_p8 = scmp.lt.s32.totalorder %s3404_s28, %s3398_s25 }
  0x2e   : > { %p3401_p5 = pneg %p3400_p4  ;;  %p3407_p9 = por %p3406_p8, %p3405_p6 }
  0x30   : > { %p3408_p11 = pnand %p3407_p9, %p3401_p5 }
  0x32   : > { %3411 = shalt.err (!%p3408_p11)
}
  0x33   : > { %s3549_s30 = smov 128   ;;  %s3550_s5 = smov 8  }
  0x34   : > { %191 = dma.hbm_to_vmem [thread:$0]  (%p3289_p10), %s3648_s9, %s3637_s29, %s3650_s10, %s3640_s4, %s3549_s30, %s3549_s30, %s3550_s5  }
  0x35 PF: > { %194 = sbr.rel (!%p3617_p3) target bundleno = 85 (0x55), region = 24  ;;  %s195_s6 = sand.u32 (%p3617_p3), 1, %s3546_s17  }
  0x36   : > { %s197_s7 = sand.u32 (%p3617_p3), 1, %s3534_s14   ;;  %s3294_s11 = sshll.u32 (%p3617_p3), %s3542_s16, 8 }
  0x37   : > { %s3293_s8 = sshll.u32 (%p3617_p3), %s197_s7, 11  ;;  %s203_s12 = ssub.s32 (%p3617_p3), 375, %s3294_s11 }
  0x38   : > { %p204_p12 = scmp.lt.s32.totalorder (%p3617_p3), %s203_s12, 256  ;;  %s3680_s25 = scalar_lea.sflag (%p3617_p3), [#allocation6], %s195_s6 }
  0x39   : > { %s199_s29 = scalar_lea.vmem (%p3617_p3), [#allocation5], %s3293_s8 }
  0x3a   : > { %s8525_s12 = smov (!%p204_p12, %s203_s12), 256 }
  0x3b   : > { %s3677_s20 = sshll.u32 %s8525_s12, 7 }
  0x3c   : > { %s208_s22 = ssub.s32 32768, %s3677_s20 }
  0x3d   : > { %209 = vsyncadd %s3680_s25, %s208_s22  ;;  %p3296_p10 = scmp.ne.s32.totalorder %s3677_s20, 0  ;;  %s3319_s4 = sshll.u32 %s3542_s16, 15 }
  0x3e   : > { %s3688_s26 = scalar_lea.hbm %s7223_s1, %s3319_s4  ;;  %s214_s27 = sshll.u32 %s199_s29, 4  ;;  %s3690_s27 = int_to_ptr.vmem [resolvable:$true] %s214_s27 }
  0x3f   : > { %s3412_s28 = scalar_lea.hbm %s3688_s26, %s3677_s20  ;;  %s3416_s6 = scalar_lea.hbm %s7223_s1, 48000 }
  0x40   : > { %p3413_p13 = scmp.ne.s32.totalorder %s3688_s26, %s3412_s28  ;;  %p3418_p2 = scmp.lt.s32.totalorder %s3416_s6, %s3412_s28 }
  0x42   : > { %p3414_p0 = pnand %p3413_p13, %p3296_p10 }
  0x44   : > { %p3415_p1 = pneg %p3414_p0 }
  0x46   : > { %p3420_p4 = pnand %p3418_p2, %p3415_p1 }
  0x48   : > { %3423 = shalt.err (!%p3420_p4)
}
  0x49   : > { %s3424_s7 = scalar_lea.vmem %s3690_s27, %s3677_s20  ;;  %s3551_s8 = smov [#allocation5]  }
  0x4a   : > { %p3425_p5 = scmp.ne.s32.totalorder %s3690_s27, %s3424_s7  ;;  %s3428_s11 = sshll.u32 %s3551_s8, 4  ;;  %s3429_s11 = int_to_ptr.vmem [resolvable:$false] %s3428_s11 }
  0x4b   : > { %s3430_s12 = scalar_lea.vmem %s3429_s11, 65536  ;;  %p3431_p9 = scmp.lt.s32.totalorder %s3690_s27, %s3429_s11 }
  0x4c   : > { %p3426_p6 = pnand %p3425_p5, %p3296_p10  ;;  %p3432_p11 = scmp.lt.s32.totalorder %s3430_s12, %s3424_s7 }
  0x4e   : > { %p3427_p8 = pneg %p3426_p6  ;;  %p3433_p12 = por %p3432_p11, %p3431_p9 }
  0x50   : > { %p3434_p13 = pnand %p3433_p12, %p3427_p8 }
  0x52   : > { %3437 = shalt.err (!%p3434_p13)
}
  0x53   : > { %s3552_s22 = smov 128   ;;  %s3553_s29 = smov 8  }
  0x54   : > { %220 = dma.hbm_to_vmem [thread:$0]  (%p3296_p10), %s3688_s26, %s3677_s20, %s3690_s27, %s3680_s25, %s3552_s22, %s3552_s22, %s3553_s29  }
  0x55 PF: > { %223 = sbr.rel (!%p3617_p3) target bundleno = 117 (0x75), region = 28  ;;  %s224_s4 = sand.u32 (%p3617_p3), 1, %s3546_s17  }
  0x56   : > { %s226_s9 = sand.u32 (%p3617_p3), 1, %s3534_s14   ;;  %s3301_s28 = sshll.u32 (%p3617_p3), %s3542_s16, 8 }
  0x57   : > { %s3300_s10 = sshll.u32 (%p3617_p3), %s226_s9, 11  ;;  %s232_s30 = ssub.s32 (%p3617_p3), 375, %s3301_s28 }
  0x58   : > { %p233_p0 = scmp.lt.s32.totalorder (%p3617_p3), %s232_s30, 256  ;;  %s3720_s7 = scalar_lea.sflag (%p3617_p3), [#allocation6], %s224_s4 }
  0x59   : > { %s228_s20 = scalar_lea.vmem (%p3617_p3), [#allocation7], %s3300_s10 }
  0x5a   : > { %s8527_s30 = smov (!%p233_p0, %s232_s30), 256 }
  0x5b   : > { %s3717_s5 = sshll.u32 %s8527_s30, 7 }
  0x5c   : > { %s237_s6 = ssub.s32 32768, %s3717_s5 }
  0x5d   : > { %238 = vsyncadd %s3720_s7, %s237_s6  ;;  %p3303_p3 = scmp.ne.s32.totalorder %s3717_s5, 0  ;;  %s3320_s21 = sshll.u32 %s3542_s16, 15 }
  0x5e   : > { %s3728_s27 = scalar_lea.hbm %s7224_s2, %s3320_s21  ;;  %s243_s8 = sshll.u32 %s228_s20, 4  ;;  %s3730_s8 = int_to_ptr.vmem [resolvable:$true] %s243_s8 }
  0x5f   : > { %s3438_s11 = scalar_lea.hbm %s3728_s27, %s3717_s5  ;;  %s3442_s29 = scalar_lea.hbm %s7224_s2, 48000 }
  0x60   : > { %p3439_p10 = scmp.ne.s32.totalorder %s3728_s27, %s3438_s11  ;;  %p3444_p4 = scmp.lt.s32.totalorder %s3442_s29, %s3438_s11 }
  0x62   : > { %p3440_p1 = pnand %p3439_p10, %p3303_p3 }
  0x64   : > { %p3441_p2 = pneg %p3440_p1 }
  0x66   : > { %p3446_p5 = pnand %p3444_p4, %p3441_p2 }
  0x68   : > { %3449 = shalt.err (!%p3446_p5)
}
  0x69   : > { %s3450_s4 = scalar_lea.vmem %s3730_s8, %s3717_s5  ;;  %s3554_s9 = smov [#allocation7]  }
  0x6a   : > { %p3451_p6 = scmp.ne.s32.totalorder %s3730_s8, %s3450_s4  ;;  %s3454_s10 = sshll.u32 %s3554_s9, 4  ;;  %s3455_s10 = int_to_ptr.vmem [resolvable:$false] %s3454_s10 }
  0x6b   : > { %s3456_s28 = scalar_lea.vmem %s3455_s10, 65536  ;;  %p3457_p11 = scmp.lt.s32.totalorder %s3730_s8, %s3455_s10 }
  0x6c   : > { %p3452_p8 = pnand %p3451_p6, %p3303_p3  ;;  %p3458_p12 = scmp.lt.s32.totalorder %s3456_s28, %s3450_s4 }
  0x6e   : > { %p3453_p9 = pneg %p3452_p8  ;;  %p3459_p13 = por %p3458_p12, %p3457_p11 }
  0x70   : > { %p3460_p0 = pnand %p3459_p13, %p3453_p9 }
  0x72   : > { %3463 = shalt.err (!%p3460_p0)
}
  0x73   : > { %s3555_s30 = smov 128   ;;  %s3556_s6 = smov 8  }
  0x74   : > { %249 = dma.hbm_to_vmem [thread:$0]  (%p3303_p3), %s3728_s27, %s3717_s5, %s3730_s8, %s3720_s7, %s3555_s30, %s3555_s30, %s3556_s6  }
  0x75 PF: > { %p3307_p10 = scmp.ge.s32.totalorder %s3546_s17, 1  ;;  %p251_p1 = scmp.lt.s32.totalorder %s3546_s17, 3 }
  0x77   : > { %p252_p2 = pnand %p3307_p10, %p251_p1 }
  0x79   : > { %255 = sbr.rel (%p252_p2) target bundleno = 1380 (0x564), region = 32 }
  0x7e   : > { %s257_s20 = sand.u32 1, %s3530_s13  }
  0x7f   : > { %s3308_s21 = sshll.u32 %s257_s20, 11  ;;  %s258_s25 = scalar_lea.sflag [#allocation3], %s257_s20 }
  0x80   : > { %s3755_s26 = scalar_lea.vmem [#allocation2], %s3308_s21 }
  0x81   : > { %3513 = dma.done.wait (%p3625_p7), %s258_s25, 32768  }
  0x82   : > { %3515 = vsyncadd (%p3625_p7), %s258_s25, 4294934528  ;;  %s266_s5 = sand.u32 1, %s3608_s18   ;;  %s3762_s27 = scalar_lea.vmem [#allocation5], %s3308_s21 }
  0x83   : > { %s267_s7 = scalar_lea.sflag [#allocation6], %s266_s5 }
  0x84   : > { %3517 = dma.done.wait (%p3625_p7), %s267_s7, 65536  }
  0x85   : > { %3519 = vsyncadd (%p3625_p7), %s267_s7, 4294901760  ;;  %s3768_s8 = scalar_lea.vmem [#allocation7], %s3308_s21  ;;  %p3311_p3 = scmp.ne.s32.totalorder %s3538_s15, 0 }
  0x87   : > { %331 = sbr.rel (%p3311_p3) target bundleno = 142 (0x8e), region = 48 }
  0x8c   : > { %v3557_v0 = vmov 0.0  }
  0x8d   : > { %332 = vst [vmem:[#allocation8] sm:$0xff] %v3557_v0 }
  0x8e PF: > { %v333_v1 = vld [vmem:[%s3762_s27] sm:$0xff]  ;;  %v334_v2 = vld [vmem:[%s3762_s27 + $0x8] sm:$0xff]  ;;  %v335_v3 = vld [vmem:[%s3762_s27 + $0x10] sm:$0xff]  ;;  %p3312_p7 = scmp.ge.s32.totalorder %s3538_s15, 1 }
  0x8f   : > { %v336_v4 = vld [vmem:[%s3762_s27 + $0x18] sm:$0xff]  ;;  %v337_v5 = vld [vmem:[%s3762_s27 + $0x20] sm:$0xff]  ;;  %v338_v6 = vld [vmem:[%s3762_s27 + $0x28] sm:$0xff] }
  0x90   : > { %v339_v7 = vld [vmem:[%s3762_s27 + $0x30] sm:$0xff]  ;;  %v340_v8 = vld [vmem:[%s3762_s27 + $0x38] sm:$0xff]  ;;  %v341_v9 = vld [vmem:[%s3762_s27 + $0x40] sm:$0xff] }
  0x91   : > { %v342_v10 = vld [vmem:[%s3762_s27 + $0x48] sm:$0xff]  ;;  %v343_v11 = vld [vmem:[%s3762_s27 + $0x50] sm:$0xff]  ;;  %v344_v12 = vld [vmem:[%s3762_s27 + $0x58] sm:$0xff] }
  0x92   : > { %v345_v13 = vld [vmem:[%s3762_s27 + $0x60] sm:$0xff]  ;;  %v346_v14 = vld [vmem:[%s3762_s27 + $0x68] sm:$0xff]  ;;  %v347_v17 = vld [vmem:[%s3762_s27 + $0x70] sm:$0xff] }
  0x93   : > { %v589_v15 = vld [vmem:[%s3755_s26] sm:$0xff]  ;;  %v590_v16 = vld [vmem:[%s3755_s26 + $0x8] sm:$0xff]  ;;  %v348_v18 = vld [vmem:[%s3762_s27 + $0x78] sm:$0xff] }
  0x94   : > { %v349_v19 = vld [vmem:[%s3762_s27 + $0x80] sm:$0xff]  ;;  %v591_v20 = vld [vmem:[%s3755_s26 + $0x10] sm:$0xff]  ;;  %v592_v21 = vld [vmem:[%s3755_s26 + $0x18] sm:$0xff]  ;;  %v845_v23 = vsub.f32 %v333_v1, %v589_v15  ;;  %v846_v24 = vsub.f32 %v334_v2, %v590_v16 }
  0x95   : > { %v593_v22 = vld [vmem:[%s3755_s26 + $0x20] sm:$0xff]  ;;  %v350_v25 = vld [vmem:[%s3762_s27 + $0x88] sm:$0xff]  ;;  %v351_v26 = vld [vmem:[%s3762_s27 + $0x90] sm:$0xff]  ;;  %v847_v31 = vsub.f32 %v335_v3, %v591_v20  ;;  %v848_v32 = vsub.f32 %v336_v4, %v592_v21 }
  0x96   : > { %v352_v27 = vld [vmem:[%s3762_s27 + $0x98] sm:$0xff]  ;;  %v594_v28 = vld [vmem:[%s3755_s26 + $0x28] sm:$0xff]  ;;  %v595_v29 = vld [vmem:[%s3755_s26 + $0x30] sm:$0xff]  ;;  %v849_v33 = vsub.f32 %v337_v5, %v593_v22  ;;  %v3807_v43 = vmul.f32 %v845_v23, %v845_v23  ;;  %v3821_v53 = vmul.f32 %v846_v24, %v846_v24 }
  0x97   : > { %v596_v30 = vld [vmem:[%s3755_s26 + $0x38] sm:$0xff]  ;;  %v353_v34 = vld [vmem:[%s3762_s27 + $0xa0] sm:$0xff]  ;;  %v354_v35 = vld [vmem:[%s3762_s27 + $0xa8] sm:$0xff]  ;;  %v850_v40 = vsub.f32 %v338_v6, %v594_v28  ;;  %v851_v41 = vsub.f32 %v339_v7, %v595_v29  ;;  %v3835_v63 = vmul.f32 %v847_v31, %v847_v31 }
  0x98   : > { %v355_v36 = vld [vmem:[%s3762_s27 + $0xb0] sm:$0xff]  ;;  %v597_v37 = vld [vmem:[%s3755_s26 + $0x40] sm:$0xff]  ;;  %v598_v38 = vld [vmem:[%s3755_s26 + $0x48] sm:$0xff]  ;;  %v3805_v42 = vsub.f32 %v340_v8, %v596_v30  ;;  %7228 = vst [vmem:[#allocation12_spill] sm:$0xff] %v3807_v43 }
  0x99   : > { %v599_v39 = vld [vmem:[%s3755_s26 + $0x50] sm:$0xff]  ;;  %v356_v44 = vld [vmem:[%s3762_s27 + $0xb8] sm:$0xff]  ;;  %v357_v45 = vld [vmem:[%s3762_s27 + $0xc0] sm:$0xff]  ;;  %v3815_v50 = vsub.f32 %v341_v9, %v597_v37  ;;  %v3817_v51 = vsub.f32 %v342_v10, %v598_v38  ;;  %7229 = vst [vmem:[#allocation13_spill] sm:$0xff] %v3821_v53  ;;  %v3849_v9 = vmul.f32 %v848_v32, %v848_v32  ;;  %v3877_v29 = vmul.f32 %v850_v40, %v850_v40 }
  0x9a   : > { %v358_v46 = vld [vmem:[%s3762_s27 + $0xc8] sm:$0xff]  ;;  %v600_v47 = vld [vmem:[%s3755_s26 + $0x58] sm:$0xff]  ;;  %v601_v48 = vld [vmem:[%s3755_s26 + $0x60] sm:$0xff]  ;;  %v3819_v52 = vsub.f32 %v343_v11, %v599_v39  ;;  %7230 = vst [vmem:[#allocation14_spill] sm:$0xff] %v3835_v63  ;;  %v3891_v39 = vmul.f32 %v851_v41, %v851_v41  ;;  %v3907_v41 = vmul.f32 %v3805_v42, %v3805_v42 }
  0x9b   : > { %v602_v49 = vld [vmem:[%s3755_s26 + $0x68] sm:$0xff]  ;;  %v359_v54 = vld [vmem:[%s3762_s27 + $0xd0] sm:$0xff]  ;;  %v360_v55 = vld [vmem:[%s3762_s27 + $0xd8] sm:$0xff]  ;;  %v3829_v60 = vsub.f32 %v344_v12, %v600_v47  ;;  %v3831_v61 = vsub.f32 %v345_v13, %v601_v48  ;;  %7231 = vst [vmem:[#allocation15_spill] sm:$0xff] %v3849_v9  ;;  %v3923_v42 = vmul.f32 %v3815_v50, %v3815_v50  ;;  %v3939_v50 = vmul.f32 %v3817_v51, %v3817_v51 }
  0x9c   : > { %v361_v56 = vld [vmem:[%s3762_s27 + $0xe0] sm:$0xff]  ;;  %v603_v57 = vld [vmem:[%s3755_s26 + $0x70] sm:$0xff]  ;;  %v604_v58 = vld [vmem:[%s3755_s26 + $0x78] sm:$0xff]  ;;  %v3833_v62 = vsub.f32 %v346_v14, %v602_v49  ;;  %7233 = vst [vmem:[#allocation17_spill] sm:$0xff] %v3877_v29  ;;  %v3955_v51 = vmul.f32 %v3819_v52, %v3819_v52 }
  0x9d   : > { %v605_v59 = vld [vmem:[%s3755_s26 + $0x80] sm:$0xff]  ;;  %v362_v0 = vld [vmem:[%s3762_s27 + $0xe8] sm:$0xff]  ;;  %v363_v1 = vld [vmem:[%s3762_s27 + $0xf0] sm:$0xff]  ;;  %v3843_v6 = vsub.f32 %v347_v17, %v603_v57  ;;  %v3845_v7 = vsub.f32 %v348_v18, %v604_v58  ;;  %7234 = vst [vmem:[#allocation18_spill] sm:$0xff] %v3891_v39  ;;  %v3971_v52 = vmul.f32 %v3829_v60, %v3829_v60  ;;  %v3987_v60 = vmul.f32 %v3831_v61, %v3831_v61 }
  0x9e   : > { %v364_v2 = vld [vmem:[%s3762_s27 + $0xf8] sm:$0xff]  ;;  %v606_v3 = vld [vmem:[%s3755_s26 + $0x88] sm:$0xff]  ;;  %v607_v4 = vld [vmem:[%s3755_s26 + $0x90] sm:$0xff]  ;;  %v3847_v8 = vsub.f32 %v349_v19, %v605_v59  ;;  %v3863_v19 = vmul.f32 %v849_v33, %v849_v33  ;;  %7235 = vst [vmem:[#allocation19_spill] sm:$0xff] %v3907_v41  ;;  %v4003_v61 = vmul.f32 %v3833_v62, %v3833_v62 }
  0x9f   : > { %v608_v5 = vld [vmem:[%s3755_s26 + $0x98] sm:$0xff]  ;;  %v365_v10 = vld [vmem:[%s3762_s27 + $0x100] sm:$0xff]  ;;  %v366_v11 = vld [vmem:[%s3762_s27 + $0x108] sm:$0xff]  ;;  %v3857_v16 = vsub.f32 %v350_v25, %v606_v3  ;;  %v3859_v17 = vsub.f32 %v351_v26, %v607_v4  ;;  %7236 = vst [vmem:[#allocation20_spill] sm:$0xff] %v3923_v42  ;;  %v4019_v62 = vmul.f32 %v3843_v6, %v3843_v6  ;;  %v4035_v6 = vmul.f32 %v3845_v7, %v3845_v7 }
  0xa0   : > { %v367_v12 = vld [vmem:[%s3762_s27 + $0x110] sm:$0xff]  ;;  %v609_v13 = vld [vmem:[%s3755_s26 + $0xa0] sm:$0xff]  ;;  %v610_v14 = vld [vmem:[%s3755_s26 + $0xa8] sm:$0xff]  ;;  %v3861_v18 = vsub.f32 %v352_v27, %v608_v5  ;;  %7232 = vst [vmem:[#allocation16_spill] sm:$0xff] %v3863_v19  ;;  %v4051_v7 = vmul.f32 %v3847_v8, %v3847_v8 }
  0xa1   : > { %v611_v15 = vld [vmem:[%s3755_s26 + $0xb0] sm:$0xff]  ;;  %v368_v20 = vld [vmem:[%s3762_s27 + $0x118] sm:$0xff]  ;;  %v369_v21 = vld [vmem:[%s3762_s27 + $0x120] sm:$0xff]  ;;  %v3871_v25 = vsub.f32 %v353_v34, %v609_v13  ;;  %v3873_v26 = vsub.f32 %v354_v35, %v610_v14  ;;  %7237 = vst [vmem:[#allocation21_spill] sm:$0xff] %v3939_v50  ;;  %v4067_v8 = vmul.f32 %v3857_v16, %v3857_v16  ;;  %v4083_v16 = vmul.f32 %v3859_v17, %v3859_v17 }
  0xa2   : > { %v370_v22 = vld [vmem:[%s3762_s27 + $0x128] sm:$0xff]  ;;  %v612_v23 = vld [vmem:[%s3755_s26 + $0xb8] sm:$0xff]  ;;  %v613_v24 = vld [vmem:[%s3755_s26 + $0xc0] sm:$0xff]  ;;  %v3875_v27 = vsub.f32 %v355_v36, %v611_v15  ;;  %7238 = vst [vmem:[#allocation22_spill] sm:$0xff] %v3955_v51  ;;  %v4099_v17 = vmul.f32 %v3861_v18, %v3861_v18 }
  0xa3   : > { %v614_v28 = vld [vmem:[%s3755_s26 + $0xc8] sm:$0xff]  ;;  %v371_v30 = vld [vmem:[%s3762_s27 + $0x130] sm:$0xff]  ;;  %v372_v31 = vld [vmem:[%s3762_s27 + $0x138] sm:$0xff]  ;;  %v3885_v34 = vsub.f32 %v356_v44, %v612_v23  ;;  %v3887_v35 = vsub.f32 %v357_v45, %v613_v24  ;;  %7239 = vst [vmem:[#allocation23_spill] sm:$0xff] %v3971_v52  ;;  %v4115_v18 = vmul.f32 %v3871_v25, %v3871_v25  ;;  %v4131_v25 = vmul.f32 %v3873_v26, %v3873_v26 }
  0xa4   : > { %v373_v32 = vld [vmem:[%s3762_s27 + $0x140] sm:$0xff]  ;;  %v615_v33 = vld [vmem:[%s3755_s26 + $0xd0] sm:$0xff]  ;;  %v616_v37 = vld [vmem:[%s3755_s26 + $0xd8] sm:$0xff]  ;;  %v3889_v36 = vsub.f32 %v358_v46, %v614_v28  ;;  %7240 = vst [vmem:[#allocation24_spill] sm:$0xff] %v3987_v60  ;;  %v4147_v26 = vmul.f32 %v3875_v27, %v3875_v27 }
  0xa5   : > { %v617_v38 = vld [vmem:[%s3755_s26 + $0xe0] sm:$0xff]  ;;  %v374_v40 = vld [vmem:[%s3762_s27 + $0x148] sm:$0xff]  ;;  %v375_v47 = vld [vmem:[%s3762_s27 + $0x150] sm:$0xff]  ;;  %v3899_v44 = vsub.f32 %v359_v54, %v615_v33  ;;  %v3901_v45 = vsub.f32 %v360_v55, %v616_v37  ;;  %7243 = vst [vmem:[#allocation27_spill] sm:$0xff] %v4003_v61  ;;  %v4163_v27 = vmul.f32 %v3885_v34, %v3885_v34  ;;  %v4179_v34 = vmul.f32 %v3887_v35, %v3887_v35 }
  0xa6   : > { %v376_v48 = vld [vmem:[%s3762_s27 + $0x158] sm:$0xff]  ;;  %v618_v49 = vld [vmem:[%s3755_s26 + $0xe8] sm:$0xff]  ;;  %v619_v57 = vld [vmem:[%s3755_s26 + $0xf0] sm:$0xff]  ;;  %v3903_v46 = vsub.f32 %v361_v56, %v617_v38  ;;  %7246 = vst [vmem:[#allocation30_spill] sm:$0xff] %v4019_v62  ;;  %v4195_v35 = vmul.f32 %v3889_v36, %v3889_v36 }
  0xa7   : > { %v620_v58 = vld [vmem:[%s3755_s26 + $0xf8] sm:$0xff]  ;;  %v377_v59 = vld [vmem:[%s3762_s27 + $0x160] sm:$0xff]  ;;  %v378_v3 = vld [vmem:[%s3762_s27 + $0x168] sm:$0xff]  ;;  %v3915_v14 = vsub.f32 %v362_v0, %v618_v49  ;;  %v3917_v55 = vsub.f32 %v363_v1, %v619_v57  ;;  %7249 = vst [vmem:[#allocation33_spill] sm:$0xff] %v4035_v6  ;;  %v4211_v36 = vmul.f32 %v3899_v44, %v3899_v44  ;;  %v4227_v44 = vmul.f32 %v3901_v45, %v3901_v45 }
  0xa8   : > { %v379_v4 = vld [vmem:[%s3762_s27 + $0x170] sm:$0xff]  ;;  %v621_v5 = vld [vmem:[%s3755_s26 + $0x100] sm:$0xff]  ;;  %v622_v13 = vld [vmem:[%s3755_s26 + $0x108] sm:$0xff]  ;;  %v3919_v56 = vsub.f32 %v364_v2, %v620_v58  ;;  %7252 = vst [vmem:[#allocation36_spill] sm:$0xff] %v4051_v7  ;;  %v4243_v45 = vmul.f32 %v3903_v46, %v3903_v46 }
  0xa9   : > { %v623_v54 = vld [vmem:[%s3755_s26 + $0x110] sm:$0xff]  ;;  %v380_v15 = vld [vmem:[%s3762_s27 + $0x178] sm:$0xff]  ;;  %v381_v23 = vld [vmem:[%s3762_s27 + $0x180] sm:$0xff]  ;;  %v3931_v37 = vsub.f32 %v365_v10, %v621_v5  ;;  %v3933_v1 = vsub.f32 %v366_v11, %v622_v13  ;;  %7255 = vst [vmem:[#allocation39_spill] sm:$0xff] %v4067_v8  ;;  %v4259_v46 = vmul.f32 %v3915_v14, %v3915_v14  ;;  %v4275_v14 = vmul.f32 %v3917_v55, %v3917_v55 }
  0xaa   : > { %v382_v24 = vld [vmem:[%s3762_s27 + $0x188] sm:$0xff]  ;;  %v624_v28 = vld [vmem:[%s3755_s26 + $0x118] sm:$0xff]  ;;  %v625_v33 = vld [vmem:[%s3755_s26 + $0x120] sm:$0xff]  ;;  %v3935_v2 = vsub.f32 %v367_v12, %v623_v54  ;;  %7258 = vst [vmem:[#allocation42_spill] sm:$0xff] %v4083_v16  ;;  %v4291_v55 = vmul.f32 %v3919_v56, %v3919_v56 }
  0xab   : > { %v626_v0 = vld [vmem:[%s3755_s26 + $0x128] sm:$0xff]  ;;  %v383_v38 = vld [vmem:[%s3762_s27 + $0x190] sm:$0xff]  ;;  %v384_v49 = vld [vmem:[%s3762_s27 + $0x198] sm:$0xff]  ;;  %v3947_v5 = vsub.f32 %v368_v20, %v624_v28  ;;  %v3949_v11 = vsub.f32 %v369_v21, %v625_v33  ;;  %7261 = vst [vmem:[#allocation45_spill] sm:$0xff] %v4099_v17  ;;  %v4307_v56 = vmul.f32 %v3931_v37, %v3931_v37  ;;  %v4323_v37 = vmul.f32 %v3933_v1, %v3933_v1 }
  0xac   : > { %v385_v57 = vld [vmem:[%s3762_s27 + $0x1a0] sm:$0xff]  ;;  %v627_v58 = vld [vmem:[%s3755_s26 + $0x130] sm:$0xff]  ;;  %v628_v42 = vld [vmem:[%s3755_s26 + $0x138] sm:$0xff]  ;;  %v3951_v12 = vsub.f32 %v370_v22, %v626_v0  ;;  %7264 = vst [vmem:[#allocation48_spill] sm:$0xff] %v4115_v18  ;;  %v4339_v1 = vmul.f32 %v3935_v2, %v3935_v2 }
  0xad   : > { %v629_v10 = vld [vmem:[%s3755_s26 + $0x140] sm:$0xff]  ;;  %v386_v13 = vld [vmem:[%s3762_s27 + $0x1a8] sm:$0xff]  ;;  %v387_v54 = vld [vmem:[%s3762_s27 + $0x1b0] sm:$0xff]  ;;  %v3963_v28 = vsub.f32 %v371_v30, %v627_v58  ;;  %v3965_v21 = vsub.f32 %v372_v31, %v628_v42  ;;  %7267 = vst [vmem:[#allocation51_spill] sm:$0xff] %v4131_v25  ;;  %v4355_v2 = vmul.f32 %v3947_v5, %v3947_v5  ;;  %v4371_v5 = vmul.f32 %v3949_v11, %v3949_v11 }
  0xae   : > { %v388_v50 = vld [vmem:[%s3762_s27 + $0x1b8] sm:$0xff]  ;;  %v630_v41 = vld [vmem:[%s3755_s26 + $0x148] sm:$0xff]  ;;  %v631_v39 = vld [vmem:[%s3755_s26 + $0x150] sm:$0xff]  ;;  %v3967_v22 = vsub.f32 %v373_v32, %v629_v10  ;;  %7270 = vst [vmem:[#allocation54_spill] sm:$0xff] %v4147_v26  ;;  %v4387_v11 = vmul.f32 %v3951_v12, %v3951_v12 }
  0xaf   : > { %v632_v20 = vld [vmem:[%s3755_s26 + $0x158] sm:$0xff]  ;;  %v389_v33 = vld [vmem:[%s3762_s27 + $0x1c0] sm:$0xff]  ;;  %v390_v0 = vld [vmem:[%s3762_s27 + $0x1c8] sm:$0xff]  ;;  %v3979_v58 = vsub.f32 %v374_v40, %v630_v41  ;;  %v3981_v31 = vsub.f32 %v375_v47, %v631_v39  ;;  %7273 = vst [vmem:[#allocation57_spill] sm:$0xff] %v4163_v27  ;;  %v4403_v12 = vmul.f32 %v3963_v28, %v3963_v28  ;;  %v4419_v28 = vmul.f32 %v3965_v21, %v3965_v21 }
  0xb0   : > { %v391_v51 = vld [vmem:[%s3762_s27 + $0x1d0] sm:$0xff]  ;;  %v633_v29 = vld [vmem:[%s3755_s26 + $0x160] sm:$0xff]  ;;  %v634_v19 = vld [vmem:[%s3755_s26 + $0x168] sm:$0xff]  ;;  %v3983_v32 = vsub.f32 %v376_v48, %v632_v20  ;;  %7276 = vst [vmem:[#allocation60_spill] sm:$0xff] %v4179_v34  ;;  %v4435_v21 = vmul.f32 %v3967_v22, %v3967_v22 }
  0xb1   : > { %v635_v30 = vld [vmem:[%s3755_s26 + $0x170] sm:$0xff]  ;;  %v392_v42 = vld [vmem:[%s3762_s27 + $0x1d8] sm:$0xff]  ;;  %v393_v10 = vld [vmem:[%s3762_s27 + $0x1e0] sm:$0xff]  ;;  %v3995_v41 = vsub.f32 %v377_v59, %v633_v29  ;;  %v3997_v39 = vsub.f32 %v378_v3, %v634_v19  ;;  %7279 = vst [vmem:[#allocation63_spill] sm:$0xff] %v4195_v35  ;;  %v4451_v22 = vmul.f32 %v3979_v58, %v3979_v58  ;;  %v4467_v58 = vmul.f32 %v3981_v31, %v3981_v31 }
  0xb2   : > { %v394_v52 = vld [vmem:[%s3762_s27 + $0x1e8] sm:$0xff]  ;;  %v636_v9 = vld [vmem:[%s3755_s26 + $0x178] sm:$0xff]  ;;  %v637_v63 = vld [vmem:[%s3755_s26 + $0x180] sm:$0xff]  ;;  %v3999_v47 = vsub.f32 %v379_v4, %v635_v30  ;;  %7282 = vst [vmem:[#allocation66_spill] sm:$0xff] %v4211_v36  ;;  %v4483_v31 = vmul.f32 %v3983_v32, %v3983_v32 }
  0xb3   : > { %v638_v40 = vld [vmem:[%s3755_s26 + $0x188] sm:$0xff]  ;;  %7241 = vst [vmem:[#allocation25_spill] sm:$0xff] %v3997_v39  ;;  %v395_v48 = vld [vmem:[%s3762_s27 + $0x1f0] sm:$0xff]  ;;  %v396_v20 = vld [vmem:[%s3762_s27 + $0x1f8] sm:$0xff]  ;;  %v4011_v59 = vsub.f32 %v380_v15, %v636_v9  ;;  %v4013_v19 = vsub.f32 %v381_v23, %v637_v63  ;;  %v4499_v32 = vmul.f32 %v3995_v41, %v3995_v41 }
  0xb4   : > { %7242 = vst [vmem:[#allocation26_spill] sm:$0xff] %v3999_v47  ;;  %v397_v60 = vld [vmem:[%s3762_s27 + $0x200] sm:$0xff]  ;;  %v639_v53 = vld [vmem:[%s3755_s26 + $0x190] sm:$0xff]  ;;  %v640_v43 = vld [vmem:[%s3755_s26 + $0x198] sm:$0xff]  ;;  %v4015_v3 = vsub.f32 %v382_v24, %v638_v40 }
  0xb5   : > { %v641_v29 = vld [vmem:[%s3755_s26 + $0x1a0] sm:$0xff]  ;;  %7244 = vst [vmem:[#allocation28_spill] sm:$0xff] %v4013_v19  ;;  %v398_v4 = vld [vmem:[%s3762_s27 + $0x208] sm:$0xff]  ;;  %v399_v30 = vld [vmem:[%s3762_s27 + $0x210] sm:$0xff]  ;;  %v4027_v15 = vsub.f32 %v383_v38, %v639_v53  ;;  %v4029_v63 = vsub.f32 %v384_v49, %v640_v43 }
  0xb6   : > { %7245 = vst [vmem:[#allocation29_spill] sm:$0xff] %v4015_v3  ;;  %v400_v61 = vld [vmem:[%s3762_s27 + $0x218] sm:$0xff]  ;;  %v642_v47 = vld [vmem:[%s3755_s26 + $0x1a8] sm:$0xff]  ;;  %v643_v39 = vld [vmem:[%s3755_s26 + $0x1b0] sm:$0xff]  ;;  %v4031_v23 = vsub.f32 %v385_v57, %v641_v29 }
  0xb7   : > { %v644_v9 = vld [vmem:[%s3755_s26 + $0x1b8] sm:$0xff]  ;;  %7247 = vst [vmem:[#allocation31_spill] sm:$0xff] %v4029_v63  ;;  %v401_v24 = vld [vmem:[%s3762_s27 + $0x220] sm:$0xff]  ;;  %v402_v40 = vld [vmem:[%s3762_s27 + $0x228] sm:$0xff]  ;;  %v4043_v38 = vsub.f32 %v386_v13, %v642_v47  ;;  %v4045_v43 = vsub.f32 %v387_v54, %v643_v39 }
  0xb8   : > { %7248 = vst [vmem:[#allocation32_spill] sm:$0xff] %v4031_v23  ;;  %v403_v62 = vld [vmem:[%s3762_s27 + $0x230] sm:$0xff]  ;;  %v645_v3 = vld [vmem:[%s3755_s26 + $0x1c0] sm:$0xff]  ;;  %v646_v19 = vld [vmem:[%s3755_s26 + $0x1c8] sm:$0xff]  ;;  %v4047_v49 = vsub.f32 %v388_v50, %v644_v9 }
  0xb9   : > { %v647_v53 = vld [vmem:[%s3755_s26 + $0x1d0] sm:$0xff]  ;;  %7250 = vst [vmem:[#allocation34_spill] sm:$0xff] %v4045_v43  ;;  %v404_v57 = vld [vmem:[%s3762_s27 + $0x238] sm:$0xff]  ;;  %v405_v29 = vld [vmem:[%s3762_s27 + $0x240] sm:$0xff]  ;;  %v4059_v47 = vsub.f32 %v389_v33, %v645_v3  ;;  %v4061_v54 = vsub.f32 %v390_v0, %v646_v19 }
  0xba   : > { %7251 = vst [vmem:[#allocation35_spill] sm:$0xff] %v4047_v49  ;;  %v406_v6 = vld [vmem:[%s3762_s27 + $0x248] sm:$0xff]  ;;  %v648_v23 = vld [vmem:[%s3755_s26 + $0x1d8] sm:$0xff]  ;;  %v649_v63 = vld [vmem:[%s3755_s26 + $0x1e0] sm:$0xff]  ;;  %v4063_v50 = vsub.f32 %v391_v51, %v647_v53 }
  0xbb   : > { %v650_v13 = vld [vmem:[%s3755_s26 + $0x1e8] sm:$0xff]  ;;  %7253 = vst [vmem:[#allocation37_spill] sm:$0xff] %v4061_v54  ;;  %v407_v39 = vld [vmem:[%s3762_s27 + $0x250] sm:$0xff]  ;;  %v408_v9 = vld [vmem:[%s3762_s27 + $0x258] sm:$0xff]  ;;  %v4075_v3 = vsub.f32 %v392_v42, %v648_v23  ;;  %v4077_v0 = vsub.f32 %v393_v10, %v649_v63 }
  0xbc   : > { %7254 = vst [vmem:[#allocation38_spill] sm:$0xff] %v4063_v50  ;;  %v409_v7 = vld [vmem:[%s3762_s27 + $0x260] sm:$0xff]  ;;  %v651_v49 = vld [vmem:[%s3755_s26 + $0x1f0] sm:$0xff]  ;;  %v652_v43 = vld [vmem:[%s3755_s26 + $0x1f8] sm:$0xff]  ;;  %v4079_v51 = vsub.f32 %v394_v52, %v650_v13 }
  0xbd   : > { %v653_v33 = vld [vmem:[%s3755_s26 + $0x200] sm:$0xff]  ;;  %7256 = vst [vmem:[#allocation40_spill] sm:$0xff] %v4077_v0  ;;  %v410_v19 = vld [vmem:[%s3762_s27 + $0x268] sm:$0xff]  ;;  %v411_v53 = vld [vmem:[%s3762_s27 + $0x270] sm:$0xff]  ;;  %v4091_v23 = vsub.f32 %v395_v48, %v651_v49  ;;  %v4093_v10 = vsub.f32 %v396_v20, %v652_v43 }
  0xbe   : > { %7257 = vst [vmem:[#allocation41_spill] sm:$0xff] %v4079_v51  ;;  %v412_v8 = vld [vmem:[%s3762_s27 + $0x278] sm:$0xff]  ;;  %v654_v50 = vld [vmem:[%s3755_s26 + $0x208] sm:$0xff]  ;;  %v655_v54 = vld [vmem:[%s3755_s26 + $0x210] sm:$0xff]  ;;  %v4095_v52 = vsub.f32 %v397_v60, %v653_v33 }
  0xbf   : > { %v656_v42 = vld [vmem:[%s3755_s26 + $0x218] sm:$0xff]  ;;  %7259 = vst [vmem:[#allocation43_spill] sm:$0xff] %v4093_v10  ;;  %v413_v63 = vld [vmem:[%s3762_s27 + $0x280] sm:$0xff]  ;;  %v414_v13 = vld [vmem:[%s3762_s27 + $0x288] sm:$0xff]  ;;  %v4107_v49 = vsub.f32 %v398_v4, %v654_v50  ;;  %v4109_v20 = vsub.f32 %v399_v30, %v655_v54 }
  0xc0   : > { %7260 = vst [vmem:[#allocation44_spill] sm:$0xff] %v4095_v52  ;;  %v415_v16 = vld [vmem:[%s3762_s27 + $0x290] sm:$0xff]  ;;  %v657_v51 = vld [vmem:[%s3755_s26 + $0x220] sm:$0xff]  ;;  %v658_v0 = vld [vmem:[%s3755_s26 + $0x228] sm:$0xff]  ;;  %v4111_v60 = vsub.f32 %v400_v61, %v656_v42 }
  0xc1   : > { %v659_v48 = vld [vmem:[%s3755_s26 + $0x230] sm:$0xff]  ;;  %7262 = vst [vmem:[#allocation46_spill] sm:$0xff] %v4109_v20  ;;  %v416_v43 = vld [vmem:[%s3762_s27 + $0x298] sm:$0xff]  ;;  %v417_v33 = vld [vmem:[%s3762_s27 + $0x2a0] sm:$0xff]  ;;  %v4123_v50 = vsub.f32 %v401_v24, %v657_v51  ;;  %v4125_v30 = vsub.f32 %v402_v40, %v658_v0 }
  0xc2   : > { %7263 = vst [vmem:[#allocation47_spill] sm:$0xff] %v4111_v60  ;;  %v418_v17 = vld [vmem:[%s3762_s27 + $0x2a8] sm:$0xff]  ;;  %v660_v52 = vld [vmem:[%s3755_s26 + $0x238] sm:$0xff]  ;;  %v661_v10 = vld [vmem:[%s3755_s26 + $0x240] sm:$0xff]  ;;  %v4127_v61 = vsub.f32 %v403_v62, %v659_v48 }
  0xc3   : > { %v662_v4 = vld [vmem:[%s3755_s26 + $0x248] sm:$0xff]  ;;  %7265 = vst [vmem:[#allocation49_spill] sm:$0xff] %v4125_v30  ;;  %v419_v54 = vld [vmem:[%s3762_s27 + $0x2b0] sm:$0xff]  ;;  %v420_v42 = vld [vmem:[%s3762_s27 + $0x2b8] sm:$0xff]  ;;  %v4139_v51 = vsub.f32 %v404_v57, %v660_v52  ;;  %v4141_v40 = vsub.f32 %v405_v29, %v661_v10 }
  0xc4   : > { %7266 = vst [vmem:[#allocation50_spill] sm:$0xff] %v4127_v61  ;;  %v421_v18 = vld [vmem:[%s3762_s27 + $0x2c0] sm:$0xff]  ;;  %v663_v60 = vld [vmem:[%s3755_s26 + $0x250] sm:$0xff]  ;;  %v664_v20 = vld [vmem:[%s3755_s26 + $0x258] sm:$0xff]  ;;  %v4143_v62 = vsub.f32 %v406_v6, %v662_v4 }
  0xc5   : > { %v665_v24 = vld [vmem:[%s3755_s26 + $0x260] sm:$0xff]  ;;  %7268 = vst [vmem:[#allocation52_spill] sm:$0xff] %v4141_v40  ;;  %v422_v0 = vld [vmem:[%s3762_s27 + $0x2c8] sm:$0xff]  ;;  %v423_v48 = vld [vmem:[%s3762_s27 + $0x2d0] sm:$0xff]  ;;  %v4155_v52 = vsub.f32 %v407_v39, %v663_v60  ;;  %v4157_v29 = vsub.f32 %v408_v9, %v664_v20 }
  0xc6   : > { %7269 = vst [vmem:[#allocation53_spill] sm:$0xff] %v4143_v62  ;;  %v424_v25 = vld [vmem:[%s3762_s27 + $0x2d8] sm:$0xff]  ;;  %v666_v61 = vld [vmem:[%s3755_s26 + $0x268] sm:$0xff]  ;;  %v667_v30 = vld [vmem:[%s3755_s26 + $0x270] sm:$0xff]  ;;  %v4159_v6 = vsub.f32 %v409_v7, %v665_v24 }
  0xc7   : > { %v668_v57 = vld [vmem:[%s3755_s26 + $0x278] sm:$0xff]  ;;  %7271 = vst [vmem:[#allocation55_spill] sm:$0xff] %v4157_v29  ;;  %v425_v10 = vld [vmem:[%s3762_s27 + $0x2e0] sm:$0xff]  ;;  %v426_v4 = vld [vmem:[%s3762_s27 + $0x2e8] sm:$0xff]  ;;  %v4171_v60 = vsub.f32 %v410_v19, %v666_v61  ;;  %v4173_v9 = vsub.f32 %v411_v53, %v667_v30 }
  0xc8   : > { %7272 = vst [vmem:[#allocation56_spill] sm:$0xff] %v4159_v6  ;;  %v427_v26 = vld [vmem:[%s3762_s27 + $0x2f0] sm:$0xff]  ;;  %v669_v62 = vld [vmem:[%s3755_s26 + $0x280] sm:$0xff]  ;;  %v670_v40 = vld [vmem:[%s3755_s26 + $0x288] sm:$0xff]  ;;  %v4175_v7 = vsub.f32 %v412_v8, %v668_v57 }
  0xc9   : > { %v671_v39 = vld [vmem:[%s3755_s26 + $0x290] sm:$0xff]  ;;  %7274 = vst [vmem:[#allocation58_spill] sm:$0xff] %v4173_v9  ;;  %v428_v20 = vld [vmem:[%s3762_s27 + $0x2f8] sm:$0xff]  ;;  %v429_v24 = vld [vmem:[%s3762_s27 + $0x300] sm:$0xff]  ;;  %v4187_v61 = vsub.f32 %v413_v63, %v669_v62  ;;  %v4189_v53 = vsub.f32 %v414_v13, %v670_v40 }
  0xca   : > { %7275 = vst [vmem:[#allocation59_spill] sm:$0xff] %v4175_v7  ;;  %v430_v27 = vld [vmem:[%s3762_s27 + $0x308] sm:$0xff]  ;;  %v672_v6 = vld [vmem:[%s3755_s26 + $0x298] sm:$0xff]  ;;  %v673_v29 = vld [vmem:[%s3755_s26 + $0x2a0] sm:$0xff]  ;;  %v4191_v8 = vsub.f32 %v415_v16, %v671_v39 }
  0xcb   : > { %v674_v19 = vld [vmem:[%s3755_s26 + $0x2a8] sm:$0xff]  ;;  %7277 = vst [vmem:[#allocation61_spill] sm:$0xff] %v4189_v53  ;;  %v431_v30 = vld [vmem:[%s3762_s27 + $0x310] sm:$0xff]  ;;  %v432_v57 = vld [vmem:[%s3762_s27 + $0x318] sm:$0xff]  ;;  %v4203_v62 = vsub.f32 %v416_v43, %v672_v6  ;;  %v4205_v13 = vsub.f32 %v417_v33, %v673_v29 }
  0xcc   : > { %7278 = vst [vmem:[#allocation62_spill] sm:$0xff] %v4191_v8  ;;  %v433_v34 = vld [vmem:[%s3762_s27 + $0x320] sm:$0xff]  ;;  %v675_v7 = vld [vmem:[%s3755_s26 + $0x2b0] sm:$0xff]  ;;  %v676_v9 = vld [vmem:[%s3755_s26 + $0x2b8] sm:$0xff]  ;;  %v4207_v16 = vsub.f32 %v418_v17, %v674_v19 }
  0xcd   : > { %v677_v63 = vld [vmem:[%s3755_s26 + $0x2c0] sm:$0xff]  ;;  %7280 = vst [vmem:[#allocation64_spill] sm:$0xff] %v4205_v13  ;;  %v434_v40 = vld [vmem:[%s3762_s27 + $0x328] sm:$0xff]  ;;  %v435_v39 = vld [vmem:[%s3762_s27 + $0x330] sm:$0xff]  ;;  %v4219_v6 = vsub.f32 %v419_v54, %v675_v7  ;;  %v4221_v33 = vsub.f32 %v420_v42, %v676_v9 }
  0xce   : > { %7281 = vst [vmem:[#allocation65_spill] sm:$0xff] %v4207_v16  ;;  %v436_v35 = vld [vmem:[%s3762_s27 + $0x338] sm:$0xff]  ;;  %v678_v8 = vld [vmem:[%s3755_s26 + $0x2c8] sm:$0xff]  ;;  %v679_v53 = vld [vmem:[%s3755_s26 + $0x2d0] sm:$0xff]  ;;  %v4223_v17 = vsub.f32 %v421_v18, %v677_v63 }
  0xcf   : > { %v680_v43 = vld [vmem:[%s3755_s26 + $0x2d8] sm:$0xff]  ;;  %7283 = vst [vmem:[#allocation67_spill] sm:$0xff] %v4221_v33  ;;  %7285 = vst [vmem:[#allocation69_spill] sm:$0xff] %v4227_v44  ;;  %v437_v29 = vld [vmem:[%s3762_s27 + $0x340] sm:$0xff]  ;;  %v4235_v7 = vsub.f32 %v422_v0, %v678_v8  ;;  %v4237_v42 = vsub.f32 %v423_v48, %v679_v53 }
  0xd0   : > { %7284 = vst [vmem:[#allocation68_spill] sm:$0xff] %v4223_v17  ;;  %v438_v19 = vld [vmem:[%s3762_s27 + $0x348] sm:$0xff]  ;;  %v439_v36 = vld [vmem:[%s3762_s27 + $0x350] sm:$0xff]  ;;  %v681_v16 = vld [vmem:[%s3755_s26 + $0x2e0] sm:$0xff]  ;;  %v4239_v18 = vsub.f32 %v424_v25, %v680_v43 }
  0xd1   : > { %v682_v13 = vld [vmem:[%s3755_s26 + $0x2e8] sm:$0xff]  ;;  %v683_v54 = vld [vmem:[%s3755_s26 + $0x2f0] sm:$0xff]  ;;  %7286 = vst [vmem:[#allocation70_spill] sm:$0xff] %v4237_v42  ;;  %7288 = vst [vmem:[#allocation72_spill] sm:$0xff] %v4243_v45  ;;  %v4251_v8 = vsub.f32 %v425_v10, %v681_v16 }
  0xd2   : > { %7287 = vst [vmem:[#allocation71_spill] sm:$0xff] %v4239_v18  ;;  %v440_v9 = vld [vmem:[%s3762_s27 + $0x358] sm:$0xff]  ;;  %v441_v63 = vld [vmem:[%s3762_s27 + $0x360] sm:$0xff]  ;;  %v442_v44 = vld [vmem:[%s3762_s27 + $0x368] sm:$0xff]  ;;  %v4253_v48 = vsub.f32 %v426_v4, %v682_v13  ;;  %v4255_v25 = vsub.f32 %v427_v26, %v683_v54 }
  0xd3   : > { %v684_v17 = vld [vmem:[%s3755_s26 + $0x2f8] sm:$0xff]  ;;  %v685_v33 = vld [vmem:[%s3755_s26 + $0x300] sm:$0xff]  ;;  %v686_v0 = vld [vmem:[%s3755_s26 + $0x308] sm:$0xff]  ;;  %7291 = vst [vmem:[#allocation75_spill] sm:$0xff] %v4259_v46 }
  0xd4   : > { %7289 = vst [vmem:[#allocation73_spill] sm:$0xff] %v4253_v48  ;;  %7290 = vst [vmem:[#allocation74_spill] sm:$0xff] %v4255_v25  ;;  %v443_v53 = vld [vmem:[%s3762_s27 + $0x370] sm:$0xff]  ;;  %v444_v43 = vld [vmem:[%s3762_s27 + $0x378] sm:$0xff]  ;;  %v4267_v16 = vsub.f32 %v428_v20, %v684_v17  ;;  %v4269_v4 = vsub.f32 %v429_v24, %v685_v33  ;;  %v4271_v26 = vsub.f32 %v430_v27, %v686_v0 }
  0xd5   : > { %v445_v45 = vld [vmem:[%s3762_s27 + $0x380] sm:$0xff]  ;;  %v687_v18 = vld [vmem:[%s3755_s26 + $0x310] sm:$0xff]  ;;  %v688_v42 = vld [vmem:[%s3755_s26 + $0x318] sm:$0xff]  ;;  %7294 = vst [vmem:[#allocation78_spill] sm:$0xff] %v4275_v14 }
  0xd6   : > { %v689_v10 = vld [vmem:[%s3755_s26 + $0x320] sm:$0xff]  ;;  %7292 = vst [vmem:[#allocation76_spill] sm:$0xff] %v4269_v4  ;;  %7293 = vst [vmem:[#allocation77_spill] sm:$0xff] %v4271_v26  ;;  %v446_v13 = vld [vmem:[%s3762_s27 + $0x388] sm:$0xff]  ;;  %v4283_v17 = vsub.f32 %v431_v30, %v687_v18  ;;  %v4285_v24 = vsub.f32 %v432_v57, %v688_v42 }
  0xd7   : > { %v447_v54 = vld [vmem:[%s3762_s27 + $0x390] sm:$0xff]  ;;  %v448_v46 = vld [vmem:[%s3762_s27 + $0x398] sm:$0xff]  ;;  %v690_v25 = vld [vmem:[%s3755_s26 + $0x328] sm:$0xff]  ;;  %v4287_v27 = vsub.f32 %v433_v34, %v689_v10  ;;  %7297 = vst [vmem:[#allocation81_spill] sm:$0xff] %v4291_v55 }
  0xd8   : > { %v691_v48 = vld [vmem:[%s3755_s26 + $0x330] sm:$0xff]  ;;  %v692_v20 = vld [vmem:[%s3755_s26 + $0x338] sm:$0xff]  ;;  %7295 = vst [vmem:[#allocation79_spill] sm:$0xff] %v4285_v24  ;;  %v449_v33 = vld [vmem:[%s3762_s27 + $0x3a0] sm:$0xff]  ;;  %v4299_v18 = vsub.f32 %v434_v40, %v690_v25 }
  0xd9   : > { %7296 = vst [vmem:[#allocation80_spill] sm:$0xff] %v4287_v27  ;;  %v450_v0 = vld [vmem:[%s3762_s27 + $0x3a8] sm:$0xff]  ;;  %v451_v14 = vld [vmem:[%s3762_s27 + $0x3b0] sm:$0xff]  ;;  %v693_v26 = vld [vmem:[%s3755_s26 + $0x340] sm:$0xff]  ;;  %v4301_v57 = vsub.f32 %v435_v39, %v691_v48  ;;  %v4303_v34 = vsub.f32 %v436_v35, %v692_v20 }
  0xda   : > { %v694_v4 = vld [vmem:[%s3755_s26 + $0x348] sm:$0xff]  ;;  %v695_v30 = vld [vmem:[%s3755_s26 + $0x350] sm:$0xff]  ;;  %7300 = vst [vmem:[#allocation84_spill] sm:$0xff] %v4307_v56  ;;  %v452_v42 = vld [vmem:[%s3762_s27 + $0x3b8] sm:$0xff]  ;;  %v4315_v25 = vsub.f32 %v437_v29, %v693_v26 }
  0xdb   : > { %7298 = vst [vmem:[#allocation82_spill] sm:$0xff] %v4301_v57  ;;  %7299 = vst [vmem:[#allocation83_spill] sm:$0xff] %v4303_v34  ;;  %v453_v10 = vld [vmem:[%s3762_s27 + $0x3c0] sm:$0xff]  ;;  %v454_v55 = vld [vmem:[%s3762_s27 + $0x3c8] sm:$0xff]  ;;  %v4317_v39 = vsub.f32 %v438_v19, %v694_v4  ;;  %v4319_v35 = vsub.f32 %v439_v36, %v695_v30 }
  0xdc   : > { %v696_v27 = vld [vmem:[%s3755_s26 + $0x358] sm:$0xff]  ;;  %v697_v24 = vld [vmem:[%s3755_s26 + $0x360] sm:$0xff]  ;;  %v698_v40 = vld [vmem:[%s3755_s26 + $0x368] sm:$0xff]  ;;  %7303 = vst [vmem:[#allocation87_spill] sm:$0xff] %v4323_v37 }
  0xdd   : > { %7301 = vst [vmem:[#allocation85_spill] sm:$0xff] %v4317_v39  ;;  %7302 = vst [vmem:[#allocation86_spill] sm:$0xff] %v4319_v35  ;;  %v455_v48 = vld [vmem:[%s3762_s27 + $0x3d0] sm:$0xff]  ;;  %v456_v20 = vld [vmem:[%s3762_s27 + $0x3d8] sm:$0xff]  ;;  %v4331_v26 = vsub.f32 %v440_v9, %v696_v27  ;;  %v4333_v19 = vsub.f32 %v441_v63, %v697_v24  ;;  %v4335_v36 = vsub.f32 %v442_v44, %v698_v40 }
  0xde   : > { %v457_v56 = vld [vmem:[%s3762_s27 + $0x3e0] sm:$0xff]  ;;  %v699_v34 = vld [vmem:[%s3755_s26 + $0x370] sm:$0xff]  ;;  %v700_v57 = vld [vmem:[%s3755_s26 + $0x378] sm:$0xff]  ;;  %7306 = vst [vmem:[#allocation90_spill] sm:$0xff] %v4339_v1 }
  0xdf   : > { %v701_v29 = vld [vmem:[%s3755_s26 + $0x380] sm:$0xff]  ;;  %7304 = vst [vmem:[#allocation88_spill] sm:$0xff] %v4333_v19  ;;  %7305 = vst [vmem:[#allocation89_spill] sm:$0xff] %v4335_v36  ;;  %v458_v4 = vld [vmem:[%s3762_s27 + $0x3e8] sm:$0xff]  ;;  %v4347_v27 = vsub.f32 %v443_v53, %v699_v34  ;;  %v4349_v63 = vsub.f32 %v444_v43, %v700_v57 }
  0xe0   : > { %v459_v30 = vld [vmem:[%s3762_s27 + $0x3f0] sm:$0xff]  ;;  %v460_v37 = vld [vmem:[%s3762_s27 + $0x3f8] sm:$0xff]  ;;  %v702_v35 = vld [vmem:[%s3755_s26 + $0x388] sm:$0xff]  ;;  %v4351_v44 = vsub.f32 %v445_v45, %v701_v29  ;;  %7309 = vst [vmem:[#allocation93_spill] sm:$0xff] %v4355_v2 }
  0xe1   : > { %v703_v39 = vld [vmem:[%s3755_s26 + $0x390] sm:$0xff]  ;;  %v704_v9 = vld [vmem:[%s3755_s26 + $0x398] sm:$0xff]  ;;  %7307 = vst [vmem:[#allocation91_spill] sm:$0xff] %v4349_v63  ;;  %v461_v24 = vld [vmem:[%s3762_s27 + $0x400] sm:$0xff]  ;;  %v4363_v34 = vsub.f32 %v446_v13, %v702_v35 }
  0xe2   : > { %7308 = vst [vmem:[#allocation92_spill] sm:$0xff] %v4351_v44  ;;  %v462_v40 = vld [vmem:[%s3762_s27 + $0x408] sm:$0xff]  ;;  %v463_v1 = vld [vmem:[%s3762_s27 + $0x410] sm:$0xff]  ;;  %v705_v36 = vld [vmem:[%s3755_s26 + $0x3a0] sm:$0xff]  ;;  %v4365_v43 = vsub.f32 %v447_v54, %v703_v39  ;;  %v4367_v45 = vsub.f32 %v448_v46, %v704_v9 }
  0xe3   : > { %v706_v19 = vld [vmem:[%s3755_s26 + $0x3a8] sm:$0xff]  ;;  %v707_v53 = vld [vmem:[%s3755_s26 + $0x3b0] sm:$0xff]  ;;  %7312 = vst [vmem:[#allocation96_spill] sm:$0xff] %v4371_v5  ;;  %v464_v57 = vld [vmem:[%s3762_s27 + $0x418] sm:$0xff]  ;;  %v4379_v35 = vsub.f32 %v449_v33, %v705_v36 }
  0xe4   : > { %7310 = vst [vmem:[#allocation94_spill] sm:$0xff] %v4365_v43  ;;  %7311 = vst [vmem:[#allocation95_spill] sm:$0xff] %v4367_v45  ;;  %v465_v29 = vld [vmem:[%s3762_s27 + $0x420] sm:$0xff]  ;;  %v466_v2 = vld [vmem:[%s3762_s27 + $0x428] sm:$0xff]  ;;  %v4381_v54 = vsub.f32 %v450_v0, %v706_v19  ;;  %v4383_v46 = vsub.f32 %v451_v14, %v707_v53 }
  0xe5   : > { %v708_v44 = vld [vmem:[%s3755_s26 + $0x3b8] sm:$0xff]  ;;  %v709_v63 = vld [vmem:[%s3755_s26 + $0x3c0] sm:$0xff]  ;;  %v710_v13 = vld [vmem:[%s3755_s26 + $0x3c8] sm:$0xff]  ;;  %7315 = vst [vmem:[#allocation99_spill] sm:$0xff] %v4387_v11 }
  0xe6   : > { %7313 = vst [vmem:[#allocation97_spill] sm:$0xff] %v4381_v54  ;;  %7314 = vst [vmem:[#allocation98_spill] sm:$0xff] %v4383_v46  ;;  %v467_v39 = vld [vmem:[%s3762_s27 + $0x430] sm:$0xff]  ;;  %v468_v9 = vld [vmem:[%s3762_s27 + $0x438] sm:$0xff]  ;;  %v4395_v36 = vsub.f32 %v452_v42, %v708_v44  ;;  %v4397_v0 = vsub.f32 %v453_v10, %v709_v63  ;;  %v4399_v14 = vsub.f32 %v454_v55, %v710_v13 }
  0xe7   : > { %v469_v5 = vld [vmem:[%s3762_s27 + $0x440] sm:$0xff]  ;;  %v711_v45 = vld [vmem:[%s3755_s26 + $0x3d0] sm:$0xff]  ;;  %v712_v43 = vld [vmem:[%s3755_s26 + $0x3d8] sm:$0xff]  ;;  %7318 = vst [vmem:[#allocation102_spill] sm:$0xff] %v4403_v12 }
  0xe8   : > { %v713_v33 = vld [vmem:[%s3755_s26 + $0x3e0] sm:$0xff]  ;;  %7316 = vst [vmem:[#allocation100_spill] sm:$0xff] %v4397_v0  ;;  %7317 = vst [vmem:[#allocation101_spill] sm:$0xff] %v4399_v14  ;;  %v470_v19 = vld [vmem:[%s3762_s27 + $0x448] sm:$0xff]  ;;  %v4411_v44 = vsub.f32 %v455_v48, %v711_v45  ;;  %v4413_v10 = vsub.f32 %v456_v20, %v712_v43 }
  0xe9   : > { %v471_v53 = vld [vmem:[%s3762_s27 + $0x450] sm:$0xff]  ;;  %v472_v11 = vld [vmem:[%s3762_s27 + $0x458] sm:$0xff]  ;;  %v714_v46 = vld [vmem:[%s3755_s26 + $0x3e8] sm:$0xff]  ;;  %v4415_v55 = vsub.f32 %v457_v56, %v713_v33  ;;  %7321 = vst [vmem:[#allocation105_spill] sm:$0xff] %v4419_v28 }
  0xea   : > { %v715_v54 = vld [vmem:[%s3755_s26 + $0x3f0] sm:$0xff]  ;;  %v716_v42 = vld [vmem:[%s3755_s26 + $0x3f8] sm:$0xff]  ;;  %7319 = vst [vmem:[#allocation103_spill] sm:$0xff] %v4413_v10  ;;  %v473_v63 = vld [vmem:[%s3762_s27 + $0x460] sm:$0xff]  ;;  %v4427_v45 = vsub.f32 %v458_v4, %v714_v46 }
  0xeb   : > { %7320 = vst [vmem:[#allocation104_spill] sm:$0xff] %v4415_v55  ;;  %v474_v13 = vld [vmem:[%s3762_s27 + $0x468] sm:$0xff]  ;;  %v475_v12 = vld [vmem:[%s3762_s27 + $0x470] sm:$0xff]  ;;  %v717_v14 = vld [vmem:[%s3755_s26 + $0x400] sm:$0xff]  ;;  %v4429_v20 = vsub.f32 %v459_v30, %v715_v54  ;;  %v4431_v56 = vsub.f32 %v460_v37, %v716_v42 }
  0xec   : > { %v718_v0 = vld [vmem:[%s3755_s26 + $0x408] sm:$0xff]  ;;  %v719_v48 = vld [vmem:[%s3755_s26 + $0x410] sm:$0xff]  ;;  %7324 = vst [vmem:[#allocation108_spill] sm:$0xff] %v4435_v21  ;;  %v476_v43 = vld [vmem:[%s3762_s27 + $0x478] sm:$0xff]  ;;  %v4443_v46 = vsub.f32 %v461_v24, %v717_v14 }
  0xed   : > { %7322 = vst [vmem:[#allocation106_spill] sm:$0xff] %v4429_v20  ;;  %7323 = vst [vmem:[#allocation107_spill] sm:$0xff] %v4431_v56  ;;  %v477_v33 = vld [vmem:[%s3762_s27 + $0x480] sm:$0xff]  ;;  %v478_v28 = vld [vmem:[%s3762_s27 + $0x488] sm:$0xff]  ;;  %v4445_v30 = vsub.f32 %v462_v40, %v718_v0  ;;  %v4447_v37 = vsub.f32 %v463_v1, %v719_v48 }
  0xee   : > { %v720_v55 = vld [vmem:[%s3755_s26 + $0x418] sm:$0xff]  ;;  %v721_v10 = vld [vmem:[%s3755_s26 + $0x420] sm:$0xff]  ;;  %v722_v4 = vld [vmem:[%s3755_s26 + $0x428] sm:$0xff]  ;;  %7327 = vst [vmem:[#allocation111_spill] sm:$0xff] %v4451_v22 }
  0xef   : > { %7325 = vst [vmem:[#allocation109_spill] sm:$0xff] %v4445_v30  ;;  %7326 = vst [vmem:[#allocation110_spill] sm:$0xff] %v4447_v37  ;;  %v479_v54 = vld [vmem:[%s3762_s27 + $0x490] sm:$0xff]  ;;  %v480_v42 = vld [vmem:[%s3762_s27 + $0x498] sm:$0xff]  ;;  %v4459_v14 = vsub.f32 %v464_v57, %v720_v55  ;;  %v4461_v40 = vsub.f32 %v465_v29, %v721_v10  ;;  %v4463_v1 = vsub.f32 %v466_v2, %v722_v4 }
  0xf0   : > { %v481_v21 = vld [vmem:[%s3762_s27 + $0x4a0] sm:$0xff]  ;;  %v723_v56 = vld [vmem:[%s3755_s26 + $0x430] sm:$0xff]  ;;  %v724_v20 = vld [vmem:[%s3755_s26 + $0x438] sm:$0xff]  ;;  %7330 = vst [vmem:[#allocation114_spill] sm:$0xff] %v4467_v58 }
  0xf1   : > { %v725_v24 = vld [vmem:[%s3755_s26 + $0x440] sm:$0xff]  ;;  %7328 = vst [vmem:[#allocation112_spill] sm:$0xff] %v4461_v40  ;;  %7329 = vst [vmem:[#allocation113_spill] sm:$0xff] %v4463_v1  ;;  %v482_v0 = vld [vmem:[%s3762_s27 + $0x4a8] sm:$0xff]  ;;  %v4475_v55 = vsub.f32 %v467_v39, %v723_v56  ;;  %v4477_v29 = vsub.f32 %v468_v9, %v724_v20 }
  0xf2   : > { %v483_v48 = vld [vmem:[%s3762_s27 + $0x4b0] sm:$0xff]  ;;  %v484_v22 = vld [vmem:[%s3762_s27 + $0x4b8] sm:$0xff]  ;;  %v726_v37 = vld [vmem:[%s3755_s26 + $0x448] sm:$0xff]  ;;  %v4479_v2 = vsub.f32 %v469_v5, %v725_v24  ;;  %7333 = vst [vmem:[#allocation117_spill] sm:$0xff] %v4483_v31 }
  0xf3   : > { %v727_v30 = vld [vmem:[%s3755_s26 + $0x450] sm:$0xff]  ;;  %v728_v57 = vld [vmem:[%s3755_s26 + $0x458] sm:$0xff]  ;;  %7331 = vst [vmem:[#allocation115_spill] sm:$0xff] %v4477_v29  ;;  %v485_v10 = vld [vmem:[%s3762_s27 + $0x4c0] sm:$0xff]  ;;  %v4491_v56 = vsub.f32 %v470_v19, %v726_v37 }
  0xf4   : > { %7332 = vst [vmem:[#allocation116_spill] sm:$0xff] %v4479_v2  ;;  %v486_v4 = vld [vmem:[%s3762_s27 + $0x4c8] sm:$0xff]  ;;  %v487_v58 = vld [vmem:[%s3762_s27 + $0x4d0] sm:$0xff]  ;;  %v729_v1 = vld [vmem:[%s3755_s26 + $0x460] sm:$0xff]  ;;  %v4493_v9 = vsub.f32 %v471_v53, %v727_v30  ;;  %v4495_v5 = vsub.f32 %v472_v11, %v728_v57 }
  0xf5   : > { %v730_v40 = vld [vmem:[%s3755_s26 + $0x468] sm:$0xff]  ;;  %v731_v39 = vld [vmem:[%s3755_s26 + $0x470] sm:$0xff]  ;;  %7334 = vst [vmem:[#allocation118_spill] sm:$0xff] %v4491_v56  ;;  %7337 = vst [vmem:[#allocation121_spill] sm:$0xff] %v4499_v32  ;;  %v4507_v37 = vsub.f32 %v473_v63, %v729_v1 }
  0xf6   : > { %7335 = vst [vmem:[#allocation119_spill] sm:$0xff] %v4493_v9  ;;  %7336 = vst [vmem:[#allocation120_spill] sm:$0xff] %v4495_v5  ;;  %v488_v20 = vld [vmem:[%s3762_s27 + $0x4d8] sm:$0xff]  ;;  %v489_v24 = vld [vmem:[%s3762_s27 + $0x4e0] sm:$0xff]  ;;  %v4509_v53 = vsub.f32 %v474_v13, %v730_v40  ;;  %v4511_v11 = vsub.f32 %v475_v12, %v731_v39 }
  0xf7   : > { %v490_v31 = vld [vmem:[%s3762_s27 + $0x4e8] sm:$0xff]  ;;  %v732_v2 = vld [vmem:[%s3755_s26 + $0x478] sm:$0xff]  ;;  %v733_v29 = vld [vmem:[%s3755_s26 + $0x480] sm:$0xff]  ;;  %7338 = vst [vmem:[#allocation122_spill] sm:$0xff] %v4507_v37 }
  0xf8   : > { %v734_v19 = vld [vmem:[%s3755_s26 + $0x488] sm:$0xff]  ;;  %7339 = vst [vmem:[#allocation123_spill] sm:$0xff] %v4509_v53  ;;  %7340 = vst [vmem:[#allocation124_spill] sm:$0xff] %v4511_v11  ;;  %v7341_v30 = vld [vmem:[#allocation25_spill] sm:$0xff]  ;;  %v4523_v1 = vsub.f32 %v476_v43, %v732_v2  ;;  %v4525_v13 = vsub.f32 %v477_v33, %v733_v29  ;;  %v4547_v29 = vmul.f32 %v4011_v59, %v4011_v59 }
  0xf9   : > { %v4515_v41 = vmul.f32 %v7341_v30, %v7341_v30  ;;  %v491_v57 = vld [vmem:[%s3762_s27 + $0x4f0] sm:$0xff]  ;;  %v492_v32 = vld [vmem:[%s3762_s27 + $0x4f8] sm:$0xff]  ;;  %v493_v5 = vld [vmem:[%s3762_s27 + $0x500] sm:$0xff]  ;;  %v4527_v12 = vsub.f32 %v478_v28, %v734_v19 }
  0xfa   : > { %v735_v9 = vld [vmem:[%s3755_s26 + $0x490] sm:$0xff]  ;;  %v736_v56 = vld [vmem:[%s3755_s26 + $0x498] sm:$0xff]  ;;  %v737_v63 = vld [vmem:[%s3755_s26 + $0x4a0] sm:$0xff]  ;;  %7343 = vst [vmem:[#allocation125_spill] sm:$0xff] %v4525_v13 }
  0xfb   : > { %7342 = vst [vmem:[#allocation25_spill] sm:$0xff] %v4515_v41  ;;  %7344 = vst [vmem:[#allocation126_spill] sm:$0xff] %v4527_v12  ;;  %v7345_v40 = vld [vmem:[#allocation26_spill] sm:$0xff]  ;;  %v494_v30 = vld [vmem:[%s3762_s27 + $0x508] sm:$0xff]  ;;  %v4539_v2 = vsub.f32 %v479_v54, %v735_v9  ;;  %v4541_v33 = vsub.f32 %v480_v42, %v736_v56  ;;  %v4543_v28 = vsub.f32 %v481_v21, %v737_v63 }
  0xfc   : > { %v4531_v39 = vmul.f32 %v7345_v40, %v7345_v40  ;;  %v495_v41 = vld [vmem:[%s3762_s27 + $0x510] sm:$0xff]  ;;  %v496_v11 = vld [vmem:[%s3762_s27 + $0x518] sm:$0xff]  ;;  %v738_v53 = vld [vmem:[%s3755_s26 + $0x4a8] sm:$0xff]  ;;  %7350 = vst [vmem:[#allocation130_spill] sm:$0xff] %v4547_v29 }
  0xfd   : > { %v739_v37 = vld [vmem:[%s3755_s26 + $0x4b0] sm:$0xff]  ;;  %v740_v43 = vld [vmem:[%s3755_s26 + $0x4b8] sm:$0xff]  ;;  %7347 = vst [vmem:[#allocation127_spill] sm:$0xff] %v4539_v2  ;;  %7348 = vst [vmem:[#allocation128_spill] sm:$0xff] %v4541_v33  ;;  %v4555_v9 = vsub.f32 %v482_v0, %v738_v53 }
  0xfe   : > { %7346 = vst [vmem:[#allocation26_spill] sm:$0xff] %v4531_v39  ;;  %7349 = vst [vmem:[#allocation129_spill] sm:$0xff] %v4543_v28  ;;  %v497_v19 = vld [vmem:[%s3762_s27 + $0x520] sm:$0xff]  ;;  %v498_v40 = vld [vmem:[%s3762_s27 + $0x528] sm:$0xff]  ;;  %v4557_v42 = vsub.f32 %v483_v48, %v739_v37  ;;  %v4559_v21 = vsub.f32 %v484_v22, %v740_v43 }
  0xff   : > { %v499_v39 = vld [vmem:[%s3762_s27 + $0x530] sm:$0xff]  ;;  %v741_v12 = vld [vmem:[%s3755_s26 + $0x4c0] sm:$0xff]  ;;  %v742_v13 = vld [vmem:[%s3755_s26 + $0x4c8] sm:$0xff]  ;;  %7351 = vst [vmem:[#allocation131_spill] sm:$0xff] %v4555_v9 }
 0x100   : > { %v743_v54 = vld [vmem:[%s3755_s26 + $0x4d0] sm:$0xff]  ;;  %7352 = vst [vmem:[#allocation132_spill] sm:$0xff] %v4557_v42  ;;  %7353 = vst [vmem:[#allocation133_spill] sm:$0xff] %v4559_v21  ;;  %v7354_v56 = vld [vmem:[#allocation28_spill] sm:$0xff]  ;;  %v4571_v53 = vsub.f32 %v485_v10, %v741_v12  ;;  %v4573_v48 = vsub.f32 %v486_v4, %v742_v13  ;;  %v4595_v13 = vmul.f32 %v4027_v15, %v4027_v15 }
 0x101   : > { %v4563_v59 = vmul.f32 %v7354_v56, %v7354_v56  ;;  %v500_v63 = vld [vmem:[%s3762_s27 + $0x538] sm:$0xff]  ;;  %v501_v29 = vld [vmem:[%s3762_s27 + $0x540] sm:$0xff]  ;;  %v502_v28 = vld [vmem:[%s3762_s27 + $0x548] sm:$0xff]  ;;  %v4575_v22 = vsub.f32 %v487_v58, %v743_v54 }
 0x102   : > { %v744_v33 = vld [vmem:[%s3755_s26 + $0x4d8] sm:$0xff]  ;;  %v745_v2 = vld [vmem:[%s3755_s26 + $0x4e0] sm:$0xff]  ;;  %v746_v0 = vld [vmem:[%s3755_s26 + $0x4e8] sm:$0xff]  ;;  %7356 = vst [vmem:[#allocation134_spill] sm:$0xff] %v4573_v48 }
 0x103   : > { %7355 = vst [vmem:[#allocation28_spill] sm:$0xff] %v4563_v59  ;;  %7357 = vst [vmem:[#allocation135_spill] sm:$0xff] %v4575_v22  ;;  %v7358_v37 = vld [vmem:[#allocation29_spill] sm:$0xff]  ;;  %v504_v59 = vld [vmem:[%s3762_s27 + $0x558] sm:$0xff]  ;;  %v4587_v12 = vsub.f32 %v488_v20, %v744_v33  ;;  %v4589_v4 = vsub.f32 %v489_v24, %v745_v2  ;;  %v4591_v58 = vsub.f32 %v490_v31, %v746_v0 }
 0x104   : > { %v4579_v43 = vmul.f32 %v7358_v37, %v7358_v37  ;;  %v503_v56 = vld [vmem:[%s3762_s27 + $0x550] sm:$0xff]  ;;  %v505_v21 = vld [vmem:[%s3762_s27 + $0x560] sm:$0xff]  ;;  %v748_v9 = vld [vmem:[%s3755_s26 + $0x4f8] sm:$0xff]  ;;  %7363 = vst [vmem:[#allocation139_spill] sm:$0xff] %v4595_v13 }
 0x105   : > { %v747_v42 = vld [vmem:[%s3755_s26 + $0x4f0] sm:$0xff]  ;;  %v749_v10 = vld [vmem:[%s3755_s26 + $0x500] sm:$0xff]  ;;  %7360 = vst [vmem:[#allocation136_spill] sm:$0xff] %v4587_v12  ;;  %7361 = vst [vmem:[#allocation137_spill] sm:$0xff] %v4589_v4  ;;  %v4605_v24 = vsub.f32 %v492_v32, %v748_v9 }
 0x106   : > { %7359 = vst [vmem:[#allocation29_spill] sm:$0xff] %v4579_v43  ;;  %7362 = vst [vmem:[#allocation138_spill] sm:$0xff] %v4591_v58  ;;  %v506_v54 = vld [vmem:[%s3762_s27 + $0x568] sm:$0xff]  ;;  %v507_v37 = vld [vmem:[%s3762_s27 + $0x570] sm:$0xff]  ;;  %v4603_v33 = vsub.f32 %v491_v57, %v747_v42  ;;  %v4607_v31 = vsub.f32 %v493_v5, %v749_v10 }
 0x107   : > { %v508_v43 = vld [vmem:[%s3762_s27 + $0x578] sm:$0xff]  ;;  %v750_v22 = vld [vmem:[%s3755_s26 + $0x508] sm:$0xff]  ;;  %v751_v48 = vld [vmem:[%s3755_s26 + $0x510] sm:$0xff]  ;;  %7365 = vst [vmem:[#allocation141_spill] sm:$0xff] %v4605_v24 }
 0x108   : > { %v752_v20 = vld [vmem:[%s3755_s26 + $0x518] sm:$0xff]  ;;  %7364 = vst [vmem:[#allocation140_spill] sm:$0xff] %v4603_v33  ;;  %7366 = vst [vmem:[#allocation142_spill] sm:$0xff] %v4607_v31  ;;  %v7367_v2 = vld [vmem:[#allocation31_spill] sm:$0xff]  ;;  %v4619_v42 = vsub.f32 %v494_v30, %v750_v22  ;;  %v4621_v32 = vsub.f32 %v495_v41, %v751_v48  ;;  %v4643_v48 = vmul.f32 %v4043_v38, %v4043_v38 }
 0x109   : > { %v4611_v15 = vmul.f32 %v7367_v2, %v7367_v2  ;;  %v509_v0 = vld [vmem:[%s3762_s27 + $0x580] sm:$0xff]  ;;  %v510_v13 = vld [vmem:[%s3762_s27 + $0x588] sm:$0xff]  ;;  %v511_v58 = vld [vmem:[%s3762_s27 + $0x590] sm:$0xff]  ;;  %v4623_v5 = vsub.f32 %v496_v11, %v752_v20 }
 0x10a   : > { %v753_v4 = vld [vmem:[%s3755_s26 + $0x520] sm:$0xff]  ;;  %v754_v12 = vld [vmem:[%s3755_s26 + $0x528] sm:$0xff]  ;;  %v755_v57 = vld [vmem:[%s3755_s26 + $0x530] sm:$0xff]  ;;  %7369 = vst [vmem:[#allocation143_spill] sm:$0xff] %v4621_v32 }
 0x10b   : > { %7368 = vst [vmem:[#allocation31_spill] sm:$0xff] %v4611_v15  ;;  %7370 = vst [vmem:[#allocation144_spill] sm:$0xff] %v4623_v5  ;;  %v7371_v9 = vld [vmem:[#allocation32_spill] sm:$0xff]  ;;  %v512_v2 = vld [vmem:[%s3762_s27 + $0x598] sm:$0xff]  ;;  %v4635_v22 = vsub.f32 %v497_v19, %v753_v4  ;;  %v4637_v41 = vsub.f32 %v498_v40, %v754_v12  ;;  %v4639_v11 = vsub.f32 %v499_v39, %v755_v57 }
 0x10c   : > { %v4627_v10 = vmul.f32 %v7371_v9, %v7371_v9  ;;  %v513_v15 = vld [vmem:[%s3762_s27 + $0x5a0] sm:$0xff]  ;;  %v514_v31 = vld [vmem:[%s3762_s27 + $0x5a8] sm:$0xff]  ;;  %v756_v24 = vld [vmem:[%s3755_s26 + $0x538] sm:$0xff]  ;;  %7376 = vst [vmem:[#allocation148_spill] sm:$0xff] %v4643_v48 }
 0x10d   : > { %v757_v33 = vld [vmem:[%s3755_s26 + $0x540] sm:$0xff]  ;;  %v758_v30 = vld [vmem:[%s3755_s26 + $0x548] sm:$0xff]  ;;  %7373 = vst [vmem:[#allocation145_spill] sm:$0xff] %v4635_v22  ;;  %7374 = vst [vmem:[#allocation146_spill] sm:$0xff] %v4637_v41  ;;  %v4651_v4 = vsub.f32 %v500_v63, %v756_v24 }
 0x10e   : > { %7372 = vst [vmem:[#allocation32_spill] sm:$0xff] %v4627_v10  ;;  %7375 = vst [vmem:[#allocation147_spill] sm:$0xff] %v4639_v11  ;;  %v515_v20 = vld [vmem:[%s3762_s27 + $0x5b0] sm:$0xff]  ;;  %v516_v9 = vld [vmem:[%s3762_s27 + $0x5b8] sm:$0xff]  ;;  %v4653_v40 = vsub.f32 %v501_v29, %v757_v33  ;;  %v4655_v39 = vsub.f32 %v502_v28, %v758_v30 }
 0x10f   : > { %v517_v10 = vld [vmem:[%s3762_s27 + $0x5c0] sm:$0xff]  ;;  %v759_v5 = vld [vmem:[%s3755_s26 + $0x550] sm:$0xff]  ;;  %v760_v32 = vld [vmem:[%s3755_s26 + $0x558] sm:$0xff]  ;;  %7377 = vst [vmem:[#allocation149_spill] sm:$0xff] %v4651_v4 }
 0x110   : > { %v761_v19 = vld [vmem:[%s3755_s26 + $0x560] sm:$0xff]  ;;  %7378 = vst [vmem:[#allocation150_spill] sm:$0xff] %v4653_v40  ;;  %7379 = vst [vmem:[#allocation151_spill] sm:$0xff] %v4655_v39  ;;  %v7380_v12 = vld [vmem:[#allocation34_spill] sm:$0xff]  ;;  %v4667_v24 = vsub.f32 %v503_v56, %v759_v5  ;;  %v4669_v29 = vsub.f32 %v504_v59, %v760_v32  ;;  %v4691_v32 = vmul.f32 %v4059_v47, %v4059_v47 }
 0x111   : > { %v4659_v38 = vmul.f32 %v7380_v12, %v7380_v12  ;;  %v518_v57 = vld [vmem:[%s3762_s27 + $0x5c8] sm:$0xff]  ;;  %v519_v48 = vld [vmem:[%s3762_s27 + $0x5d0] sm:$0xff]  ;;  %v520_v11 = vld [vmem:[%s3762_s27 + $0x5d8] sm:$0xff]  ;;  %v4671_v28 = vsub.f32 %v505_v21, %v761_v19 }
 0x112   : > { %v762_v41 = vld [vmem:[%s3755_s26 + $0x568] sm:$0xff]  ;;  %v763_v22 = vld [vmem:[%s3755_s26 + $0x570] sm:$0xff]  ;;  %v764_v63 = vld [vmem:[%s3755_s26 + $0x578] sm:$0xff]  ;;  %7382 = vst [vmem:[#allocation152_spill] sm:$0xff] %v4669_v29 }
 0x113   : > { %7381 = vst [vmem:[#allocation34_spill] sm:$0xff] %v4659_v38  ;;  %7383 = vst [vmem:[#allocation153_spill] sm:$0xff] %v4671_v28  ;;  %v7384_v33 = vld [vmem:[#allocation35_spill] sm:$0xff]  ;;  %v522_v38 = vld [vmem:[%s3762_s27 + $0x5e8] sm:$0xff]  ;;  %v4683_v5 = vsub.f32 %v506_v54, %v762_v41  ;;  %v4685_v59 = vsub.f32 %v507_v37, %v763_v22  ;;  %v4687_v21 = vsub.f32 %v508_v43, %v764_v63 }
 0x114   : > { %v4675_v30 = vmul.f32 %v7384_v33, %v7384_v33  ;;  %v521_v12 = vld [vmem:[%s3762_s27 + $0x5e0] sm:$0xff]  ;;  %v523_v39 = vld [vmem:[%s3762_s27 + $0x5f0] sm:$0xff]  ;;  %v766_v4 = vld [vmem:[%s3755_s26 + $0x588] sm:$0xff]  ;;  %7389 = vst [vmem:[#allocation157_spill] sm:$0xff] %v4691_v32 }
 0x115   : > { %v765_v40 = vld [vmem:[%s3755_s26 + $0x580] sm:$0xff]  ;;  %v767_v56 = vld [vmem:[%s3755_s26 + $0x590] sm:$0xff]  ;;  %7386 = vst [vmem:[#allocation154_spill] sm:$0xff] %v4683_v5  ;;  %7387 = vst [vmem:[#allocation155_spill] sm:$0xff] %v4685_v59  ;;  %v4701_v37 = vsub.f32 %v510_v13, %v766_v4 }
 0x116   : > { %7385 = vst [vmem:[#allocation35_spill] sm:$0xff] %v4675_v30  ;;  %7388 = vst [vmem:[#allocation156_spill] sm:$0xff] %v4687_v21  ;;  %v524_v19 = vld [vmem:[%s3762_s27 + $0x5f8] sm:$0xff]  ;;  %v525_v33 = vld [vmem:[%s3762_s27 + $0x600] sm:$0xff]  ;;  %v4699_v41 = vsub.f32 %v509_v0, %v765_v40  ;;  %v4703_v43 = vsub.f32 %v511_v58, %v767_v56 }
 0x117   : > { %v526_v30 = vld [vmem:[%s3762_s27 + $0x608] sm:$0xff]  ;;  %v768_v28 = vld [vmem:[%s3755_s26 + $0x598] sm:$0xff]  ;;  %v769_v29 = vld [vmem:[%s3755_s26 + $0x5a0] sm:$0xff]  ;;  %7391 = vst [vmem:[#allocation159_spill] sm:$0xff] %v4701_v37 }
 0x118   : > { %v770_v54 = vld [vmem:[%s3755_s26 + $0x5a8] sm:$0xff]  ;;  %7390 = vst [vmem:[#allocation158_spill] sm:$0xff] %v4699_v41  ;;  %7392 = vst [vmem:[#allocation160_spill] sm:$0xff] %v4703_v43  ;;  %v7393_v22 = vld [vmem:[#allocation37_spill] sm:$0xff]  ;;  %v4715_v40 = vsub.f32 %v512_v2, %v768_v28  ;;  %v4717_v13 = vsub.f32 %v513_v15, %v769_v29  ;;  %v4739_v29 = vmul.f32 %v4075_v3, %v4075_v3 }
 0x119   : > { %v4707_v47 = vmul.f32 %v7393_v22, %v7393_v22  ;;  %v527_v63 = vld [vmem:[%s3762_s27 + $0x610] sm:$0xff]  ;;  %v528_v32 = vld [vmem:[%s3762_s27 + $0x618] sm:$0xff]  ;;  %v529_v21 = vld [vmem:[%s3762_s27 + $0x620] sm:$0xff]  ;;  %v4719_v58 = vsub.f32 %v514_v31, %v770_v54 }
 0x11a   : > { %v771_v59 = vld [vmem:[%s3755_s26 + $0x5b0] sm:$0xff]  ;;  %v772_v5 = vld [vmem:[%s3755_s26 + $0x5b8] sm:$0xff]  ;;  %v773_v0 = vld [vmem:[%s3755_s26 + $0x5c0] sm:$0xff]  ;;  %7395 = vst [vmem:[#allocation161_spill] sm:$0xff] %v4717_v13 }
 0x11b   : > { %7394 = vst [vmem:[#allocation37_spill] sm:$0xff] %v4707_v47  ;;  %7396 = vst [vmem:[#allocation162_spill] sm:$0xff] %v4719_v58  ;;  %v7397_v4 = vld [vmem:[#allocation38_spill] sm:$0xff]  ;;  %v530_v22 = vld [vmem:[%s3762_s27 + $0x628] sm:$0xff]  ;;  %v4731_v28 = vsub.f32 %v515_v20, %v771_v59  ;;  %v4733_v15 = vsub.f32 %v516_v9, %v772_v5  ;;  %v4735_v31 = vsub.f32 %v517_v10, %v773_v0 }
 0x11c   : > { %v4723_v56 = vmul.f32 %v7397_v4, %v7397_v4  ;;  %v531_v47 = vld [vmem:[%s3762_s27 + $0x630] sm:$0xff]  ;;  %v532_v43 = vld [vmem:[%s3762_s27 + $0x638] sm:$0xff]  ;;  %v774_v37 = vld [vmem:[%s3755_s26 + $0x5c8] sm:$0xff]  ;;  %7402 = vst [vmem:[#allocation166_spill] sm:$0xff] %v4739_v29 }
 0x11d   : > { %v775_v41 = vld [vmem:[%s3755_s26 + $0x5d0] sm:$0xff]  ;;  %v776_v2 = vld [vmem:[%s3755_s26 + $0x5d8] sm:$0xff]  ;;  %7399 = vst [vmem:[#allocation163_spill] sm:$0xff] %v4731_v28  ;;  %7400 = vst [vmem:[#allocation164_spill] sm:$0xff] %v4733_v15  ;;  %v4747_v59 = vsub.f32 %v518_v57, %v774_v37 }
 0x11e   : > { %7398 = vst [vmem:[#allocation38_spill] sm:$0xff] %v4723_v56  ;;  %7401 = vst [vmem:[#allocation165_spill] sm:$0xff] %v4735_v31  ;;  %v533_v54 = vld [vmem:[%s3762_s27 + $0x640] sm:$0xff]  ;;  %v534_v4 = vld [vmem:[%s3762_s27 + $0x648] sm:$0xff]  ;;  %v4749_v9 = vsub.f32 %v519_v48, %v775_v41  ;;  %v4751_v10 = vsub.f32 %v520_v11, %v776_v2 }
 0x11f   : > { %v535_v56 = vld [vmem:[%s3762_s27 + $0x650] sm:$0xff]  ;;  %v777_v58 = vld [vmem:[%s3755_s26 + $0x5e0] sm:$0xff]  ;;  %v778_v13 = vld [vmem:[%s3755_s26 + $0x5e8] sm:$0xff]  ;;  %7403 = vst [vmem:[#allocation167_spill] sm:$0xff] %v4747_v59 }
 0x120   : > { %v779_v20 = vld [vmem:[%s3755_s26 + $0x5f0] sm:$0xff]  ;;  %7404 = vst [vmem:[#allocation168_spill] sm:$0xff] %v4749_v9  ;;  %7405 = vst [vmem:[#allocation169_spill] sm:$0xff] %v4751_v10  ;;  %v7406_v5 = vld [vmem:[#allocation40_spill] sm:$0xff]  ;;  %v4763_v37 = vsub.f32 %v521_v12, %v777_v58  ;;  %v4765_v48 = vsub.f32 %v522_v38, %v778_v13  ;;  %v4787_v13 = vmul.f32 %v4091_v23, %v4091_v23 }
 0x121   : > { %v4755_v3 = vmul.f32 %v7406_v5, %v7406_v5  ;;  %v536_v0 = vld [vmem:[%s3762_s27 + $0x658] sm:$0xff]  ;;  %v537_v29 = vld [vmem:[%s3762_s27 + $0x660] sm:$0xff]  ;;  %v538_v31 = vld [vmem:[%s3762_s27 + $0x668] sm:$0xff]  ;;  %v4767_v11 = vsub.f32 %v523_v39, %v779_v20 }
 0x122   : > { %v780_v15 = vld [vmem:[%s3755_s26 + $0x5f8] sm:$0xff]  ;;  %v781_v28 = vld [vmem:[%s3755_s26 + $0x600] sm:$0xff]  ;;  %v782_v57 = vld [vmem:[%s3755_s26 + $0x608] sm:$0xff]  ;;  %7408 = vst [vmem:[#allocation170_spill] sm:$0xff] %v4765_v48 }
 0x123   : > { %7407 = vst [vmem:[#allocation40_spill] sm:$0xff] %v4755_v3  ;;  %7409 = vst [vmem:[#allocation171_spill] sm:$0xff] %v4767_v11  ;;  %v7410_v41 = vld [vmem:[#allocation41_spill] sm:$0xff]  ;;  %v540_v3 = vld [vmem:[%s3762_s27 + $0x678] sm:$0xff]  ;;  %v4779_v58 = vsub.f32 %v524_v19, %v780_v15  ;;  %v4781_v38 = vsub.f32 %v525_v33, %v781_v28  ;;  %v4783_v39 = vsub.f32 %v526_v30, %v782_v57 }
 0x124   : > { %v4771_v2 = vmul.f32 %v7410_v41, %v7410_v41  ;;  %v539_v5 = vld [vmem:[%s3762_s27 + $0x670] sm:$0xff]  ;;  %v541_v10 = vld [vmem:[%s3762_s27 + $0x680] sm:$0xff]  ;;  %v784_v59 = vld [vmem:[%s3755_s26 + $0x618] sm:$0xff]  ;;  %7415 = vst [vmem:[#allocation175_spill] sm:$0xff] %v4787_v13 }
 0x125   : > { %v783_v9 = vld [vmem:[%s3755_s26 + $0x610] sm:$0xff]  ;;  %v785_v12 = vld [vmem:[%s3755_s26 + $0x620] sm:$0xff]  ;;  %7412 = vst [vmem:[#allocation172_spill] sm:$0xff] %v4779_v58  ;;  %7413 = vst [vmem:[#allocation173_spill] sm:$0xff] %v4781_v38  ;;  %v4797_v33 = vsub.f32 %v528_v32, %v784_v59 }
 0x126   : > { %7411 = vst [vmem:[#allocation41_spill] sm:$0xff] %v4771_v2  ;;  %7414 = vst [vmem:[#allocation174_spill] sm:$0xff] %v4783_v39  ;;  %v542_v20 = vld [vmem:[%s3762_s27 + $0x688] sm:$0xff]  ;;  %v543_v41 = vld [vmem:[%s3762_s27 + $0x690] sm:$0xff]  ;;  %v4795_v15 = vsub.f32 %v527_v63, %v783_v9  ;;  %v4799_v30 = vsub.f32 %v529_v21, %v785_v12 }
 0x127   : > { %v544_v2 = vld [vmem:[%s3762_s27 + $0x698] sm:$0xff]  ;;  %v786_v11 = vld [vmem:[%s3755_s26 + $0x628] sm:$0xff]  ;;  %v787_v48 = vld [vmem:[%s3755_s26 + $0x630] sm:$0xff]  ;;  %7417 = vst [vmem:[#allocation177_spill] sm:$0xff] %v4797_v33 }
 0x128   : > { %v788_v19 = vld [vmem:[%s3755_s26 + $0x638] sm:$0xff]  ;;  %7416 = vst [vmem:[#allocation176_spill] sm:$0xff] %v4795_v15  ;;  %7418 = vst [vmem:[#allocation178_spill] sm:$0xff] %v4799_v30  ;;  %v7419_v28 = vld [vmem:[#allocation43_spill] sm:$0xff]  ;;  %v4811_v9 = vsub.f32 %v530_v22, %v786_v11  ;;  %v4813_v32 = vsub.f32 %v531_v47, %v787_v48  ;;  %v4835_v48 = vmul.f32 %v4107_v49, %v4107_v49 }
 0x129   : > { %v4803_v23 = vmul.f32 %v7419_v28, %v7419_v28  ;;  %v545_v57 = vld [vmem:[%s3762_s27 + $0x6a0] sm:$0xff]  ;;  %v546_v13 = vld [vmem:[%s3762_s27 + $0x6a8] sm:$0xff]  ;;  %v547_v39 = vld [vmem:[%s3762_s27 + $0x6b0] sm:$0xff]  ;;  %v4815_v21 = vsub.f32 %v532_v43, %v788_v19 }
 0x12a   : > { %v789_v38 = vld [vmem:[%s3755_s26 + $0x640] sm:$0xff]  ;;  %v790_v58 = vld [vmem:[%s3755_s26 + $0x648] sm:$0xff]  ;;  %v791_v63 = vld [vmem:[%s3755_s26 + $0x650] sm:$0xff]  ;;  %7421 = vst [vmem:[#allocation179_spill] sm:$0xff] %v4813_v32 }
 0x12b   : > { %7420 = vst [vmem:[#allocation43_spill] sm:$0xff] %v4803_v23  ;;  %7422 = vst [vmem:[#allocation180_spill] sm:$0xff] %v4815_v21  ;;  %v7423_v59 = vld [vmem:[#allocation44_spill] sm:$0xff]  ;;  %v548_v28 = vld [vmem:[%s3762_s27 + $0x6b8] sm:$0xff]  ;;  %v4827_v11 = vsub.f32 %v533_v54, %v789_v38  ;;  %v4829_v47 = vsub.f32 %v534_v4, %v790_v58  ;;  %v4831_v43 = vsub.f32 %v535_v56, %v791_v63 }
 0x12c   : > { %v4819_v12 = vmul.f32 %v7423_v59, %v7423_v59  ;;  %v549_v23 = vld [vmem:[%s3762_s27 + $0x6c0] sm:$0xff]  ;;  %v550_v30 = vld [vmem:[%s3762_s27 + $0x6c8] sm:$0xff]  ;;  %v792_v33 = vld [vmem:[%s3755_s26 + $0x658] sm:$0xff]  ;;  %7428 = vst [vmem:[#allocation184_spill] sm:$0xff] %v4835_v48 }
 0x12d   : > { %v793_v15 = vld [vmem:[%s3755_s26 + $0x660] sm:$0xff]  ;;  %v794_v22 = vld [vmem:[%s3755_s26 + $0x668] sm:$0xff]  ;;  %7425 = vst [vmem:[#allocation181_spill] sm:$0xff] %v4827_v11  ;;  %7426 = vst [vmem:[#allocation182_spill] sm:$0xff] %v4829_v47  ;;  %v4843_v38 = vsub.f32 %v536_v0, %v792_v33 }
 0x12e   : > { %7424 = vst [vmem:[#allocation44_spill] sm:$0xff] %v4819_v12  ;;  %7427 = vst [vmem:[#allocation183_spill] sm:$0xff] %v4831_v43  ;;  %v551_v19 = vld [vmem:[%s3762_s27 + $0x6d0] sm:$0xff]  ;;  %v552_v59 = vld [vmem:[%s3762_s27 + $0x6d8] sm:$0xff]  ;;  %v4845_v4 = vsub.f32 %v537_v29, %v793_v15  ;;  %v4847_v56 = vsub.f32 %v538_v31, %v794_v22 }
 0x12f   : > { %v553_v12 = vld [vmem:[%s3762_s27 + $0x6e0] sm:$0xff]  ;;  %v795_v21 = vld [vmem:[%s3755_s26 + $0x670] sm:$0xff]  ;;  %v796_v32 = vld [vmem:[%s3755_s26 + $0x678] sm:$0xff]  ;;  %7429 = vst [vmem:[#allocation185_spill] sm:$0xff] %v4843_v38 }
 0x130   : > { %v797_v54 = vld [vmem:[%s3755_s26 + $0x680] sm:$0xff]  ;;  %7430 = vst [vmem:[#allocation186_spill] sm:$0xff] %v4845_v4  ;;  %7431 = vst [vmem:[#allocation187_spill] sm:$0xff] %v4847_v56  ;;  %v7432_v58 = vld [vmem:[#allocation46_spill] sm:$0xff]  ;;  %v4859_v33 = vsub.f32 %v539_v5, %v795_v21  ;;  %v4861_v29 = vsub.f32 %v540_v3, %v796_v32  ;;  %v4883_v32 = vmul.f32 %v4123_v50, %v4123_v50 }
 0x131   : > { %v4851_v49 = vmul.f32 %v7432_v58, %v7432_v58  ;;  %v554_v63 = vld [vmem:[%s3762_s27 + $0x6e8] sm:$0xff]  ;;  %v555_v48 = vld [vmem:[%s3762_s27 + $0x6f0] sm:$0xff]  ;;  %v556_v43 = vld [vmem:[%s3762_s27 + $0x6f8] sm:$0xff]  ;;  %v4863_v31 = vsub.f32 %v541_v10, %v797_v54 }
 0x132   : > { %v798_v47 = vld [vmem:[%s3755_s26 + $0x688] sm:$0xff]  ;;  %v799_v11 = vld [vmem:[%s3755_s26 + $0x690] sm:$0xff]  ;;  %v800_v0 = vld [vmem:[%s3755_s26 + $0x698] sm:$0xff]  ;;  %7434 = vst [vmem:[#allocation188_spill] sm:$0xff] %v4861_v29 }
 0x133   : > { %7433 = vst [vmem:[#allocation46_spill] sm:$0xff] %v4851_v49  ;;  %7435 = vst [vmem:[#allocation189_spill] sm:$0xff] %v4863_v31  ;;  %v7436_v15 = vld [vmem:[#allocation47_spill] sm:$0xff]  ;;  %v558_v49 = vld [vmem:[%s3762_s27 + $0x708] sm:$0xff]  ;;  %v4875_v21 = vsub.f32 %v542_v20, %v798_v47  ;;  %v4877_v3 = vsub.f32 %v543_v41, %v799_v11  ;;  %v4879_v10 = vsub.f32 %v544_v2, %v800_v0 }
 0x134   : > { %v4867_v22 = vmul.f32 %v7436_v15, %v7436_v15  ;;  %v557_v58 = vld [vmem:[%s3762_s27 + $0x700] sm:$0xff]  ;;  %v559_v56 = vld [vmem:[%s3762_s27 + $0x710] sm:$0xff]  ;;  %v802_v38 = vld [vmem:[%s3755_s26 + $0x6a8] sm:$0xff]  ;;  %7441 = vst [vmem:[#allocation193_spill] sm:$0xff] %v4883_v32 }
 0x135   : > { %v801_v4 = vld [vmem:[%s3755_s26 + $0x6a0] sm:$0xff]  ;;  %v803_v5 = vld [vmem:[%s3755_s26 + $0x6b0] sm:$0xff]  ;;  %7438 = vst [vmem:[#allocation190_spill] sm:$0xff] %v4875_v21  ;;  %7439 = vst [vmem:[#allocation191_spill] sm:$0xff] %v4877_v3  ;;  %v4893_v41 = vsub.f32 %v546_v13, %v802_v38 }
 0x136   : > { %7437 = vst [vmem:[#allocation47_spill] sm:$0xff] %v4867_v22  ;;  %7440 = vst [vmem:[#allocation192_spill] sm:$0xff] %v4879_v10  ;;  %v560_v54 = vld [vmem:[%s3762_s27 + $0x718] sm:$0xff]  ;;  %v561_v15 = vld [vmem:[%s3762_s27 + $0x720] sm:$0xff]  ;;  %v4891_v47 = vsub.f32 %v545_v57, %v801_v4  ;;  %v4895_v2 = vsub.f32 %v547_v39, %v803_v5 }
 0x137   : > { %v562_v22 = vld [vmem:[%s3762_s27 + $0x728] sm:$0xff]  ;;  %v804_v31 = vld [vmem:[%s3755_s26 + $0x6b8] sm:$0xff]  ;;  %v805_v29 = vld [vmem:[%s3755_s26 + $0x6c0] sm:$0xff]  ;;  %7443 = vst [vmem:[#allocation195_spill] sm:$0xff] %v4893_v41 }
 0x138   : > { %v806_v20 = vld [vmem:[%s3755_s26 + $0x6c8] sm:$0xff]  ;;  %7442 = vst [vmem:[#allocation194_spill] sm:$0xff] %v4891_v47  ;;  %7444 = vst [vmem:[#allocation196_spill] sm:$0xff] %v4895_v2  ;;  %v7445_v11 = vld [vmem:[#allocation49_spill] sm:$0xff]  ;;  %v4907_v4 = vsub.f32 %v548_v28, %v804_v31  ;;  %v4909_v13 = vsub.f32 %v549_v23, %v805_v29  ;;  %v4931_v29 = vmul.f32 %v4139_v51, %v4139_v51 }
 0x139   : > { %v4899_v50 = vmul.f32 %v7445_v11, %v7445_v11  ;;  %v563_v0 = vld [vmem:[%s3762_s27 + $0x730] sm:$0xff]  ;;  %v564_v32 = vld [vmem:[%s3762_s27 + $0x738] sm:$0xff]  ;;  %v565_v10 = vld [vmem:[%s3762_s27 + $0x740] sm:$0xff]  ;;  %v4911_v39 = vsub.f32 %v550_v30, %v806_v20 }
 0x13a   : > { %v807_v3 = vld [vmem:[%s3755_s26 + $0x6d0] sm:$0xff]  ;;  %v808_v21 = vld [vmem:[%s3755_s26 + $0x6d8] sm:$0xff]  ;;  %v809_v57 = vld [vmem:[%s3755_s26 + $0x6e0] sm:$0xff]  ;;  %7447 = vst [vmem:[#allocation197_spill] sm:$0xff] %v4909_v13 }
 0x13b   : > { %7446 = vst [vmem:[#allocation49_spill] sm:$0xff] %v4899_v50  ;;  %7448 = vst [vmem:[#allocation198_spill] sm:$0xff] %v4911_v39  ;;  %v7449_v38 = vld [vmem:[#allocation50_spill] sm:$0xff]  ;;  %v566_v11 = vld [vmem:[%s3762_s27 + $0x748] sm:$0xff]  ;;  %v4923_v31 = vsub.f32 %v551_v19, %v807_v3  ;;  %v4925_v23 = vsub.f32 %v552_v59, %v808_v21  ;;  %v4927_v30 = vsub.f32 %v553_v12, %v809_v57 }
 0x13c   : > { %v4915_v5 = vmul.f32 %v7449_v38, %v7449_v38  ;;  %v567_v50 = vld [vmem:[%s3762_s27 + $0x750] sm:$0xff]  ;;  %v568_v2 = vld [vmem:[%s3762_s27 + $0x758] sm:$0xff]  ;;  %v810_v41 = vld [vmem:[%s3755_s26 + $0x6e8] sm:$0xff]  ;;  %7454 = vst [vmem:[#allocation202_spill] sm:$0xff] %v4931_v29 }
 0x13d   : > { %v811_v47 = vld [vmem:[%s3755_s26 + $0x6f0] sm:$0xff]  ;;  %v812_v28 = vld [vmem:[%s3755_s26 + $0x6f8] sm:$0xff]  ;;  %7451 = vst [vmem:[#allocation199_spill] sm:$0xff] %v4923_v31  ;;  %7452 = vst [vmem:[#allocation200_spill] sm:$0xff] %v4925_v23  ;;  %v4939_v3 = vsub.f32 %v554_v63, %v810_v41 }
 0x13e   : > { %7450 = vst [vmem:[#allocation50_spill] sm:$0xff] %v4915_v5  ;;  %7453 = vst [vmem:[#allocation201_spill] sm:$0xff] %v4927_v30  ;;  %v569_v20 = vld [vmem:[%s3762_s27 + $0x760] sm:$0xff]  ;;  %v570_v38 = vld [vmem:[%s3762_s27 + $0x768] sm:$0xff]  ;;  %v4941_v59 = vsub.f32 %v555_v48, %v811_v47  ;;  %v4943_v12 = vsub.f32 %v556_v43, %v812_v28 }
 0x13f   : > { %v571_v5 = vld [vmem:[%s3762_s27 + $0x770] sm:$0xff]  ;;  %v813_v39 = vld [vmem:[%s3755_s26 + $0x700] sm:$0xff]  ;;  %v814_v13 = vld [vmem:[%s3755_s26 + $0x708] sm:$0xff]  ;;  %7455 = vst [vmem:[#allocation203_spill] sm:$0xff] %v4939_v3 }
 0x140   : > { %v815_v19 = vld [vmem:[%s3755_s26 + $0x710] sm:$0xff]  ;;  %7456 = vst [vmem:[#allocation204_spill] sm:$0xff] %v4941_v59  ;;  %7457 = vst [vmem:[#allocation205_spill] sm:$0xff] %v4943_v12  ;;  %v7458_v21 = vld [vmem:[#allocation52_spill] sm:$0xff]  ;;  %v4955_v41 = vsub.f32 %v557_v58, %v813_v39  ;;  %v4957_v48 = vsub.f32 %v558_v49, %v814_v13  ;;  %v4979_v13 = vmul.f32 %v4155_v52, %v4155_v52 }
 0x141   : > { %v4947_v51 = vmul.f32 %v7458_v21, %v7458_v21  ;;  %v572_v57 = vld [vmem:[%s3762_s27 + $0x778] sm:$0xff]  ;;  %v573_v29 = vld [vmem:[%s3762_s27 + $0x780] sm:$0xff]  ;;  %v574_v30 = vld [vmem:[%s3762_s27 + $0x788] sm:$0xff]  ;;  %v4959_v43 = vsub.f32 %v559_v56, %v815_v19 }
 0x142   : > { %v816_v23 = vld [vmem:[%s3755_s26 + $0x718] sm:$0xff]  ;;  %v817_v31 = vld [vmem:[%s3755_s26 + $0x720] sm:$0xff]  ;;  %v818_v63 = vld [vmem:[%s3755_s26 + $0x728] sm:$0xff]  ;;  %7460 = vst [vmem:[#allocation206_spill] sm:$0xff] %v4957_v48 }
 0x143   : > { %7459 = vst [vmem:[#allocation52_spill] sm:$0xff] %v4947_v51  ;;  %7461 = vst [vmem:[#allocation207_spill] sm:$0xff] %v4959_v43  ;;  %v7462_v47 = vld [vmem:[#allocation53_spill] sm:$0xff]  ;;  %v576_v51 = vld [vmem:[%s3762_s27 + $0x798] sm:$0xff]  ;;  %v4971_v39 = vsub.f32 %v560_v54, %v816_v23  ;;  %v4973_v49 = vsub.f32 %v561_v15, %v817_v31  ;;  %v4975_v56 = vsub.f32 %v562_v22, %v818_v63 }
 0x144   : > { %v4963_v28 = vmul.f32 %v7462_v47, %v7462_v47  ;;  %v575_v21 = vld [vmem:[%s3762_s27 + $0x790] sm:$0xff]  ;;  %v577_v12 = vld [vmem:[%s3762_s27 + $0x7a0] sm:$0xff]  ;;  %v820_v3 = vld [vmem:[%s3755_s26 + $0x738] sm:$0xff]  ;;  %7467 = vst [vmem:[#allocation211_spill] sm:$0xff] %v4979_v13 }
 0x145   : > { %v819_v59 = vld [vmem:[%s3755_s26 + $0x730] sm:$0xff]  ;;  %v821_v58 = vld [vmem:[%s3755_s26 + $0x740] sm:$0xff]  ;;  %7464 = vst [vmem:[#allocation208_spill] sm:$0xff] %v4971_v39  ;;  %7465 = vst [vmem:[#allocation209_spill] sm:$0xff] %v4973_v49  ;;  %v4989_v15 = vsub.f32 %v564_v32, %v820_v3 }
 0x146   : > { %7463 = vst [vmem:[#allocation53_spill] sm:$0xff] %v4963_v28  ;;  %7466 = vst [vmem:[#allocation210_spill] sm:$0xff] %v4975_v56  ;;  %v578_v19 = vld [vmem:[%s3762_s27 + $0x7a8] sm:$0xff]  ;;  %v579_v47 = vld [vmem:[%s3762_s27 + $0x7b0] sm:$0xff]  ;;  %v4987_v23 = vsub.f32 %v563_v0, %v819_v59  ;;  %v4991_v22 = vsub.f32 %v565_v10, %v821_v58 }
 0x147   : > { %v580_v28 = vld [vmem:[%s3762_s27 + $0x7b8] sm:$0xff]  ;;  %v822_v43 = vld [vmem:[%s3755_s26 + $0x748] sm:$0xff]  ;;  %v823_v48 = vld [vmem:[%s3755_s26 + $0x750] sm:$0xff]  ;;  %7469 = vst [vmem:[#allocation213_spill] sm:$0xff] %v4989_v15 }
 0x148   : > { %v824_v54 = vld [vmem:[%s3755_s26 + $0x758] sm:$0xff]  ;;  %7468 = vst [vmem:[#allocation212_spill] sm:$0xff] %v4987_v23  ;;  %7470 = vst [vmem:[#allocation214_spill] sm:$0xff] %v4991_v22  ;;  %v7471_v31 = vld [vmem:[#allocation55_spill] sm:$0xff]  ;;  %v5003_v59 = vsub.f32 %v566_v11, %v822_v43  ;;  %v5005_v32 = vsub.f32 %v567_v50, %v823_v48  ;;  %v5027_v48 = vmul.f32 %v4171_v60, %v4171_v60 }
 0x149   : > { %v4995_v52 = vmul.f32 %v7471_v31, %v7471_v31  ;;  %v581_v63 = vld [vmem:[%s3762_s27 + $0x7c0] sm:$0xff]  ;;  %v582_v13 = vld [vmem:[%s3762_s27 + $0x7c8] sm:$0xff]  ;;  %v583_v56 = vld [vmem:[%s3762_s27 + $0x7d0] sm:$0xff]  ;;  %v5007_v10 = vsub.f32 %v568_v2, %v824_v54 }
 0x14a   : > { %v825_v49 = vld [vmem:[%s3755_s26 + $0x760] sm:$0xff]  ;;  %v826_v39 = vld [vmem:[%s3755_s26 + $0x768] sm:$0xff]  ;;  %v827_v0 = vld [vmem:[%s3755_s26 + $0x770] sm:$0xff]  ;;  %7473 = vst [vmem:[#allocation215_spill] sm:$0xff] %v5003_v59 }
 0x14b   : > { %7472 = vst [vmem:[#allocation55_spill] sm:$0xff] %v4995_v52  ;;  %7474 = vst [vmem:[#allocation216_spill] sm:$0xff] %v5005_v32  ;;  %v7476_v3 = vld [vmem:[#allocation56_spill] sm:$0xff]  ;;  %v584_v31 = vld [vmem:[%s3762_s27 + $0x7d8] sm:$0xff]  ;;  %v5019_v43 = vsub.f32 %v569_v20, %v825_v49  ;;  %v5021_v50 = vsub.f32 %v570_v38, %v826_v39  ;;  %v5023_v2 = vsub.f32 %v571_v5, %v827_v0 }
 0x14c   : > { %7475 = vst [vmem:[#allocation217_spill] sm:$0xff] %v5007_v10  ;;  %v5011_v58 = vmul.f32 %v7476_v3, %v7476_v3  ;;  %v585_v52 = vld [vmem:[%s3762_s27 + $0x7e0] sm:$0xff]  ;;  %v586_v22 = vld [vmem:[%s3762_s27 + $0x7e8] sm:$0xff]  ;;  %v828_v15 = vld [vmem:[%s3755_s26 + $0x778] sm:$0xff] }
 0x14d   : > { %v829_v23 = vld [vmem:[%s3755_s26 + $0x780] sm:$0xff]  ;;  %v830_v11 = vld [vmem:[%s3755_s26 + $0x788] sm:$0xff]  ;;  %7478 = vst [vmem:[#allocation218_spill] sm:$0xff] %v5023_v2  ;;  %7479 = vst [vmem:[#allocation219_spill] sm:$0xff] %v5027_v48  ;;  %v5034_v59 = vsub.f32 %v572_v57, %v828_v15 }
 0x14e   : > { %7477 = vst [vmem:[#allocation56_spill] sm:$0xff] %v5011_v58  ;;  %v587_v54 = vld [vmem:[%s3762_s27 + $0x7f0] sm:$0xff]  ;;  %v588_v3 = vld [vmem:[%s3762_s27 + $0x7f8] sm:$0xff]  ;;  %v833_v32 = vld [vmem:[%s3755_s26 + $0x7a0] sm:$0xff]  ;;  %v5036_v20 = vsub.f32 %v573_v29, %v829_v23  ;;  %v5038_v38 = vsub.f32 %v574_v30, %v830_v11 }
 0x14f   : > { %v831_v58 = vld [vmem:[%s3755_s26 + $0x790] sm:$0xff]  ;;  %v832_v10 = vld [vmem:[%s3755_s26 + $0x798] sm:$0xff]  ;;  %v834_v60 = vld [vmem:[%s3755_s26 + $0x7a8] sm:$0xff]  ;;  %v5051_v57 = vsub.f32 %v577_v12, %v833_v32 }
 0x150   : > { %7480 = vst [vmem:[#allocation220_spill] sm:$0xff] %v5038_v38  ;;  %v7481_v5 = vld [vmem:[#allocation58_spill] sm:$0xff]  ;;  %v835_v49 = vld [vmem:[%s3755_s26 + $0x7b0] sm:$0xff]  ;;  %v5047_v48 = vsub.f32 %v575_v21, %v831_v58  ;;  %v5049_v2 = vsub.f32 %v576_v51, %v832_v10  ;;  %v7483_v29 = vld [vmem:[#allocation59_spill] sm:$0xff]  ;;  %v5068_v51 = vmul.f32 %v4187_v61, %v4187_v61 }
 0x151   : > { %v5042_v39 = vmul.f32 %v7481_v5, %v7481_v5  ;;  %v836_v0 = vld [vmem:[%s3755_s26 + $0x7b8] sm:$0xff]  ;;  %v5055_v30 = vmul.f32 %v7483_v29, %v7483_v29  ;;  %v837_v23 = vld [vmem:[%s3755_s26 + $0x7c0] sm:$0xff]  ;;  %v838_v15 = vld [vmem:[%s3755_s26 + $0x7c8] sm:$0xff]  ;;  %v5060_v5 = vsub.f32 %v578_v19, %v834_v60 }
 0x152   : > { %v839_v11 = vld [vmem:[%s3755_s26 + $0x7d0] sm:$0xff]  ;;  %v5064_v38 = vsub.f32 %v580_v28, %v836_v0  ;;  %v840_v12 = vld [vmem:[%s3755_s26 + $0x7d8] sm:$0xff]  ;;  %v841_v21 = vld [vmem:[%s3755_s26 + $0x7e0] sm:$0xff]  ;;  %v5073_v10 = vsub.f32 %v581_v63, %v837_v23  ;;  %v5075_v58 = vsub.f32 %v582_v13, %v838_v15  ;;  %v5113_v15 = vmul.f32 %v4219_v6, %v4219_v6 }
 0x153   : > { %7482 = vst [vmem:[#allocation58_spill] sm:$0xff] %v5042_v39  ;;  %7484 = vst [vmem:[#allocation59_spill] sm:$0xff] %v5055_v30  ;;  %v5062_v39 = vsub.f32 %v579_v47, %v835_v49  ;;  %v842_v32 = vld [vmem:[%s3755_s26 + $0x7e8] sm:$0xff]  ;;  %v5077_v29 = vsub.f32 %v583_v56, %v839_v11  ;;  %v7485_v30 = vld [vmem:[#allocation61_spill] sm:$0xff]  ;;  %v5085_v60 = vsub.f32 %v584_v31, %v840_v12 }
 0x154   : > { %v5081_v19 = vmul.f32 %v7485_v30, %v7485_v30  ;;  %v843_v47 = vld [vmem:[%s3755_s26 + $0x7f0] sm:$0xff]  ;;  %v844_v28 = vld [vmem:[%s3755_s26 + $0x7f8] sm:$0xff]  ;;  %v5087_v49 = vsub.f32 %v585_v52, %v841_v21  ;;  %v5089_v61 = vsub.f32 %v586_v22, %v842_v32  ;;  %v5101_v30 = vmul.f32 %v4203_v62, %v4203_v62  ;;  %v7487_v23 = vld [vmem:[#allocation64_spill] sm:$0xff] }
 0x155   : > { %v7486_v0 = vld [vmem:[#allocation62_spill] sm:$0xff]  ;;  %v5095_v13 = vsub.f32 %v587_v54, %v843_v47  ;;  %v5097_v56 = vsub.f32 %v588_v3, %v844_v28  ;;  %v5105_v31 = vmul.f32 %v7487_v23, %v7487_v23  ;;  %v7488_v52 = vld [vmem:[#allocation65_spill] sm:$0xff]  ;;  %v7489_v54 = vld [vmem:[#allocation67_spill] sm:$0xff]  ;;  %v5125_v12 = vmul.f32 %v4235_v7, %v4235_v7 }
 0x156   : > { %v5093_v63 = vmul.f32 %v7486_v0, %v7486_v0  ;;  %v5109_v22 = vmul.f32 %v7488_v52, %v7488_v52  ;;  %v5117_v3 = vmul.f32 %v7489_v54, %v7489_v54  ;;  %v7490_v11 = vld [vmem:[#allocation68_spill] sm:$0xff]  ;;  %v7491_v21 = vld [vmem:[#allocation70_spill] sm:$0xff]  ;;  %v7492_v47 = vld [vmem:[#allocation71_spill] sm:$0xff]  ;;  %v5137_v28 = vmul.f32 %v4251_v8, %v4251_v8 }
 0x157   : > { %v5121_v62 = vmul.f32 %v7490_v11, %v7490_v11  ;;  %v5129_v32 = vmul.f32 %v7491_v21, %v7491_v21  ;;  %v5133_v6 = vmul.f32 %v7492_v47, %v7492_v47  ;;  %v7493_v0 = vld [vmem:[#allocation73_spill] sm:$0xff]  ;;  %v7495_v52 = vld [vmem:[#allocation74_spill] sm:$0xff]  ;;  %v5149_v54 = vmul.f32 %v4267_v16, %v4267_v16  ;;  %v7497_v11 = vld [vmem:[#allocation76_spill] sm:$0xff] }
 0x158   : > { %v5141_v23 = vmul.f32 %v7493_v0, %v7493_v0  ;;  %v5145_v7 = vmul.f32 %v7495_v52, %v7495_v52  ;;  %v5153_v21 = vmul.f32 %v7497_v11, %v7497_v11  ;;  %v7499_v47 = vld [vmem:[#allocation77_spill] sm:$0xff]  ;;  %v5161_v0 = vmul.f32 %v4283_v17, %v4283_v17 }
 0x159   : > { %v5157_v8 = vmul.f32 %v7499_v47, %v7499_v47  ;;  %v5173_v11 = vmul.f32 %v4299_v18, %v4299_v18 }
 0x15a   : > { %7494 = vst [vmem:[#allocation61_spill] sm:$0xff] %v5141_v23  ;;  %7496 = vst [vmem:[#allocation62_spill] sm:$0xff] %v5145_v7  ;;  %v7501_v23 = vld [vmem:[#allocation79_spill] sm:$0xff]  ;;  %v7503_v7 = vld [vmem:[#allocation80_spill] sm:$0xff] }
 0x15b   : > { %7498 = vst [vmem:[#allocation64_spill] sm:$0xff] %v5153_v21  ;;  %7500 = vst [vmem:[#allocation65_spill] sm:$0xff] %v5157_v8  ;;  %v5165_v52 = vmul.f32 %v7501_v23, %v7501_v23  ;;  %v5169_v16 = vmul.f32 %v7503_v7, %v7503_v7  ;;  %v7505_v21 = vld [vmem:[#allocation82_spill] sm:$0xff]  ;;  %v7507_v8 = vld [vmem:[#allocation83_spill] sm:$0xff]  ;;  %v5185_v23 = vmul.f32 %v4315_v25, %v4315_v25 }
 0x15c   : > { %v5177_v47 = vmul.f32 %v7505_v21, %v7505_v21  ;;  %v5181_v17 = vmul.f32 %v7507_v8, %v7507_v8  ;;  %v5197_v21 = vmul.f32 %v4331_v26, %v4331_v26 }
 0x15d   : > { %7502 = vst [vmem:[#allocation67_spill] sm:$0xff] %v5165_v52  ;;  %7504 = vst [vmem:[#allocation68_spill] sm:$0xff] %v5169_v16  ;;  %v7509_v52 = vld [vmem:[#allocation85_spill] sm:$0xff]  ;;  %v7511_v16 = vld [vmem:[#allocation86_spill] sm:$0xff] }
 0x15e   : > { %7506 = vst [vmem:[#allocation70_spill] sm:$0xff] %v5177_v47  ;;  %7508 = vst [vmem:[#allocation71_spill] sm:$0xff] %v5181_v17  ;;  %v5189_v7 = vmul.f32 %v7509_v52, %v7509_v52  ;;  %v5193_v18 = vmul.f32 %v7511_v16, %v7511_v16  ;;  %v7513_v47 = vld [vmem:[#allocation88_spill] sm:$0xff]  ;;  %v7515_v17 = vld [vmem:[#allocation89_spill] sm:$0xff]  ;;  %v5209_v52 = vmul.f32 %v4347_v27, %v4347_v27 }
 0x15f   : > { %v5201_v8 = vmul.f32 %v7513_v47, %v7513_v47  ;;  %v5205_v25 = vmul.f32 %v7515_v17, %v7515_v17  ;;  %v5221_v47 = vmul.f32 %v4363_v34, %v4363_v34 }
 0x160   : > { %7510 = vst [vmem:[#allocation73_spill] sm:$0xff] %v5189_v7  ;;  %7512 = vst [vmem:[#allocation74_spill] sm:$0xff] %v5193_v18  ;;  %v7517_v7 = vld [vmem:[#allocation91_spill] sm:$0xff]  ;;  %v7519_v18 = vld [vmem:[#allocation92_spill] sm:$0xff] }
 0x161   : > { %7514 = vst [vmem:[#allocation76_spill] sm:$0xff] %v5201_v8  ;;  %7516 = vst [vmem:[#allocation77_spill] sm:$0xff] %v5205_v25  ;;  %v5213_v16 = vmul.f32 %v7517_v7, %v7517_v7  ;;  %v5217_v26 = vmul.f32 %v7519_v18, %v7519_v18  ;;  %v7521_v8 = vld [vmem:[#allocation94_spill] sm:$0xff]  ;;  %v7523_v25 = vld [vmem:[#allocation95_spill] sm:$0xff]  ;;  %v5233_v7 = vmul.f32 %v4379_v35, %v4379_v35 }
 0x162   : > { %v5225_v17 = vmul.f32 %v7521_v8, %v7521_v8  ;;  %v5229_v27 = vmul.f32 %v7523_v25, %v7523_v25  ;;  %v5245_v8 = vmul.f32 %v4395_v36, %v4395_v36 }
 0x163   : > { %7518 = vst [vmem:[#allocation79_spill] sm:$0xff] %v5213_v16  ;;  %7520 = vst [vmem:[#allocation80_spill] sm:$0xff] %v5217_v26  ;;  %v7525_v16 = vld [vmem:[#allocation97_spill] sm:$0xff]  ;;  %v7527_v26 = vld [vmem:[#allocation98_spill] sm:$0xff] }
 0x164   : > { %7522 = vst [vmem:[#allocation82_spill] sm:$0xff] %v5225_v17  ;;  %7524 = vst [vmem:[#allocation83_spill] sm:$0xff] %v5229_v27  ;;  %v5237_v18 = vmul.f32 %v7525_v16, %v7525_v16  ;;  %v5241_v34 = vmul.f32 %v7527_v26, %v7527_v26  ;;  %v7529_v17 = vld [vmem:[#allocation100_spill] sm:$0xff]  ;;  %v7531_v27 = vld [vmem:[#allocation101_spill] sm:$0xff]  ;;  %v5257_v16 = vmul.f32 %v4411_v44, %v4411_v44 }
 0x165   : > { %v5249_v25 = vmul.f32 %v7529_v17, %v7529_v17  ;;  %v5253_v35 = vmul.f32 %v7531_v27, %v7531_v27  ;;  %v5269_v17 = vmul.f32 %v4427_v45, %v4427_v45 }
 0x166   : > { %7526 = vst [vmem:[#allocation85_spill] sm:$0xff] %v5237_v18  ;;  %7528 = vst [vmem:[#allocation86_spill] sm:$0xff] %v5241_v34  ;;  %v7533_v18 = vld [vmem:[#allocation103_spill] sm:$0xff]  ;;  %v7535_v34 = vld [vmem:[#allocation104_spill] sm:$0xff] }
 0x167   : > { %7530 = vst [vmem:[#allocation88_spill] sm:$0xff] %v5249_v25  ;;  %7532 = vst [vmem:[#allocation89_spill] sm:$0xff] %v5253_v35  ;;  %v5261_v26 = vmul.f32 %v7533_v18, %v7533_v18  ;;  %v5265_v36 = vmul.f32 %v7535_v34, %v7535_v34  ;;  %v7537_v25 = vld [vmem:[#allocation106_spill] sm:$0xff]  ;;  %v7539_v35 = vld [vmem:[#allocation107_spill] sm:$0xff]  ;;  %v5281_v18 = vmul.f32 %v4443_v46, %v4443_v46 }
 0x168   : > { %v5273_v27 = vmul.f32 %v7537_v25, %v7537_v25  ;;  %v5277_v44 = vmul.f32 %v7539_v35, %v7539_v35  ;;  %v5293_v25 = vmul.f32 %v4459_v14, %v4459_v14 }
 0x169   : > { %7534 = vst [vmem:[#allocation91_spill] sm:$0xff] %v5261_v26  ;;  %7536 = vst [vmem:[#allocation92_spill] sm:$0xff] %v5265_v36  ;;  %v7541_v26 = vld [vmem:[#allocation109_spill] sm:$0xff]  ;;  %v7543_v36 = vld [vmem:[#allocation110_spill] sm:$0xff] }
 0x16a   : > { %7538 = vst [vmem:[#allocation94_spill] sm:$0xff] %v5273_v27  ;;  %7540 = vst [vmem:[#allocation95_spill] sm:$0xff] %v5277_v44  ;;  %v5285_v34 = vmul.f32 %v7541_v26, %v7541_v26  ;;  %v5289_v45 = vmul.f32 %v7543_v36, %v7543_v36  ;;  %v7546_v27 = vld [vmem:[#allocation112_spill] sm:$0xff]  ;;  %v7548_v44 = vld [vmem:[#allocation113_spill] sm:$0xff]  ;;  %v5305_v26 = vmul.f32 %v4475_v55, %v4475_v55 }
 0x16b   : > { %7545 = vst [vmem:[#allocation100_spill] sm:$0xff] %v5293_v25  ;;  %v5297_v35 = vmul.f32 %v7546_v27, %v7546_v27  ;;  %v5301_v46 = vmul.f32 %v7548_v44, %v7548_v44  ;;  %v7555_v25 = vld [vmem:[#allocation118_spill] sm:$0xff] }
 0x16c   : > { %7542 = vst [vmem:[#allocation97_spill] sm:$0xff] %v5285_v34  ;;  %7544 = vst [vmem:[#allocation98_spill] sm:$0xff] %v5289_v45  ;;  %v7551_v34 = vld [vmem:[#allocation115_spill] sm:$0xff]  ;;  %v7553_v45 = vld [vmem:[#allocation116_spill] sm:$0xff]  ;;  %v5317_v27 = vmul.f32 %v7555_v25, %v7555_v25 }
 0x16d   : > { %7547 = vst [vmem:[#allocation101_spill] sm:$0xff] %v5297_v35  ;;  %7549 = vst [vmem:[#allocation103_spill] sm:$0xff] %v5301_v46  ;;  %v5309_v36 = vmul.f32 %v7551_v34, %v7551_v34  ;;  %v5313_v14 = vmul.f32 %v7553_v45, %v7553_v45  ;;  %v7556_v35 = vld [vmem:[#allocation119_spill] sm:$0xff]  ;;  %v7558_v46 = vld [vmem:[#allocation120_spill] sm:$0xff] }
 0x16e   : > { %7550 = vst [vmem:[#allocation104_spill] sm:$0xff] %v5305_v26  ;;  %v5321_v44 = vmul.f32 %v7556_v35, %v7556_v35  ;;  %v5325_v55 = vmul.f32 %v7558_v46, %v7558_v46  ;;  %v7560_v26 = vld [vmem:[#allocation122_spill] sm:$0xff]  ;;  %v5341_v35 = vmul.f32 %v4523_v1, %v4523_v1 }
 0x16f   : > { %7552 = vst [vmem:[#allocation106_spill] sm:$0xff] %v5309_v36  ;;  %7554 = vst [vmem:[#allocation107_spill] sm:$0xff] %v5313_v14  ;;  %v5329_v34 = vmul.f32 %v7560_v26, %v7560_v26  ;;  %v7562_v36 = vld [vmem:[#allocation123_spill] sm:$0xff]  ;;  %v7564_v14 = vld [vmem:[#allocation124_spill] sm:$0xff] }
 0x170   : > { %7557 = vst [vmem:[#allocation109_spill] sm:$0xff] %v5321_v44  ;;  %7559 = vst [vmem:[#allocation110_spill] sm:$0xff] %v5325_v55  ;;  %v5333_v45 = vmul.f32 %v7562_v36, %v7562_v36  ;;  %v5337_v25 = vmul.f32 %v7564_v14, %v7564_v14  ;;  %v7567_v44 = vld [vmem:[#allocation125_spill] sm:$0xff]  ;;  %v7569_v55 = vld [vmem:[#allocation126_spill] sm:$0xff] }
 0x171   : > { %7561 = vst [vmem:[#allocation112_spill] sm:$0xff] %v5329_v34  ;;  %7566 = vst [vmem:[#allocation116_spill] sm:$0xff] %v5341_v35  ;;  %v5345_v46 = vmul.f32 %v7567_v44, %v7567_v44  ;;  %v5349_v26 = vmul.f32 %v7569_v55, %v7569_v55  ;;  %v7571_v34 = vld [vmem:[#allocation127_spill] sm:$0xff] }
 0x172   : > { %7563 = vst [vmem:[#allocation113_spill] sm:$0xff] %v5333_v45  ;;  %7565 = vst [vmem:[#allocation115_spill] sm:$0xff] %v5337_v25  ;;  %v5353_v36 = vmul.f32 %v7571_v34, %v7571_v34  ;;  %v7572_v45 = vld [vmem:[#allocation128_spill] sm:$0xff]  ;;  %v7574_v25 = vld [vmem:[#allocation129_spill] sm:$0xff] }
 0x173   : > { %7568 = vst [vmem:[#allocation118_spill] sm:$0xff] %v5345_v46  ;;  %7570 = vst [vmem:[#allocation119_spill] sm:$0xff] %v5349_v26  ;;  %v5357_v14 = vmul.f32 %v7572_v45, %v7572_v45  ;;  %v5361_v1 = vmul.f32 %v7574_v25, %v7574_v25  ;;  %v7576_v35 = vld [vmem:[#allocation131_spill] sm:$0xff]  ;;  %v7578_v46 = vld [vmem:[#allocation132_spill] sm:$0xff]  ;;  %v5377_v45 = vmul.f32 %v4571_v53, %v4571_v53 }
 0x174   : > { %v5365_v44 = vmul.f32 %v7576_v35, %v7576_v35  ;;  %v5369_v55 = vmul.f32 %v7578_v46, %v7578_v46  ;;  %v7580_v26 = vld [vmem:[#allocation133_spill] sm:$0xff] }
 0x175   : > { %7573 = vst [vmem:[#allocation120_spill] sm:$0xff] %v5357_v14  ;;  %7575 = vst [vmem:[#allocation122_spill] sm:$0xff] %v5361_v1  ;;  %v5373_v34 = vmul.f32 %v7580_v26, %v7580_v26  ;;  %v7583_v14 = vld [vmem:[#allocation134_spill] sm:$0xff]  ;;  %v7585_v1 = vld [vmem:[#allocation135_spill] sm:$0xff] }
 0x176   : > { %7577 = vst [vmem:[#allocation123_spill] sm:$0xff] %v5365_v44  ;;  %7579 = vst [vmem:[#allocation124_spill] sm:$0xff] %v5369_v55  ;;  %v5381_v25 = vmul.f32 %v7583_v14, %v7583_v14  ;;  %v5385_v35 = vmul.f32 %v7585_v1, %v7585_v1  ;;  %v7587_v44 = vld [vmem:[#allocation136_spill] sm:$0xff]  ;;  %v7589_v55 = vld [vmem:[#allocation137_spill] sm:$0xff] }
 0x177   : > { %7581 = vst [vmem:[#allocation125_spill] sm:$0xff] %v5373_v34  ;;  %7582 = vst [vmem:[#allocation126_spill] sm:$0xff] %v5377_v45  ;;  %v5389_v46 = vmul.f32 %v7587_v44, %v7587_v44  ;;  %v5393_v26 = vmul.f32 %v7589_v55, %v7589_v55  ;;  %v7591_v34 = vld [vmem:[#allocation138_spill] sm:$0xff]  ;;  %v7593_v45 = vld [vmem:[#allocation140_spill] sm:$0xff]  ;;  %v5413_v55 = vmul.f32 %v4619_v42, %v4619_v42 }
 0x178   : > { %7584 = vst [vmem:[#allocation127_spill] sm:$0xff] %v5381_v25  ;;  %7586 = vst [vmem:[#allocation128_spill] sm:$0xff] %v5385_v35  ;;  %v5397_v53 = vmul.f32 %v7591_v34, %v7591_v34  ;;  %v5401_v14 = vmul.f32 %v7593_v45, %v7593_v45  ;;  %v7595_v25 = vld [vmem:[#allocation141_spill] sm:$0xff]  ;;  %v7597_v35 = vld [vmem:[#allocation142_spill] sm:$0xff] }
 0x179   : > { %7588 = vst [vmem:[#allocation129_spill] sm:$0xff] %v5389_v46  ;;  %7590 = vst [vmem:[#allocation131_spill] sm:$0xff] %v5393_v26  ;;  %v5405_v1 = vmul.f32 %v7595_v25, %v7595_v25  ;;  %v5409_v44 = vmul.f32 %v7597_v35, %v7597_v35  ;;  %v7600_v26 = vld [vmem:[#allocation143_spill] sm:$0xff]  ;;  %v7773_v46 = vld [vmem:[#allocation17_spill] sm:$0xff] }
 0x17a   : > { %7592 = vst [vmem:[#allocation132_spill] sm:$0xff] %v5397_v53  ;;  %7594 = vst [vmem:[#allocation133_spill] sm:$0xff] %v5401_v14  ;;  %v5417_v34 = vmul.f32 %v7600_v26, %v7600_v26  ;;  %v7602_v53 = vld [vmem:[#allocation144_spill] sm:$0xff]  ;;  %v7604_v14 = vld [vmem:[#allocation145_spill] sm:$0xff] }
 0x17b   : > { %7596 = vst [vmem:[#allocation134_spill] sm:$0xff] %v5405_v1  ;;  %7598 = vst [vmem:[#allocation135_spill] sm:$0xff] %v5409_v44  ;;  %v5421_v45 = vmul.f32 %v7602_v53, %v7602_v53  ;;  %v5425_v25 = vmul.f32 %v7604_v14, %v7604_v14  ;;  %v7606_v1 = vld [vmem:[#allocation146_spill] sm:$0xff]  ;;  %v7608_v44 = vld [vmem:[#allocation147_spill] sm:$0xff] }
 0x17c   : > { %7599 = vst [vmem:[#allocation136_spill] sm:$0xff] %v5413_v55  ;;  %7601 = vst [vmem:[#allocation137_spill] sm:$0xff] %v5417_v34  ;;  %v5429_v35 = vmul.f32 %v7606_v1, %v7606_v1  ;;  %v5433_v42 = vmul.f32 %v7608_v44, %v7608_v44  ;;  %v7610_v55 = vld [vmem:[#allocation149_spill] sm:$0xff]  ;;  %v7612_v34 = vld [vmem:[#allocation150_spill] sm:$0xff]  ;;  %v5449_v1 = vmul.f32 %v4667_v24, %v4667_v24 }
 0x17d   : > { %7603 = vst [vmem:[#allocation138_spill] sm:$0xff] %v5421_v45  ;;  %7605 = vst [vmem:[#allocation140_spill] sm:$0xff] %v5425_v25  ;;  %v5437_v26 = vmul.f32 %v7610_v55, %v7610_v55  ;;  %v5441_v53 = vmul.f32 %v7612_v34, %v7612_v34  ;;  %v7614_v45 = vld [vmem:[#allocation151_spill] sm:$0xff] }
 0x17e   : > { %7607 = vst [vmem:[#allocation141_spill] sm:$0xff] %v5429_v35  ;;  %7609 = vst [vmem:[#allocation142_spill] sm:$0xff] %v5433_v42  ;;  %v5445_v14 = vmul.f32 %v7614_v45, %v7614_v45  ;;  %v7617_v35 = vld [vmem:[#allocation152_spill] sm:$0xff]  ;;  %v7619_v42 = vld [vmem:[#allocation153_spill] sm:$0xff] }
 0x17f   : > { %7611 = vst [vmem:[#allocation143_spill] sm:$0xff] %v5437_v26  ;;  %7613 = vst [vmem:[#allocation144_spill] sm:$0xff] %v5441_v53  ;;  %v5453_v44 = vmul.f32 %v7617_v35, %v7617_v35  ;;  %v5457_v55 = vmul.f32 %v7619_v42, %v7619_v42  ;;  %v7621_v26 = vld [vmem:[#allocation154_spill] sm:$0xff]  ;;  %v7623_v53 = vld [vmem:[#allocation155_spill] sm:$0xff] }
 0x180   : > { %7615 = vst [vmem:[#allocation145_spill] sm:$0xff] %v5445_v14  ;;  %7616 = vst [vmem:[#allocation146_spill] sm:$0xff] %v5449_v1  ;;  %v5461_v34 = vmul.f32 %v7621_v26, %v7621_v26  ;;  %v5465_v45 = vmul.f32 %v7623_v53, %v7623_v53  ;;  %v7625_v14 = vld [vmem:[#allocation156_spill] sm:$0xff]  ;;  %v7627_v1 = vld [vmem:[#allocation158_spill] sm:$0xff]  ;;  %v5485_v53 = vmul.f32 %v4715_v40, %v4715_v40 }
 0x181   : > { %7618 = vst [vmem:[#allocation147_spill] sm:$0xff] %v5453_v44  ;;  %7620 = vst [vmem:[#allocation149_spill] sm:$0xff] %v5457_v55  ;;  %v5469_v24 = vmul.f32 %v7625_v14, %v7625_v14  ;;  %v5473_v35 = vmul.f32 %v7627_v1, %v7627_v1  ;;  %v7629_v44 = vld [vmem:[#allocation159_spill] sm:$0xff]  ;;  %v7631_v55 = vld [vmem:[#allocation160_spill] sm:$0xff] }
 0x182   : > { %7622 = vst [vmem:[#allocation150_spill] sm:$0xff] %v5461_v34  ;;  %7624 = vst [vmem:[#allocation151_spill] sm:$0xff] %v5465_v45  ;;  %v5477_v42 = vmul.f32 %v7629_v44, %v7629_v44  ;;  %v5481_v26 = vmul.f32 %v7631_v55, %v7631_v55  ;;  %v7634_v45 = vld [vmem:[#allocation161_spill] sm:$0xff]  ;;  %v1384_v34 = vld [vmem:[%s3768_s8 + $0xd8] sm:$0xff] }
 0x183   : > { %7626 = vst [vmem:[#allocation152_spill] sm:$0xff] %v5469_v24  ;;  %7628 = vst [vmem:[#allocation153_spill] sm:$0xff] %v5473_v35  ;;  %v5489_v14 = vmul.f32 %v7634_v45, %v7634_v45  ;;  %v7636_v24 = vld [vmem:[#allocation162_spill] sm:$0xff]  ;;  %v7638_v35 = vld [vmem:[#allocation163_spill] sm:$0xff] }
 0x184   : > { %7630 = vst [vmem:[#allocation154_spill] sm:$0xff] %v5477_v42  ;;  %7632 = vst [vmem:[#allocation155_spill] sm:$0xff] %v5481_v26  ;;  %v5493_v1 = vmul.f32 %v7636_v24, %v7636_v24  ;;  %v5497_v44 = vmul.f32 %v7638_v35, %v7638_v35  ;;  %v7640_v42 = vld [vmem:[#allocation164_spill] sm:$0xff]  ;;  %v7642_v26 = vld [vmem:[#allocation165_spill] sm:$0xff] }
 0x185   : > { %7633 = vst [vmem:[#allocation156_spill] sm:$0xff] %v5485_v53  ;;  %7635 = vst [vmem:[#allocation158_spill] sm:$0xff] %v5489_v14  ;;  %v5501_v55 = vmul.f32 %v7640_v42, %v7640_v42  ;;  %v5505_v40 = vmul.f32 %v7642_v26, %v7642_v26  ;;  %v7644_v53 = vld [vmem:[#allocation167_spill] sm:$0xff]  ;;  %v7646_v14 = vld [vmem:[#allocation168_spill] sm:$0xff]  ;;  %v5521_v42 = vmul.f32 %v4763_v37, %v4763_v37 }
 0x186   : > { %7637 = vst [vmem:[#allocation159_spill] sm:$0xff] %v5493_v1  ;;  %7639 = vst [vmem:[#allocation160_spill] sm:$0xff] %v5497_v44  ;;  %v5509_v45 = vmul.f32 %v7644_v53, %v7644_v53  ;;  %v5513_v24 = vmul.f32 %v7646_v14, %v7646_v14  ;;  %v7648_v1 = vld [vmem:[#allocation169_spill] sm:$0xff]  ;;  %v7771_v44 = vld [vmem:[#allocation16_spill] sm:$0xff] }
 0x187   : > { %7641 = vst [vmem:[#allocation161_spill] sm:$0xff] %v5501_v55  ;;  %7643 = vst [vmem:[#allocation162_spill] sm:$0xff] %v5505_v40  ;;  %v5517_v35 = vmul.f32 %v7648_v1, %v7648_v1  ;;  %v7651_v55 = vld [vmem:[#allocation170_spill] sm:$0xff]  ;;  %v7653_v40 = vld [vmem:[#allocation171_spill] sm:$0xff] }
 0x188   : > { %7645 = vst [vmem:[#allocation163_spill] sm:$0xff] %v5509_v45  ;;  %7647 = vst [vmem:[#allocation164_spill] sm:$0xff] %v5513_v24  ;;  %v5525_v26 = vmul.f32 %v7651_v55, %v7651_v55  ;;  %v5529_v53 = vmul.f32 %v7653_v40, %v7653_v40  ;;  %v7655_v45 = vld [vmem:[#allocation172_spill] sm:$0xff]  ;;  %v7657_v24 = vld [vmem:[#allocation173_spill] sm:$0xff] }
 0x189   : > { %7649 = vst [vmem:[#allocation165_spill] sm:$0xff] %v5517_v35  ;;  %7650 = vst [vmem:[#allocation167_spill] sm:$0xff] %v5521_v42  ;;  %v5533_v14 = vmul.f32 %v7655_v45, %v7655_v45  ;;  %v5537_v1 = vmul.f32 %v7657_v24, %v7657_v24  ;;  %v7659_v35 = vld [vmem:[#allocation174_spill] sm:$0xff]  ;;  %v7661_v42 = vld [vmem:[#allocation176_spill] sm:$0xff]  ;;  %v5557_v24 = vmul.f32 %v4811_v9, %v4811_v9 }
 0x18a   : > { %7652 = vst [vmem:[#allocation168_spill] sm:$0xff] %v5525_v26  ;;  %7654 = vst [vmem:[#allocation169_spill] sm:$0xff] %v5529_v53  ;;  %v5541_v37 = vmul.f32 %v7659_v35, %v7659_v35  ;;  %v5545_v55 = vmul.f32 %v7661_v42, %v7661_v42  ;;  %v7663_v26 = vld [vmem:[#allocation177_spill] sm:$0xff]  ;;  %v7665_v53 = vld [vmem:[#allocation178_spill] sm:$0xff] }
 0x18b   : > { %7656 = vst [vmem:[#allocation170_spill] sm:$0xff] %v5533_v14  ;;  %7658 = vst [vmem:[#allocation171_spill] sm:$0xff] %v5537_v1  ;;  %v5549_v40 = vmul.f32 %v7663_v26, %v7663_v26  ;;  %v5553_v45 = vmul.f32 %v7665_v53, %v7665_v53  ;;  %v7668_v1 = vld [vmem:[#allocation179_spill] sm:$0xff] }
 0x18c   : > { %7660 = vst [vmem:[#allocation172_spill] sm:$0xff] %v5541_v37  ;;  %7662 = vst [vmem:[#allocation173_spill] sm:$0xff] %v5545_v55  ;;  %v5561_v35 = vmul.f32 %v7668_v1, %v7668_v1  ;;  %v7670_v37 = vld [vmem:[#allocation180_spill] sm:$0xff]  ;;  %v7672_v55 = vld [vmem:[#allocation181_spill] sm:$0xff] }
 0x18d   : > { %7664 = vst [vmem:[#allocation174_spill] sm:$0xff] %v5549_v40  ;;  %7666 = vst [vmem:[#allocation176_spill] sm:$0xff] %v5553_v45  ;;  %v5565_v42 = vmul.f32 %v7670_v37, %v7670_v37  ;;  %v5569_v26 = vmul.f32 %v7672_v55, %v7672_v55  ;;  %v7674_v40 = vld [vmem:[#allocation182_spill] sm:$0xff]  ;;  %v7676_v45 = vld [vmem:[#allocation183_spill] sm:$0xff] }
 0x18e   : > { %7667 = vst [vmem:[#allocation177_spill] sm:$0xff] %v5557_v24  ;;  %7669 = vst [vmem:[#allocation178_spill] sm:$0xff] %v5561_v35  ;;  %v5573_v53 = vmul.f32 %v7674_v40, %v7674_v40  ;;  %v5577_v9 = vmul.f32 %v7676_v45, %v7676_v45  ;;  %v7678_v24 = vld [vmem:[#allocation185_spill] sm:$0xff]  ;;  %v7680_v35 = vld [vmem:[#allocation186_spill] sm:$0xff]  ;;  %v5593_v40 = vmul.f32 %v4859_v33, %v4859_v33 }
 0x18f   : > { %7671 = vst [vmem:[#allocation179_spill] sm:$0xff] %v5565_v42  ;;  %7673 = vst [vmem:[#allocation180_spill] sm:$0xff] %v5569_v26  ;;  %v5581_v1 = vmul.f32 %v7678_v24, %v7678_v24  ;;  %v5585_v37 = vmul.f32 %v7680_v35, %v7680_v35  ;;  %v7682_v42 = vld [vmem:[#allocation187_spill] sm:$0xff] }
 0x190   : > { %7675 = vst [vmem:[#allocation181_spill] sm:$0xff] %v5573_v53  ;;  %7677 = vst [vmem:[#allocation182_spill] sm:$0xff] %v5577_v9  ;;  %v5589_v55 = vmul.f32 %v7682_v42, %v7682_v42  ;;  %v7685_v53 = vld [vmem:[#allocation188_spill] sm:$0xff]  ;;  %v7687_v9 = vld [vmem:[#allocation189_spill] sm:$0xff] }
 0x191   : > { %7679 = vst [vmem:[#allocation183_spill] sm:$0xff] %v5581_v1  ;;  %7681 = vst [vmem:[#allocation185_spill] sm:$0xff] %v5585_v37  ;;  %v5597_v45 = vmul.f32 %v7685_v53, %v7685_v53  ;;  %v5601_v24 = vmul.f32 %v7687_v9, %v7687_v9  ;;  %v7689_v1 = vld [vmem:[#allocation190_spill] sm:$0xff]  ;;  %v7691_v37 = vld [vmem:[#allocation191_spill] sm:$0xff] }
 0x192   : > { %7683 = vst [vmem:[#allocation186_spill] sm:$0xff] %v5589_v55  ;;  %7684 = vst [vmem:[#allocation187_spill] sm:$0xff] %v5593_v40  ;;  %v5605_v35 = vmul.f32 %v7689_v1, %v7689_v1  ;;  %v5609_v42 = vmul.f32 %v7691_v37, %v7691_v37  ;;  %v7693_v55 = vld [vmem:[#allocation192_spill] sm:$0xff]  ;;  %v7695_v40 = vld [vmem:[#allocation194_spill] sm:$0xff]  ;;  %v5629_v37 = vmul.f32 %v4907_v4, %v4907_v4 }
 0x193   : > { %7686 = vst [vmem:[#allocation188_spill] sm:$0xff] %v5597_v45  ;;  %7688 = vst [vmem:[#allocation189_spill] sm:$0xff] %v5601_v24  ;;  %v5613_v33 = vmul.f32 %v7693_v55, %v7693_v55  ;;  %v5617_v53 = vmul.f32 %v7695_v40, %v7695_v40  ;;  %v7697_v45 = vld [vmem:[#allocation195_spill] sm:$0xff]  ;;  %v7699_v24 = vld [vmem:[#allocation196_spill] sm:$0xff] }
 0x194   : > { %7690 = vst [vmem:[#allocation190_spill] sm:$0xff] %v5605_v35  ;;  %7692 = vst [vmem:[#allocation191_spill] sm:$0xff] %v5609_v42  ;;  %v5621_v9 = vmul.f32 %v7697_v45, %v7697_v45  ;;  %v5625_v1 = vmul.f32 %v7699_v24, %v7699_v24  ;;  %v7702_v42 = vld [vmem:[#allocation197_spill] sm:$0xff]  ;;  %v7769_v26 = vld [vmem:[#allocation15_spill] sm:$0xff] }
 0x195   : > { %7694 = vst [vmem:[#allocation192_spill] sm:$0xff] %v5613_v33  ;;  %7696 = vst [vmem:[#allocation194_spill] sm:$0xff] %v5617_v53  ;;  %v5633_v55 = vmul.f32 %v7702_v42, %v7702_v42  ;;  %v7704_v33 = vld [vmem:[#allocation198_spill] sm:$0xff]  ;;  %v7706_v53 = vld [vmem:[#allocation199_spill] sm:$0xff] }
 0x196   : > { %7698 = vst [vmem:[#allocation195_spill] sm:$0xff] %v5621_v9  ;;  %7700 = vst [vmem:[#allocation196_spill] sm:$0xff] %v5625_v1  ;;  %v5637_v40 = vmul.f32 %v7704_v33, %v7704_v33  ;;  %v5641_v45 = vmul.f32 %v7706_v53, %v7706_v53  ;;  %v7708_v9 = vld [vmem:[#allocation200_spill] sm:$0xff]  ;;  %v7710_v1 = vld [vmem:[#allocation201_spill] sm:$0xff] }
 0x197   : > { %7701 = vst [vmem:[#allocation221_spill] sm:$0xff] %v5629_v37  ;;  %7703 = vst [vmem:[#allocation197_spill] sm:$0xff] %v5633_v55  ;;  %v5645_v24 = vmul.f32 %v7708_v9, %v7708_v9  ;;  %v5649_v4 = vmul.f32 %v7710_v1, %v7710_v1  ;;  %v7712_v37 = vld [vmem:[#allocation203_spill] sm:$0xff]  ;;  %v7714_v55 = vld [vmem:[#allocation204_spill] sm:$0xff]  ;;  %v5665_v9 = vmul.f32 %v4955_v41, %v4955_v41 }
 0x198   : > { %7705 = vst [vmem:[#allocation198_spill] sm:$0xff] %v5637_v40  ;;  %7707 = vst [vmem:[#allocation199_spill] sm:$0xff] %v5641_v45  ;;  %v5653_v42 = vmul.f32 %v7712_v37, %v7712_v37  ;;  %v5657_v33 = vmul.f32 %v7714_v55, %v7714_v55  ;;  %v7716_v40 = vld [vmem:[#allocation205_spill] sm:$0xff]  ;;  %v7727_v41 = vld [vmem:[#allocation210_spill] sm:$0xff] }
 0x199   : > { %7709 = vst [vmem:[#allocation200_spill] sm:$0xff] %v5645_v24  ;;  %7711 = vst [vmem:[#allocation201_spill] sm:$0xff] %v5649_v4  ;;  %v5661_v53 = vmul.f32 %v7716_v40, %v7716_v40  ;;  %v7719_v24 = vld [vmem:[#allocation206_spill] sm:$0xff]  ;;  %v7721_v4 = vld [vmem:[#allocation207_spill] sm:$0xff] }
 0x19a   : > { %7713 = vst [vmem:[#allocation203_spill] sm:$0xff] %v5653_v42  ;;  %7715 = vst [vmem:[#allocation204_spill] sm:$0xff] %v5657_v33  ;;  %v5669_v1 = vmul.f32 %v7719_v24, %v7719_v24  ;;  %v5673_v37 = vmul.f32 %v7721_v4, %v7721_v4  ;;  %v7723_v42 = vld [vmem:[#allocation208_spill] sm:$0xff]  ;;  %v7725_v33 = vld [vmem:[#allocation209_spill] sm:$0xff] }
 0x19b   : > { %7717 = vst [vmem:[#allocation205_spill] sm:$0xff] %v5661_v53  ;;  %7718 = vst [vmem:[#allocation222_spill] sm:$0xff] %v5665_v9  ;;  %v5677_v55 = vmul.f32 %v7723_v42, %v7723_v42  ;;  %v5681_v40 = vmul.f32 %v7725_v33, %v7725_v33  ;;  %v5685_v9 = vmul.f32 %v7727_v41, %v7727_v41  ;;  %v7729_v24 = vld [vmem:[#allocation212_spill] sm:$0xff]  ;;  %v7733_v42 = vld [vmem:[#allocation214_spill] sm:$0xff] }
 0x19c   : > { %7720 = vst [vmem:[#allocation206_spill] sm:$0xff] %v5669_v1  ;;  %7722 = vst [vmem:[#allocation207_spill] sm:$0xff] %v5673_v37  ;;  %v5689_v4 = vmul.f32 %v7729_v24, %v7729_v24  ;;  %v7731_v37 = vld [vmem:[#allocation213_spill] sm:$0xff]  ;;  %v7735_v33 = vld [vmem:[#allocation215_spill] sm:$0xff] }
 0x19d   : > { %7724 = vst [vmem:[#allocation208_spill] sm:$0xff] %v5677_v55  ;;  %7726 = vst [vmem:[#allocation209_spill] sm:$0xff] %v5681_v40  ;;  %v5693_v1 = vmul.f32 %v7731_v37, %v7731_v37  ;;  %v5697_v55 = vmul.f32 %v7733_v42, %v7733_v42  ;;  %v5701_v40 = vmul.f32 %v7735_v33, %v7735_v33  ;;  %v7737_v53 = vld [vmem:[#allocation216_spill] sm:$0xff]  ;;  %v1357_v42 = vld [vmem:[%s3768_s8] sm:$0xff] }
 0x19e   : > { %7728 = vst [vmem:[#allocation210_spill] sm:$0xff] %v5685_v9  ;;  %7730 = vst [vmem:[#allocation212_spill] sm:$0xff] %v5689_v4  ;;  %v5705_v41 = vmul.f32 %v7737_v53, %v7737_v53  ;;  %v7739_v9 = vld [vmem:[#allocation217_spill] sm:$0xff]  ;;  %v5713_v37 = vmul.f32 %v5019_v43, %v5019_v43  ;;  %v5718_v33 = vmul.f32 %v5021_v50, %v5021_v50  ;;  %v1358_v43 = vld [vmem:[%s3768_s8 + $0x8] sm:$0xff] }
 0x19f   : > { %7732 = vst [vmem:[#allocation213_spill] sm:$0xff] %v5693_v1  ;;  %7734 = vst [vmem:[#allocation214_spill] sm:$0xff] %v5697_v55  ;;  %v5709_v24 = vmul.f32 %v7739_v9, %v7739_v9  ;;  %v5726_v9 = vmul.f32 %v5034_v59, %v5034_v59  ;;  %v1361_v50 = vld [vmem:[%s3768_s8 + $0x20] sm:$0xff]  ;;  %v5742_v59 = vmul.f32 %v5047_v48, %v5047_v48  ;;  %v1364_v55 = vld [vmem:[%s3768_s8 + $0x38] sm:$0xff] }
 0x1a0   : > { %7736 = vst [vmem:[#allocation215_spill] sm:$0xff] %v5701_v40  ;;  %7738 = vst [vmem:[#allocation216_spill] sm:$0xff] %v5705_v41  ;;  %v7743_v40 = vld [vmem:[#allocation218_spill] sm:$0xff]  ;;  %v5758_v48 = vmul.f32 %v5060_v5, %v5060_v5  ;;  %v1369_v5 = vld [vmem:[%s3768_s8 + $0x60] sm:$0xff] }
 0x1a1   : > { %7740 = vst [vmem:[#allocation217_spill] sm:$0xff] %v5709_v24  ;;  %7741 = vst [vmem:[#allocation223_spill] sm:$0xff] %v5713_v37  ;;  %v5722_v53 = vmul.f32 %v7743_v40, %v7743_v40  ;;  %v5730_v24 = vmul.f32 %v5036_v20, %v5036_v20  ;;  %v1359_v37 = vld [vmem:[%s3768_s8 + $0x10] sm:$0xff]  ;;  %v1360_v41 = vld [vmem:[%s3768_s8 + $0x18] sm:$0xff]  ;;  %v5746_v20 = vmul.f32 %v5049_v2, %v5049_v2 }
 0x1a2   : > { %7742 = vst [vmem:[#allocation224_spill] sm:$0xff] %v5718_v33  ;;  %7745 = vst [vmem:[#allocation225_spill] sm:$0xff] %v5726_v9  ;;  %v7747_v33 = vld [vmem:[#allocation220_spill] sm:$0xff]  ;;  %v5762_v2 = vmul.f32 %v5062_v39, %v5062_v39  ;;  %v5778_v39 = vmul.f32 %v5075_v58, %v5075_v58  ;;  %v1372_v58 = vld [vmem:[%s3768_s8 + $0x78] sm:$0xff]  ;;  %v5826_v14 = vmul.f32 %v1360_v41, %v7769_v26 }
 0x1a3   : > { %7744 = vst [vmem:[#allocation218_spill] sm:$0xff] %v5722_v53  ;;  %7746 = vst [vmem:[#allocation226_spill] sm:$0xff] %v5730_v24  ;;  %v5738_v40 = vmul.f32 %v7747_v33, %v7747_v33  ;;  %v5750_v24 = vmul.f32 %v5051_v57, %v5051_v57  ;;  %v1362_v9 = vld [vmem:[%s3768_s8 + $0x28] sm:$0xff]  ;;  %v1363_v53 = vld [vmem:[%s3768_s8 + $0x30] sm:$0xff]  ;;  %v5766_v57 = vmul.f32 %v5064_v38, %v5064_v38 }
 0x1a4   : > { %7749 = vst [vmem:[#allocation227_spill] sm:$0xff] %v5742_v59  ;;  %7750 = vst [vmem:[#allocation228_spill] sm:$0xff] %v5746_v20  ;;  %v1365_v33 = vld [vmem:[%s3768_s8 + $0x40] sm:$0xff]  ;;  %v1366_v20 = vld [vmem:[%s3768_s8 + $0x48] sm:$0xff]  ;;  %v5782_v38 = vmul.f32 %v5077_v29, %v5077_v29  ;;  %v5802_v29 = vmul.f32 %v5095_v13, %v5095_v13 }
 0x1a5   : > { %7748 = vst [vmem:[#allocation220_spill] sm:$0xff] %v5738_v40  ;;  %7751 = vst [vmem:[#allocation229_spill] sm:$0xff] %v5750_v24  ;;  %v5770_v24 = vmul.f32 %v5073_v10, %v5073_v10  ;;  %v1367_v59 = vld [vmem:[%s3768_s8 + $0x50] sm:$0xff]  ;;  %v1368_v40 = vld [vmem:[%s3768_s8 + $0x58] sm:$0xff]  ;;  %v5786_v10 = vmul.f32 %v5085_v60, %v5085_v60  ;;  %v5806_v60 = vmul.f32 %v5097_v56, %v5097_v56 }
 0x1a6   : > { %7752 = vst [vmem:[#allocation230_spill] sm:$0xff] %v5758_v48  ;;  %7753 = vst [vmem:[#allocation231_spill] sm:$0xff] %v5762_v2  ;;  %v1371_v2 = vld [vmem:[%s3768_s8 + $0x70] sm:$0xff]  ;;  %v5798_v48 = vmul.f32 %v5089_v61, %v5089_v61  ;;  %v7763_v1 = vld [vmem:[#allocation12_spill] sm:$0xff] }
 0x1a7   : > { %7754 = vst [vmem:[#allocation232_spill] sm:$0xff] %v5766_v57  ;;  %7755 = vst [vmem:[#allocation233_spill] sm:$0xff] %v5770_v24  ;;  %v5790_v24 = vmul.f32 %v5087_v49, %v5087_v49  ;;  %v1370_v57 = vld [vmem:[%s3768_s8 + $0x68] sm:$0xff]  ;;  %v5813_v4 = vmul.f32 %v1357_v42, %v7763_v1  ;;  %v1380_v13 = vld [vmem:[%s3768_s8 + $0xb8] sm:$0xff]  ;;  %v5829_v1 = vmul.f32 %v1361_v50, %v7771_v44 }
 0x1a8   : > { %7756 = vst [vmem:[#allocation234_spill] sm:$0xff] %v5778_v39  ;;  %7757 = vst [vmem:[#allocation235_spill] sm:$0xff] %v5782_v38  ;;  %v1373_v39 = vld [vmem:[%s3768_s8 + $0x80] sm:$0xff]  ;;  %v1374_v49 = vld [vmem:[%s3768_s8 + $0x88] sm:$0xff] }
 0x1a9   : > { %7758 = vst [vmem:[#allocation236_spill] sm:$0xff] %v5786_v10  ;;  %7759 = vst [vmem:[#allocation237_spill] sm:$0xff] %v5790_v24  ;;  %v1375_v24 = vld [vmem:[%s3768_s8 + $0x90] sm:$0xff]  ;;  %v1376_v10 = vld [vmem:[%s3768_s8 + $0x98] sm:$0xff] }
 0x1aa   : > { %7760 = vst [vmem:[#allocation238_spill] sm:$0xff] %v5798_v48  ;;  %7761 = vst [vmem:[#allocation239_spill] sm:$0xff] %v5802_v29  ;;  %v1377_v38 = vld [vmem:[%s3768_s8 + $0xa0] sm:$0xff]  ;;  %v1378_v61 = vld [vmem:[%s3768_s8 + $0xa8] sm:$0xff] }
 0x1ab   : > { %7762 = vst [vmem:[#allocation240_spill] sm:$0xff] %v5806_v60  ;;  %7764 = vst [vmem:[#allocation12_spill] sm:$0xff] %v5813_v4  ;;  %v1379_v48 = vld [vmem:[%s3768_s8 + $0xb0] sm:$0xff]  ;;  %v1381_v29 = vld [vmem:[%s3768_s8 + $0xc0] sm:$0xff] }
 0x1ac   : > { %v7765_v45 = vld [vmem:[#allocation13_spill] sm:$0xff]  ;;  %v7767_v60 = vld [vmem:[#allocation14_spill] sm:$0xff]  ;;  %7770 = vst [vmem:[#allocation15_spill] sm:$0xff] %v5826_v14  ;;  %7772 = vst [vmem:[#allocation16_spill] sm:$0xff] %v5829_v1 }
 0x1ad   : > { %v5820_v56 = vmul.f32 %v1358_v43, %v7765_v45  ;;  %v5823_v35 = vmul.f32 %v1359_v37, %v7767_v60  ;;  %v1382_v42 = vld [vmem:[%s3768_s8 + $0xc8] sm:$0xff]  ;;  %v1383_v4 = vld [vmem:[%s3768_s8 + $0xd0] sm:$0xff]  ;;  %v1385_v25 = vld [vmem:[%s3768_s8 + $0xe0] sm:$0xff]  ;;  %v5836_v45 = vmul.f32 %v1362_v9, %v7773_v46 }
 0x1ae   : > { %v7775_v43 = vld [vmem:[#allocation18_spill] sm:$0xff]  ;;  %v7777_v60 = vld [vmem:[#allocation19_spill] sm:$0xff]  ;;  %v7779_v41 = vld [vmem:[#allocation20_spill] sm:$0xff] }
 0x1af   : > { %7766 = vst [vmem:[#allocation13_spill] sm:$0xff] %v5820_v56  ;;  %7768 = vst [vmem:[#allocation14_spill] sm:$0xff] %v5823_v35  ;;  %v5839_v37 = vmul.f32 %v1363_v53, %v7775_v43  ;;  %v5842_v26 = vmul.f32 %v1364_v55, %v7777_v60  ;;  %v5845_v44 = vmul.f32 %v1365_v33, %v7779_v41  ;;  %v1386_v50 = vld [vmem:[%s3768_s8 + $0xe8] sm:$0xff]  ;;  %v1387_v1 = vld [vmem:[%s3768_s8 + $0xf0] sm:$0xff] }
 0x1b0   : > { %7774 = vst [vmem:[#allocation17_spill] sm:$0xff] %v5836_v45  ;;  %v1388_v14 = vld [vmem:[%s3768_s8 + $0xf8] sm:$0xff]  ;;  %v1389_v35 = vld [vmem:[%s3768_s8 + $0x100] sm:$0xff]  ;;  %v7781_v56 = vld [vmem:[#allocation21_spill] sm:$0xff] }
 0x1b1   : > { %7776 = vst [vmem:[#allocation18_spill] sm:$0xff] %v5839_v37  ;;  %7778 = vst [vmem:[#allocation19_spill] sm:$0xff] %v5842_v26  ;;  %v5852_v46 = vmul.f32 %v1366_v20, %v7781_v56  ;;  %v7783_v9 = vld [vmem:[#allocation22_spill] sm:$0xff]  ;;  %v7785_v43 = vld [vmem:[#allocation23_spill] sm:$0xff] }
 0x1b2   : > { %7780 = vst [vmem:[#allocation20_spill] sm:$0xff] %v5845_v44  ;;  %v5855_v53 = vmul.f32 %v1367_v59, %v7783_v9  ;;  %v5858_v55 = vmul.f32 %v1368_v40, %v7785_v43  ;;  %v7787_v60 = vld [vmem:[#allocation24_spill] sm:$0xff]  ;;  %v1391_v44 = vld [vmem:[%s3768_s8 + $0x110] sm:$0xff]  ;;  %v1392_v26 = vld [vmem:[%s3768_s8 + $0x118] sm:$0xff] }
 0x1b3   : > { %7782 = vst [vmem:[#allocation21_spill] sm:$0xff] %v5852_v46  ;;  %v5861_v33 = vmul.f32 %v1369_v5, %v7787_v60  ;;  %v1390_v41 = vld [vmem:[%s3768_s8 + $0x108] sm:$0xff]  ;;  %v1393_v37 = vld [vmem:[%s3768_s8 + $0x120] sm:$0xff]  ;;  %v7791_v56 = vld [vmem:[#allocation30_spill] sm:$0xff] }
 0x1b4   : > { %7784 = vst [vmem:[#allocation22_spill] sm:$0xff] %v5855_v53  ;;  %7786 = vst [vmem:[#allocation23_spill] sm:$0xff] %v5858_v55  ;;  %v7789_v45 = vld [vmem:[#allocation27_spill] sm:$0xff]  ;;  %v5871_v59 = vmul.f32 %v1371_v2, %v7791_v56  ;;  %v7793_v9 = vld [vmem:[#allocation33_spill] sm:$0xff] }
 0x1b5   : > { %7788 = vst [vmem:[#allocation24_spill] sm:$0xff] %v5861_v33  ;;  %v5868_v20 = vmul.f32 %v1370_v57, %v7789_v45  ;;  %v5874_v40 = vmul.f32 %v1372_v58, %v7793_v9  ;;  %v7795_v43 = vld [vmem:[#allocation36_spill] sm:$0xff]  ;;  %v1395_v33 = vld [vmem:[%s3768_s8 + $0x130] sm:$0xff]  ;;  %v1396_v55 = vld [vmem:[%s3768_s8 + $0x138] sm:$0xff] }
 0x1b6   : > { %7792 = vst [vmem:[#allocation30_spill] sm:$0xff] %v5871_v59  ;;  %v5877_v5 = vmul.f32 %v1373_v39, %v7795_v43  ;;  %v1394_v60 = vld [vmem:[%s3768_s8 + $0x128] sm:$0xff]  ;;  %v1397_v53 = vld [vmem:[%s3768_s8 + $0x140] sm:$0xff]  ;;  %v7799_v45 = vld [vmem:[#allocation42_spill] sm:$0xff] }
 0x1b7   : > { %7790 = vst [vmem:[#allocation27_spill] sm:$0xff] %v5868_v20  ;;  %7794 = vst [vmem:[#allocation33_spill] sm:$0xff] %v5874_v40  ;;  %v7797_v46 = vld [vmem:[#allocation39_spill] sm:$0xff]  ;;  %v5887_v2 = vmul.f32 %v1375_v24, %v7799_v45  ;;  %v7801_v56 = vld [vmem:[#allocation45_spill] sm:$0xff] }
 0x1b8   : > { %7796 = vst [vmem:[#allocation36_spill] sm:$0xff] %v5877_v5  ;;  %v5884_v57 = vmul.f32 %v1374_v49, %v7797_v46  ;;  %v5890_v58 = vmul.f32 %v1376_v10, %v7801_v56  ;;  %v7803_v9 = vld [vmem:[#allocation48_spill] sm:$0xff]  ;;  %v1399_v5 = vld [vmem:[%s3768_s8 + $0x150] sm:$0xff]  ;;  %v1400_v40 = vld [vmem:[%s3768_s8 + $0x158] sm:$0xff] }
 0x1b9   : > { %7800 = vst [vmem:[#allocation42_spill] sm:$0xff] %v5887_v2  ;;  %v5893_v39 = vmul.f32 %v1377_v38, %v7803_v9  ;;  %v1398_v43 = vld [vmem:[%s3768_s8 + $0x148] sm:$0xff]  ;;  %v1401_v59 = vld [vmem:[%s3768_s8 + $0x160] sm:$0xff]  ;;  %v7807_v46 = vld [vmem:[#allocation54_spill] sm:$0xff] }
 0x1ba   : > { %7798 = vst [vmem:[#allocation39_spill] sm:$0xff] %v5884_v57  ;;  %7802 = vst [vmem:[#allocation45_spill] sm:$0xff] %v5890_v58  ;;  %v7805_v20 = vld [vmem:[#allocation51_spill] sm:$0xff]  ;;  %v5903_v24 = vmul.f32 %v1379_v48, %v7807_v46  ;;  %v7809_v45 = vld [vmem:[#allocation57_spill] sm:$0xff] }
 0x1bb   : > { %7804 = vst [vmem:[#allocation48_spill] sm:$0xff] %v5893_v39  ;;  %v5900_v49 = vmul.f32 %v1378_v61, %v7805_v20  ;;  %v5906_v10 = vmul.f32 %v1380_v13, %v7809_v45  ;;  %v7811_v56 = vld [vmem:[#allocation60_spill] sm:$0xff]  ;;  %v1403_v39 = vld [vmem:[%s3768_s8 + $0x170] sm:$0xff]  ;;  %v1404_v58 = vld [vmem:[%s3768_s8 + $0x178] sm:$0xff] }
 0x1bc   : > { %7808 = vst [vmem:[#allocation54_spill] sm:$0xff] %v5903_v24  ;;  %v5909_v38 = vmul.f32 %v1381_v29, %v7811_v56  ;;  %v1402_v9 = vld [vmem:[%s3768_s8 + $0x168] sm:$0xff]  ;;  %v1405_v2 = vld [vmem:[%s3768_s8 + $0x180] sm:$0xff]  ;;  %v7815_v20 = vld [vmem:[#allocation66_spill] sm:$0xff] }
 0x1bd   : > { %7806 = vst [vmem:[#allocation51_spill] sm:$0xff] %v5900_v49  ;;  %7810 = vst [vmem:[#allocation57_spill] sm:$0xff] %v5906_v10  ;;  %v7813_v57 = vld [vmem:[#allocation63_spill] sm:$0xff]  ;;  %v5919_v48 = vmul.f32 %v1383_v4, %v7815_v20  ;;  %v7817_v46 = vld [vmem:[#allocation69_spill] sm:$0xff] }
 0x1be   : > { %7812 = vst [vmem:[#allocation60_spill] sm:$0xff] %v5909_v38  ;;  %v5916_v61 = vmul.f32 %v1382_v42, %v7813_v57  ;;  %v5922_v13 = vmul.f32 %v1384_v34, %v7817_v46  ;;  %v7819_v45 = vld [vmem:[#allocation72_spill] sm:$0xff]  ;;  %v1407_v38 = vld [vmem:[%s3768_s8 + $0x190] sm:$0xff]  ;;  %v1408_v10 = vld [vmem:[%s3768_s8 + $0x198] sm:$0xff] }
 0x1bf   : > { %7816 = vst [vmem:[#allocation66_spill] sm:$0xff] %v5919_v48  ;;  %v5925_v29 = vmul.f32 %v1385_v25, %v7819_v45  ;;  %v1406_v56 = vld [vmem:[%s3768_s8 + $0x188] sm:$0xff]  ;;  %v1409_v24 = vld [vmem:[%s3768_s8 + $0x1a0] sm:$0xff]  ;;  %v7823_v57 = vld [vmem:[#allocation78_spill] sm:$0xff] }
 0x1c0   : > { %7814 = vst [vmem:[#allocation63_spill] sm:$0xff] %v5916_v61  ;;  %7818 = vst [vmem:[#allocation69_spill] sm:$0xff] %v5922_v13  ;;  %v7821_v49 = vld [vmem:[#allocation75_spill] sm:$0xff]  ;;  %v5935_v4 = vmul.f32 %v1387_v1, %v7823_v57  ;;  %v7825_v20 = vld [vmem:[#allocation81_spill] sm:$0xff] }
 0x1c1   : > { %7820 = vst [vmem:[#allocation72_spill] sm:$0xff] %v5925_v29  ;;  %v5932_v42 = vmul.f32 %v1386_v50, %v7821_v49  ;;  %v5938_v34 = vmul.f32 %v1388_v14, %v7825_v20  ;;  %v7827_v46 = vld [vmem:[#allocation84_spill] sm:$0xff]  ;;  %v1411_v29 = vld [vmem:[%s3768_s8 + $0x1b0] sm:$0xff]  ;;  %v1412_v13 = vld [vmem:[%s3768_s8 + $0x1b8] sm:$0xff] }
 0x1c2   : > { %7824 = vst [vmem:[#allocation78_spill] sm:$0xff] %v5935_v4  ;;  %v5941_v25 = vmul.f32 %v1389_v35, %v7827_v46  ;;  %v1410_v45 = vld [vmem:[%s3768_s8 + $0x1a8] sm:$0xff]  ;;  %v1413_v48 = vld [vmem:[%s3768_s8 + $0x1c0] sm:$0xff]  ;;  %v7831_v49 = vld [vmem:[#allocation90_spill] sm:$0xff] }
 0x1c3   : > { %7822 = vst [vmem:[#allocation75_spill] sm:$0xff] %v5932_v42  ;;  %7826 = vst [vmem:[#allocation81_spill] sm:$0xff] %v5938_v34  ;;  %v7829_v61 = vld [vmem:[#allocation87_spill] sm:$0xff]  ;;  %v5951_v1 = vmul.f32 %v1391_v44, %v7831_v49  ;;  %v7833_v57 = vld [vmem:[#allocation93_spill] sm:$0xff] }
 0x1c4   : > { %7828 = vst [vmem:[#allocation84_spill] sm:$0xff] %v5941_v25  ;;  %v5948_v50 = vmul.f32 %v1390_v41, %v7829_v61  ;;  %v5954_v14 = vmul.f32 %v1392_v26, %v7833_v57  ;;  %v7835_v20 = vld [vmem:[#allocation96_spill] sm:$0xff]  ;;  %v1415_v25 = vld [vmem:[%s3768_s8 + $0x1d0] sm:$0xff]  ;;  %v1416_v34 = vld [vmem:[%s3768_s8 + $0x1d8] sm:$0xff] }
 0x1c5   : > { %7832 = vst [vmem:[#allocation90_spill] sm:$0xff] %v5951_v1  ;;  %v5957_v35 = vmul.f32 %v1393_v37, %v7835_v20  ;;  %v1414_v46 = vld [vmem:[%s3768_s8 + $0x1c8] sm:$0xff]  ;;  %v1417_v4 = vld [vmem:[%s3768_s8 + $0x1e0] sm:$0xff]  ;;  %v7839_v61 = vld [vmem:[#allocation102_spill] sm:$0xff] }
 0x1c6   : > { %7830 = vst [vmem:[#allocation87_spill] sm:$0xff] %v5948_v50  ;;  %7834 = vst [vmem:[#allocation93_spill] sm:$0xff] %v5954_v14  ;;  %v7837_v42 = vld [vmem:[#allocation99_spill] sm:$0xff]  ;;  %v5967_v44 = vmul.f32 %v1395_v33, %v7839_v61  ;;  %v7841_v49 = vld [vmem:[#allocation105_spill] sm:$0xff] }
 0x1c7   : > { %7836 = vst [vmem:[#allocation96_spill] sm:$0xff] %v5957_v35  ;;  %v5964_v41 = vmul.f32 %v1394_v60, %v7837_v42  ;;  %v5970_v26 = vmul.f32 %v1396_v55, %v7841_v49  ;;  %v7843_v57 = vld [vmem:[#allocation108_spill] sm:$0xff]  ;;  %v1419_v35 = vld [vmem:[%s3768_s8 + $0x1f0] sm:$0xff]  ;;  %v1420_v14 = vld [vmem:[%s3768_s8 + $0x1f8] sm:$0xff] }
 0x1c8   : > { %7840 = vst [vmem:[#allocation102_spill] sm:$0xff] %v5967_v44  ;;  %v5973_v37 = vmul.f32 %v1397_v53, %v7843_v57  ;;  %v1418_v20 = vld [vmem:[%s3768_s8 + $0x1e8] sm:$0xff]  ;;  %v1421_v1 = vld [vmem:[%s3768_s8 + $0x200] sm:$0xff]  ;;  %v7847_v42 = vld [vmem:[#allocation114_spill] sm:$0xff] }
 0x1c9   : > { %7838 = vst [vmem:[#allocation99_spill] sm:$0xff] %v5964_v41  ;;  %7842 = vst [vmem:[#allocation105_spill] sm:$0xff] %v5970_v26  ;;  %v7845_v50 = vld [vmem:[#allocation111_spill] sm:$0xff]  ;;  %v5983_v33 = vmul.f32 %v1399_v5, %v7847_v42  ;;  %v7849_v61 = vld [vmem:[#allocation117_spill] sm:$0xff] }
 0x1ca   : > { %7844 = vst [vmem:[#allocation108_spill] sm:$0xff] %v5973_v37  ;;  %v5980_v60 = vmul.f32 %v1398_v43, %v7845_v50  ;;  %v5986_v55 = vmul.f32 %v1400_v40, %v7849_v61  ;;  %v7851_v49 = vld [vmem:[#allocation121_spill] sm:$0xff]  ;;  %v1422_v57 = vld [vmem:[%s3768_s8 + $0x208] sm:$0xff]  ;;  %v1424_v26 = vld [vmem:[%s3768_s8 + $0x218] sm:$0xff] }
 0x1cb   : > { %7848 = vst [vmem:[#allocation114_spill] sm:$0xff] %v5983_v33  ;;  %v5989_v53 = vmul.f32 %v1401_v59, %v7851_v49  ;;  %v1423_v37 = vld [vmem:[%s3768_s8 + $0x210] sm:$0xff]  ;;  %v1425_v44 = vld [vmem:[%s3768_s8 + $0x220] sm:$0xff]  ;;  %v7855_v50 = vld [vmem:[#allocation26_spill] sm:$0xff] }
 0x1cc   : > { %7846 = vst [vmem:[#allocation111_spill] sm:$0xff] %v5980_v60  ;;  %7850 = vst [vmem:[#allocation117_spill] sm:$0xff] %v5986_v55  ;;  %v7853_v41 = vld [vmem:[#allocation25_spill] sm:$0xff]  ;;  %v5999_v5 = vmul.f32 %v1403_v39, %v7855_v50  ;;  %v7857_v42 = vld [vmem:[#allocation130_spill] sm:$0xff] }
 0x1cd   : > { %7852 = vst [vmem:[#allocation121_spill] sm:$0xff] %v5989_v53  ;;  %v5996_v43 = vmul.f32 %v1402_v9, %v7853_v41  ;;  %v6002_v40 = vmul.f32 %v1404_v58, %v7857_v42  ;;  %v7859_v61 = vld [vmem:[#allocation28_spill] sm:$0xff]  ;;  %v1427_v53 = vld [vmem:[%s3768_s8 + $0x230] sm:$0xff]  ;;  %v1428_v55 = vld [vmem:[%s3768_s8 + $0x238] sm:$0xff] }
 0x1ce   : > { %7856 = vst [vmem:[#allocation26_spill] sm:$0xff] %v5999_v5  ;;  %v6005_v59 = vmul.f32 %v1405_v2, %v7859_v61  ;;  %v1426_v49 = vld [vmem:[%s3768_s8 + $0x228] sm:$0xff]  ;;  %v1429_v33 = vld [vmem:[%s3768_s8 + $0x240] sm:$0xff]  ;;  %v7861_v60 = vld [vmem:[#allocation29_spill] sm:$0xff] }
 0x1cf   : > { %7854 = vst [vmem:[#allocation25_spill] sm:$0xff] %v5996_v43  ;;  %7858 = vst [vmem:[#allocation130_spill] sm:$0xff] %v6002_v40  ;;  %v6012_v9 = vmul.f32 %v1406_v56, %v7861_v60  ;;  %v7863_v41 = vld [vmem:[#allocation139_spill] sm:$0xff]  ;;  %v7867_v42 = vld [vmem:[#allocation32_spill] sm:$0xff] }
 0x1d0   : > { %7860 = vst [vmem:[#allocation28_spill] sm:$0xff] %v6005_v59  ;;  %v6015_v39 = vmul.f32 %v1407_v38, %v7863_v41  ;;  %v7865_v50 = vld [vmem:[#allocation31_spill] sm:$0xff]  ;;  %v6021_v2 = vmul.f32 %v1409_v24, %v7867_v42  ;;  %v1430_v61 = vld [vmem:[%s3768_s8 + $0x248] sm:$0xff]  ;;  %v1431_v59 = vld [vmem:[%s3768_s8 + $0x250] sm:$0xff] }
 0x1d1   : > { %7862 = vst [vmem:[#allocation29_spill] sm:$0xff] %v6012_v9  ;;  %v6018_v58 = vmul.f32 %v1408_v10, %v7865_v50  ;;  %v1432_v40 = vld [vmem:[%s3768_s8 + $0x258] sm:$0xff]  ;;  %v1433_v5 = vld [vmem:[%s3768_s8 + $0x260] sm:$0xff]  ;;  %v7869_v43 = vld [vmem:[#allocation148_spill] sm:$0xff] }
 0x1d2   : > { %7864 = vst [vmem:[#allocation139_spill] sm:$0xff] %v6015_v39  ;;  %7868 = vst [vmem:[#allocation32_spill] sm:$0xff] %v6021_v2  ;;  %v6028_v56 = vmul.f32 %v1410_v45, %v7869_v43  ;;  %v7871_v60 = vld [vmem:[#allocation34_spill] sm:$0xff]  ;;  %v7873_v41 = vld [vmem:[#allocation35_spill] sm:$0xff] }
 0x1d3   : > { %7866 = vst [vmem:[#allocation31_spill] sm:$0xff] %v6018_v58  ;;  %v6031_v38 = vmul.f32 %v1411_v29, %v7871_v60  ;;  %v6034_v10 = vmul.f32 %v1412_v13, %v7873_v41  ;;  %v7875_v50 = vld [vmem:[#allocation157_spill] sm:$0xff]  ;;  %v1434_v42 = vld [vmem:[%s3768_s8 + $0x268] sm:$0xff]  ;;  %v1436_v58 = vld [vmem:[%s3768_s8 + $0x278] sm:$0xff] }
 0x1d4   : > { %7870 = vst [vmem:[#allocation148_spill] sm:$0xff] %v6028_v56  ;;  %v6037_v24 = vmul.f32 %v1413_v48, %v7875_v50  ;;  %v1435_v2 = vld [vmem:[%s3768_s8 + $0x270] sm:$0xff]  ;;  %v1437_v39 = vld [vmem:[%s3768_s8 + $0x280] sm:$0xff]  ;;  %v7879_v43 = vld [vmem:[#allocation38_spill] sm:$0xff] }
 0x1d5   : > { %7872 = vst [vmem:[#allocation34_spill] sm:$0xff] %v6031_v38  ;;  %7874 = vst [vmem:[#allocation35_spill] sm:$0xff] %v6034_v10  ;;  %v7877_v9 = vld [vmem:[#allocation37_spill] sm:$0xff]  ;;  %v6047_v29 = vmul.f32 %v1415_v25, %v7879_v43  ;;  %v7881_v60 = vld [vmem:[#allocation166_spill] sm:$0xff] }
 0x1d6   : > { %7876 = vst [vmem:[#allocation157_spill] sm:$0xff] %v6037_v24  ;;  %v6044_v45 = vmul.f32 %v1414_v46, %v7877_v9  ;;  %v6050_v13 = vmul.f32 %v1416_v34, %v7881_v60  ;;  %v7883_v41 = vld [vmem:[#allocation40_spill] sm:$0xff]  ;;  %v1439_v24 = vld [vmem:[%s3768_s8 + $0x290] sm:$0xff]  ;;  %v1440_v10 = vld [vmem:[%s3768_s8 + $0x298] sm:$0xff] }
 0x1d7   : > { %7880 = vst [vmem:[#allocation38_spill] sm:$0xff] %v6047_v29  ;;  %v6053_v48 = vmul.f32 %v1417_v4, %v7883_v41  ;;  %v1438_v50 = vld [vmem:[%s3768_s8 + $0x288] sm:$0xff]  ;;  %v1441_v38 = vld [vmem:[%s3768_s8 + $0x2a0] sm:$0xff]  ;;  %v7885_v56 = vld [vmem:[#allocation41_spill] sm:$0xff] }
 0x1d8   : > { %7878 = vst [vmem:[#allocation37_spill] sm:$0xff] %v6044_v45  ;;  %7882 = vst [vmem:[#allocation166_spill] sm:$0xff] %v6050_v13  ;;  %v6060_v46 = vmul.f32 %v1418_v20, %v7885_v56  ;;  %v7887_v9 = vld [vmem:[#allocation175_spill] sm:$0xff]  ;;  %v7891_v60 = vld [vmem:[#allocation44_spill] sm:$0xff] }
 0x1d9   : > { %7884 = vst [vmem:[#allocation40_spill] sm:$0xff] %v6053_v48  ;;  %v6063_v25 = vmul.f32 %v1419_v35, %v7887_v9  ;;  %v7889_v43 = vld [vmem:[#allocation43_spill] sm:$0xff]  ;;  %v6069_v4 = vmul.f32 %v1421_v1, %v7891_v60  ;;  %v1442_v41 = vld [vmem:[%s3768_s8 + $0x2a8] sm:$0xff]  ;;  %v1443_v48 = vld [vmem:[%s3768_s8 + $0x2b0] sm:$0xff] }
 0x1da   : > { %7886 = vst [vmem:[#allocation41_spill] sm:$0xff] %v6060_v46  ;;  %v6066_v34 = vmul.f32 %v1420_v14, %v7889_v43  ;;  %v1444_v13 = vld [vmem:[%s3768_s8 + $0x2b8] sm:$0xff]  ;;  %v1445_v29 = vld [vmem:[%s3768_s8 + $0x2c0] sm:$0xff]  ;;  %v7893_v45 = vld [vmem:[#allocation184_spill] sm:$0xff] }
 0x1db   : > { %7888 = vst [vmem:[#allocation175_spill] sm:$0xff] %v6063_v25  ;;  %7892 = vst [vmem:[#allocation44_spill] sm:$0xff] %v6069_v4  ;;  %v6076_v20 = vmul.f32 %v1422_v57, %v7893_v45  ;;  %v7895_v56 = vld [vmem:[#allocation46_spill] sm:$0xff]  ;;  %v7897_v9 = vld [vmem:[#allocation47_spill] sm:$0xff] }
 0x1dc   : > { %7890 = vst [vmem:[#allocation43_spill] sm:$0xff] %v6066_v34  ;;  %v6079_v35 = vmul.f32 %v1423_v37, %v7895_v56  ;;  %v6082_v14 = vmul.f32 %v1424_v26, %v7897_v9  ;;  %v7899_v43 = vld [vmem:[#allocation193_spill] sm:$0xff]  ;;  %v1446_v60 = vld [vmem:[%s3768_s8 + $0x2c8] sm:$0xff]  ;;  %v1448_v34 = vld [vmem:[%s3768_s8 + $0x2d8] sm:$0xff] }
 0x1dd   : > { %7894 = vst [vmem:[#allocation184_spill] sm:$0xff] %v6076_v20  ;;  %v6085_v1 = vmul.f32 %v1425_v44, %v7899_v43  ;;  %v1447_v4 = vld [vmem:[%s3768_s8 + $0x2d0] sm:$0xff]  ;;  %v1449_v25 = vld [vmem:[%s3768_s8 + $0x2e0] sm:$0xff]  ;;  %v7903_v45 = vld [vmem:[#allocation50_spill] sm:$0xff] }
 0x1de   : > { %7896 = vst [vmem:[#allocation46_spill] sm:$0xff] %v6079_v35  ;;  %7898 = vst [vmem:[#allocation47_spill] sm:$0xff] %v6082_v14  ;;  %v7901_v46 = vld [vmem:[#allocation49_spill] sm:$0xff]  ;;  %v6095_v37 = vmul.f32 %v1427_v53, %v7903_v45  ;;  %v7905_v56 = vld [vmem:[#allocation202_spill] sm:$0xff] }
 0x1df   : > { %7900 = vst [vmem:[#allocation193_spill] sm:$0xff] %v6085_v1  ;;  %v6092_v57 = vmul.f32 %v1426_v49, %v7901_v46  ;;  %v6098_v26 = vmul.f32 %v1428_v55, %v7905_v56  ;;  %v7907_v9 = vld [vmem:[#allocation52_spill] sm:$0xff]  ;;  %v1451_v1 = vld [vmem:[%s3768_s8 + $0x2f0] sm:$0xff]  ;;  %v1452_v14 = vld [vmem:[%s3768_s8 + $0x2f8] sm:$0xff] }
 0x1e0   : > { %7904 = vst [vmem:[#allocation50_spill] sm:$0xff] %v6095_v37  ;;  %v6101_v44 = vmul.f32 %v1429_v33, %v7907_v9  ;;  %v1450_v43 = vld [vmem:[%s3768_s8 + $0x2e8] sm:$0xff]  ;;  %v1453_v35 = vld [vmem:[%s3768_s8 + $0x300] sm:$0xff]  ;;  %v7909_v20 = vld [vmem:[#allocation53_spill] sm:$0xff] }
 0x1e1   : > { %7902 = vst [vmem:[#allocation49_spill] sm:$0xff] %v6092_v57  ;;  %7906 = vst [vmem:[#allocation202_spill] sm:$0xff] %v6098_v26  ;;  %v6108_v49 = vmul.f32 %v1430_v61, %v7909_v20  ;;  %v7910_v46 = vld [vmem:[#allocation211_spill] sm:$0xff]  ;;  %v7913_v56 = vld [vmem:[#allocation56_spill] sm:$0xff] }
 0x1e2   : > { %7908 = vst [vmem:[#allocation52_spill] sm:$0xff] %v6101_v44  ;;  %v6111_v53 = vmul.f32 %v1431_v59, %v7910_v46  ;;  %v7911_v45 = vld [vmem:[#allocation55_spill] sm:$0xff]  ;;  %v6117_v33 = vmul.f32 %v1433_v5, %v7913_v56  ;;  %v1454_v9 = vld [vmem:[%s3768_s8 + $0x308] sm:$0xff]  ;;  %v1455_v44 = vld [vmem:[%s3768_s8 + $0x310] sm:$0xff]  ;;  %v6133_v5 = vmul.f32 %v1437_v39, %v5068_v51  ;;  %v6149_v51 = vmul.f32 %v1441_v38, %v5105_v31 }
 0x1e3   : > { %v6114_v55 = vmul.f32 %v1432_v40, %v7911_v45  ;;  %v1456_v26 = vld [vmem:[%s3768_s8 + $0x318] sm:$0xff]  ;;  %v1457_v37 = vld [vmem:[%s3768_s8 + $0x320] sm:$0xff]  ;;  %v1458_v45 = vld [vmem:[%s3768_s8 + $0x328] sm:$0xff]  ;;  %v6165_v31 = vmul.f32 %v1445_v29, %v5121_v62  ;;  %v6181_v62 = vmul.f32 %v1449_v25, %v5137_v28 }
 0x1e4   : > { %7914 = vst [vmem:[#allocation211_spill] sm:$0xff] %v6117_v33  ;;  %v7915_v57 = vld [vmem:[#allocation219_spill] sm:$0xff]  ;;  %v7916_v20 = vld [vmem:[#allocation58_spill] sm:$0xff]  ;;  %v1459_v56 = vld [vmem:[%s3768_s8 + $0x330] sm:$0xff] }
 0x1e5   : > { %7912 = vst [vmem:[#allocation53_spill] sm:$0xff] %v6114_v55  ;;  %v6124_v61 = vmul.f32 %v1434_v42, %v7915_v57  ;;  %v6127_v59 = vmul.f32 %v1435_v2, %v7916_v20  ;;  %v7917_v46 = vld [vmem:[#allocation59_spill] sm:$0xff]  ;;  %v1460_v33 = vld [vmem:[%s3768_s8 + $0x338] sm:$0xff]  ;;  %v6140_v42 = vmul.f32 %v1438_v50, %v5081_v19  ;;  %v6143_v2 = vmul.f32 %v1439_v24, %v5093_v63  ;;  %v1462_v39 = vld [vmem:[%s3768_s8 + $0x348] sm:$0xff] }
 0x1e6   : > { %v6130_v40 = vmul.f32 %v1436_v58, %v7917_v46  ;;  %v1461_v55 = vld [vmem:[%s3768_s8 + $0x340] sm:$0xff]  ;;  %v6146_v58 = vmul.f32 %v1440_v10, %v5101_v30  ;;  %v1463_v57 = vld [vmem:[%s3768_s8 + $0x350] sm:$0xff]  ;;  %v1464_v20 = vld [vmem:[%s3768_s8 + $0x358] sm:$0xff]  ;;  %v6156_v19 = vmul.f32 %v1442_v41, %v5109_v22  ;;  %v6159_v63 = vmul.f32 %v1443_v48, %v5113_v15  ;;  %7918 = vst [vmem:[#allocation55_spill] sm:$0xff] %v6165_v31 }
 0x1e7   : > { %v1465_v46 = vld [vmem:[%s3768_s8 + $0x360] sm:$0xff]  ;;  %v6162_v30 = vmul.f32 %v1444_v13, %v5117_v3  ;;  %v1466_v38 = vld [vmem:[%s3768_s8 + $0x368] sm:$0xff]  ;;  %v1467_v10 = vld [vmem:[%s3768_s8 + $0x370] sm:$0xff]  ;;  %v6172_v22 = vmul.f32 %v1446_v60, %v5125_v12  ;;  %v6175_v15 = vmul.f32 %v1447_v4, %v5129_v32  ;;  %v6178_v3 = vmul.f32 %v1448_v34, %v5133_v6  ;;  %7921 = vst [vmem:[#allocation58_spill] sm:$0xff] %v6181_v62 }
 0x1e8   : > { %v1468_v24 = vld [vmem:[%s3768_s8 + $0x378] sm:$0xff]  ;;  %v1469_v50 = vld [vmem:[%s3768_s8 + $0x380] sm:$0xff]  ;;  %v1470_v29 = vld [vmem:[%s3768_s8 + $0x388] sm:$0xff]  ;;  %v6194_v6 = vmul.f32 %v1452_v14, %v5149_v54 }
 0x1e9   : > { %7919 = vst [vmem:[#allocation56_spill] sm:$0xff] %v6175_v15  ;;  %7920 = vst [vmem:[#allocation219_spill] sm:$0xff] %v6178_v3  ;;  %v1471_v13 = vld [vmem:[%s3768_s8 + $0x390] sm:$0xff]  ;;  %v1472_v48 = vld [vmem:[%s3768_s8 + $0x398] sm:$0xff] }
 0x1ea   : > { %v1473_v41 = vld [vmem:[%s3768_s8 + $0x3a0] sm:$0xff]  ;;  %v7922_v31 = vld [vmem:[#allocation61_spill] sm:$0xff]  ;;  %v7923_v60 = vld [vmem:[#allocation62_spill] sm:$0xff]  ;;  %7924 = vst [vmem:[#allocation59_spill] sm:$0xff] %v6194_v6 }
 0x1eb   : > { %v6188_v12 = vmul.f32 %v1450_v43, %v7922_v31  ;;  %v6191_v32 = vmul.f32 %v1451_v1, %v7923_v60  ;;  %v7925_v34 = vld [vmem:[#allocation64_spill] sm:$0xff]  ;;  %v1475_v4 = vld [vmem:[%s3768_s8 + $0x3b0] sm:$0xff]  ;;  %v1476_v62 = vld [vmem:[%s3768_s8 + $0x3b8] sm:$0xff]  ;;  %v6207_v1 = vmul.f32 %v1455_v44, %v5161_v0 }
 0x1ec   : > { %v6197_v28 = vmul.f32 %v1453_v35, %v7925_v34  ;;  %v1474_v25 = vld [vmem:[%s3768_s8 + $0x3a8] sm:$0xff]  ;;  %v1477_v3 = vld [vmem:[%s3768_s8 + $0x3c0] sm:$0xff]  ;;  %v7927_v15 = vld [vmem:[#allocation65_spill] sm:$0xff] }
 0x1ed   : > { %v6204_v43 = vmul.f32 %v1454_v9, %v7927_v15  ;;  %7928 = vst [vmem:[#allocation62_spill] sm:$0xff] %v6207_v1  ;;  %v7929_v31 = vld [vmem:[#allocation67_spill] sm:$0xff]  ;;  %v7931_v14 = vld [vmem:[#allocation68_spill] sm:$0xff]  ;;  %v1479_v34 = vld [vmem:[%s3768_s8 + $0x3d0] sm:$0xff]  ;;  %v6220_v9 = vmul.f32 %v1458_v45, %v5173_v11 }
 0x1ee   : > { %7926 = vst [vmem:[#allocation61_spill] sm:$0xff] %v6197_v28  ;;  %v6210_v54 = vmul.f32 %v1456_v26, %v7929_v31  ;;  %v6213_v35 = vmul.f32 %v1457_v37, %v7931_v14  ;;  %v1478_v60 = vld [vmem:[%s3768_s8 + $0x3c8] sm:$0xff]  ;;  %v1480_v28 = vld [vmem:[%s3768_s8 + $0x3d8] sm:$0xff]  ;;  %v1481_v6 = vld [vmem:[%s3768_s8 + $0x3e0] sm:$0xff]  ;;  %v6229_v37 = vmul.f32 %v1461_v55, %v5185_v23 }
 0x1ef   : > { %v7933_v15 = vld [vmem:[#allocation70_spill] sm:$0xff]  ;;  %v7935_v44 = vld [vmem:[#allocation71_spill] sm:$0xff]  ;;  %v1482_v31 = vld [vmem:[%s3768_s8 + $0x3e8] sm:$0xff] }
 0x1f0   : > { %7930 = vst [vmem:[#allocation64_spill] sm:$0xff] %v6210_v54  ;;  %7932 = vst [vmem:[#allocation65_spill] sm:$0xff] %v6213_v35  ;;  %v6223_v0 = vmul.f32 %v1459_v56, %v7933_v15  ;;  %v6226_v26 = vmul.f32 %v1460_v33, %v7935_v44  ;;  %v1483_v14 = vld [vmem:[%s3768_s8 + $0x3f0] sm:$0xff]  ;;  %v1484_v35 = vld [vmem:[%s3768_s8 + $0x3f8] sm:$0xff]  ;;  %v6242_v33 = vmul.f32 %v1464_v20, %v5197_v21 }
 0x1f1   : > { %7937 = vst [vmem:[#allocation70_spill] sm:$0xff] %v6229_v37  ;;  %v1485_v54 = vld [vmem:[%s3768_s8 + $0x400] sm:$0xff]  ;;  %v7938_v1 = vld [vmem:[#allocation73_spill] sm:$0xff]  ;;  %v7939_v45 = vld [vmem:[#allocation74_spill] sm:$0xff] }
 0x1f2   : > { %7934 = vst [vmem:[#allocation67_spill] sm:$0xff] %v6223_v0  ;;  %7936 = vst [vmem:[#allocation68_spill] sm:$0xff] %v6226_v26  ;;  %v6236_v11 = vmul.f32 %v1462_v39, %v7938_v1  ;;  %v6239_v56 = vmul.f32 %v1463_v57, %v7939_v45  ;;  %v7941_v15 = vld [vmem:[#allocation76_spill] sm:$0xff]  ;;  %v1487_v44 = vld [vmem:[%s3768_s8 + $0x410] sm:$0xff]  ;;  %v6255_v57 = vmul.f32 %v1467_v10, %v5209_v52 }
 0x1f3   : > { %7940 = vst [vmem:[#allocation71_spill] sm:$0xff] %v6242_v33  ;;  %v6245_v23 = vmul.f32 %v1465_v46, %v7941_v15  ;;  %v1486_v55 = vld [vmem:[%s3768_s8 + $0x408] sm:$0xff]  ;;  %v1488_v37 = vld [vmem:[%s3768_s8 + $0x418] sm:$0xff]  ;;  %v1489_v26 = vld [vmem:[%s3768_s8 + $0x420] sm:$0xff] }
 0x1f4   : > { %v7943_v0 = vld [vmem:[#allocation77_spill] sm:$0xff]  ;;  %7944 = vst [vmem:[#allocation74_spill] sm:$0xff] %v6255_v57  ;;  %v7945_v1 = vld [vmem:[#allocation79_spill] sm:$0xff]  ;;  %v7947_v20 = vld [vmem:[#allocation80_spill] sm:$0xff] }
 0x1f5   : > { %7942 = vst [vmem:[#allocation73_spill] sm:$0xff] %v6245_v23  ;;  %v6252_v39 = vmul.f32 %v1466_v38, %v7943_v0  ;;  %v6258_v21 = vmul.f32 %v1468_v24, %v7945_v1  ;;  %v6261_v46 = vmul.f32 %v1469_v50, %v7947_v20  ;;  %v1490_v45 = vld [vmem:[%s3768_s8 + $0x428] sm:$0xff]  ;;  %v1491_v15 = vld [vmem:[%s3768_s8 + $0x430] sm:$0xff]  ;;  %v1492_v23 = vld [vmem:[%s3768_s8 + $0x438] sm:$0xff]  ;;  %v6268_v38 = vmul.f32 %v1470_v29, %v5221_v47 }
 0x1f6   : > { %v1493_v33 = vld [vmem:[%s3768_s8 + $0x440] sm:$0xff]  ;;  %v7949_v0 = vld [vmem:[#allocation82_spill] sm:$0xff]  ;;  %v6277_v50 = vmul.f32 %v1473_v41, %v5233_v7  ;;  %v1494_v1 = vld [vmem:[%s3768_s8 + $0x448] sm:$0xff] }
 0x1f7   : > { %7946 = vst [vmem:[#allocation76_spill] sm:$0xff] %v6258_v21  ;;  %7948 = vst [vmem:[#allocation77_spill] sm:$0xff] %v6261_v46  ;;  %v6271_v52 = vmul.f32 %v1471_v13, %v7949_v0  ;;  %v7951_v10 = vld [vmem:[#allocation83_spill] sm:$0xff]  ;;  %v1495_v20 = vld [vmem:[%s3768_s8 + $0x450] sm:$0xff] }
 0x1f8   : > { %v6274_v24 = vmul.f32 %v1472_v48, %v7951_v10  ;;  %7953 = vst [vmem:[#allocation82_spill] sm:$0xff] %v6277_v50  ;;  %v1496_v46 = vld [vmem:[%s3768_s8 + $0x458] sm:$0xff]  ;;  %v1497_v21 = vld [vmem:[%s3768_s8 + $0x460] sm:$0xff]  ;;  %v7954_v57 = vld [vmem:[#allocation85_spill] sm:$0xff]  ;;  %v6290_v48 = vmul.f32 %v1476_v62, %v5245_v8 }
 0x1f9   : > { %7950 = vst [vmem:[#allocation79_spill] sm:$0xff] %v6271_v52  ;;  %v6284_v47 = vmul.f32 %v1474_v25, %v7954_v57  ;;  %v7955_v29 = vld [vmem:[#allocation86_spill] sm:$0xff]  ;;  %v7957_v0 = vld [vmem:[#allocation88_spill] sm:$0xff]  ;;  %v1499_v10 = vld [vmem:[%s3768_s8 + $0x470] sm:$0xff] }
 0x1fa   : > { %7952 = vst [vmem:[#allocation80_spill] sm:$0xff] %v6274_v24  ;;  %v6287_v13 = vmul.f32 %v1475_v4, %v7955_v29  ;;  %7956 = vst [vmem:[#allocation83_spill] sm:$0xff] %v6290_v48  ;;  %v6293_v7 = vmul.f32 %v1477_v3, %v7957_v0  ;;  %v1498_v41 = vld [vmem:[%s3768_s8 + $0x468] sm:$0xff]  ;;  %v1500_v50 = vld [vmem:[%s3768_s8 + $0x478] sm:$0xff]  ;;  %v6303_v4 = vmul.f32 %v1479_v34, %v5257_v16 }
 0x1fb   : > { %v1501_v24 = vld [vmem:[%s3768_s8 + $0x480] sm:$0xff]  ;;  %v7959_v52 = vld [vmem:[#allocation89_spill] sm:$0xff]  ;;  %v7963_v62 = vld [vmem:[#allocation92_spill] sm:$0xff] }
 0x1fc   : > { %7958 = vst [vmem:[#allocation85_spill] sm:$0xff] %v6293_v7  ;;  %v6300_v25 = vmul.f32 %v1478_v60, %v7959_v52  ;;  %7960 = vst [vmem:[#allocation86_spill] sm:$0xff] %v6303_v4  ;;  %v7961_v57 = vld [vmem:[#allocation91_spill] sm:$0xff]  ;;  %v6309_v3 = vmul.f32 %v1481_v6, %v7963_v62  ;;  %v1502_v29 = vld [vmem:[%s3768_s8 + $0x488] sm:$0xff]  ;;  %v6316_v60 = vmul.f32 %v1482_v31, %v5269_v17 }
 0x1fd   : > { %v6306_v8 = vmul.f32 %v1480_v28, %v7961_v57  ;;  %v1503_v0 = vld [vmem:[%s3768_s8 + $0x490] sm:$0xff]  ;;  %v1504_v7 = vld [vmem:[%s3768_s8 + $0x498] sm:$0xff]  ;;  %v1505_v48 = vld [vmem:[%s3768_s8 + $0x4a0] sm:$0xff]  ;;  %v6325_v6 = vmul.f32 %v1485_v54, %v5281_v18 }
 0x1fe   : > { %7964 = vst [vmem:[#allocation89_spill] sm:$0xff] %v6309_v3  ;;  %7965 = vst [vmem:[#allocation91_spill] sm:$0xff] %v6316_v60  ;;  %v7966_v52 = vld [vmem:[#allocation94_spill] sm:$0xff]  ;;  %v7968_v34 = vld [vmem:[#allocation95_spill] sm:$0xff] }
 0x1ff   : > { %7962 = vst [vmem:[#allocation88_spill] sm:$0xff] %v6306_v8  ;;  %v6319_v16 = vmul.f32 %v1483_v14, %v7966_v52  ;;  %v6322_v28 = vmul.f32 %v1484_v35, %v7968_v34  ;;  %7970 = vst [vmem:[#allocation95_spill] sm:$0xff] %v6325_v6  ;;  %v1506_v57 = vld [vmem:[%s3768_s8 + $0x4a8] sm:$0xff]  ;;  %v1507_v62 = vld [vmem:[%s3768_s8 + $0x4b0] sm:$0xff] }
 0x200   : > { %v1508_v3 = vld [vmem:[%s3768_s8 + $0x4b8] sm:$0xff]  ;;  %v1509_v8 = vld [vmem:[%s3768_s8 + $0x4c0] sm:$0xff]  ;;  %v7971_v4 = vld [vmem:[#allocation97_spill] sm:$0xff] }
 0x201   : > { %7967 = vst [vmem:[#allocation92_spill] sm:$0xff] %v6319_v16  ;;  %7969 = vst [vmem:[#allocation94_spill] sm:$0xff] %v6322_v28  ;;  %v6332_v17 = vmul.f32 %v1486_v55, %v7971_v4  ;;  %v7972_v31 = vld [vmem:[#allocation98_spill] sm:$0xff]  ;;  %v7974_v52 = vld [vmem:[#allocation100_spill] sm:$0xff] }
 0x202   : > { %v6335_v14 = vmul.f32 %v1487_v44, %v7972_v31  ;;  %v6338_v35 = vmul.f32 %v1488_v37, %v7974_v52  ;;  %v7976_v34 = vld [vmem:[#allocation101_spill] sm:$0xff]  ;;  %v1510_v54 = vld [vmem:[%s3768_s8 + $0x4c8] sm:$0xff]  ;;  %v1512_v28 = vld [vmem:[%s3768_s8 + $0x4d8] sm:$0xff] }
 0x203   : > { %v6341_v18 = vmul.f32 %v1489_v26, %v7976_v34  ;;  %v1511_v6 = vld [vmem:[%s3768_s8 + $0x4d0] sm:$0xff]  ;;  %v1513_v16 = vld [vmem:[%s3768_s8 + $0x4e0] sm:$0xff]  ;;  %v7980_v4 = vld [vmem:[#allocation104_spill] sm:$0xff] }
 0x204   : > { %7973 = vst [vmem:[#allocation97_spill] sm:$0xff] %v6335_v14  ;;  %7975 = vst [vmem:[#allocation98_spill] sm:$0xff] %v6338_v35  ;;  %v7978_v60 = vld [vmem:[#allocation103_spill] sm:$0xff]  ;;  %v6351_v44 = vmul.f32 %v1491_v15, %v7980_v4  ;;  %v7982_v31 = vld [vmem:[#allocation106_spill] sm:$0xff] }
 0x205   : > { %7977 = vst [vmem:[#allocation100_spill] sm:$0xff] %v6341_v18  ;;  %v6348_v55 = vmul.f32 %v1490_v45, %v7978_v60  ;;  %v6354_v37 = vmul.f32 %v1492_v23, %v7982_v31  ;;  %v7984_v52 = vld [vmem:[#allocation107_spill] sm:$0xff]  ;;  %v1514_v34 = vld [vmem:[%s3768_s8 + $0x4e8] sm:$0xff]  ;;  %v1515_v18 = vld [vmem:[%s3768_s8 + $0x4f0] sm:$0xff]  ;;  %v6364_v45 = vmul.f32 %v1494_v1, %v5317_v27 }
 0x206   : > { %7981 = vst [vmem:[#allocation103_spill] sm:$0xff] %v6351_v44  ;;  %v6357_v26 = vmul.f32 %v1493_v33, %v7984_v52  ;;  %v1516_v35 = vld [vmem:[%s3768_s8 + $0x4f8] sm:$0xff]  ;;  %v1517_v14 = vld [vmem:[%s3768_s8 + $0x500] sm:$0xff]  ;;  %v7987_v60 = vld [vmem:[#allocation109_spill] sm:$0xff] }
 0x207   : > { %7979 = vst [vmem:[#allocation101_spill] sm:$0xff] %v6348_v55  ;;  %7983 = vst [vmem:[#allocation104_spill] sm:$0xff] %v6354_v37  ;;  %v6367_v15 = vmul.f32 %v1495_v20, %v7987_v60  ;;  %v7989_v4 = vld [vmem:[#allocation110_spill] sm:$0xff]  ;;  %v7991_v31 = vld [vmem:[#allocation112_spill] sm:$0xff] }
 0x208   : > { %7985 = vst [vmem:[#allocation106_spill] sm:$0xff] %v6357_v26  ;;  %7986 = vst [vmem:[#allocation107_spill] sm:$0xff] %v6364_v45  ;;  %v6370_v23 = vmul.f32 %v1496_v46, %v7989_v4  ;;  %v6373_v33 = vmul.f32 %v1497_v21, %v7991_v31  ;;  %v1518_v52 = vld [vmem:[%s3768_s8 + $0x508] sm:$0xff]  ;;  %v1519_v26 = vld [vmem:[%s3768_s8 + $0x510] sm:$0xff] }
 0x209   : > { %7988 = vst [vmem:[#allocation109_spill] sm:$0xff] %v6367_v15  ;;  %v1520_v37 = vld [vmem:[%s3768_s8 + $0x518] sm:$0xff]  ;;  %v1521_v44 = vld [vmem:[%s3768_s8 + $0x520] sm:$0xff]  ;;  %v7993_v55 = vld [vmem:[#allocation113_spill] sm:$0xff] }
 0x20a   : > { %7990 = vst [vmem:[#allocation110_spill] sm:$0xff] %v6370_v23  ;;  %7992 = vst [vmem:[#allocation112_spill] sm:$0xff] %v6373_v33  ;;  %v6380_v27 = vmul.f32 %v1498_v41, %v7993_v55  ;;  %v7995_v1 = vld [vmem:[#allocation115_spill] sm:$0xff]  ;;  %v7997_v60 = vld [vmem:[#allocation116_spill] sm:$0xff] }
 0x20b   : > { %v6383_v20 = vmul.f32 %v1499_v10, %v7995_v1  ;;  %v6386_v46 = vmul.f32 %v1500_v50, %v7997_v60  ;;  %v7999_v4 = vld [vmem:[#allocation118_spill] sm:$0xff]  ;;  %v1522_v31 = vld [vmem:[%s3768_s8 + $0x528] sm:$0xff]  ;;  %v1523_v33 = vld [vmem:[%s3768_s8 + $0x530] sm:$0xff]  ;;  %v6399_v10 = vmul.f32 %v1503_v0, %v5353_v36 }
 0x20c   : > { %7994 = vst [vmem:[#allocation113_spill] sm:$0xff] %v6380_v27  ;;  %v6389_v21 = vmul.f32 %v1501_v24, %v7999_v4  ;;  %v1524_v23 = vld [vmem:[%s3768_s8 + $0x538] sm:$0xff]  ;;  %v1525_v15 = vld [vmem:[%s3768_s8 + $0x540] sm:$0xff]  ;;  %v8004_v55 = vld [vmem:[#allocation120_spill] sm:$0xff] }
 0x20d   : > { %7996 = vst [vmem:[#allocation115_spill] sm:$0xff] %v6383_v20  ;;  %7998 = vst [vmem:[#allocation116_spill] sm:$0xff] %v6386_v46  ;;  %v8001_v45 = vld [vmem:[#allocation119_spill] sm:$0xff]  ;;  %v6402_v50 = vmul.f32 %v1504_v7, %v8004_v55  ;;  %v8006_v1 = vld [vmem:[#allocation122_spill] sm:$0xff] }
 0x20e   : > { %8000 = vst [vmem:[#allocation118_spill] sm:$0xff] %v6389_v21  ;;  %v6396_v41 = vmul.f32 %v1502_v29, %v8001_v45  ;;  %8003 = vst [vmem:[#allocation241_spill] sm:$0xff] %v6399_v10  ;;  %v6405_v24 = vmul.f32 %v1505_v48, %v8006_v1  ;;  %v1526_v60 = vld [vmem:[%s3768_s8 + $0x548] sm:$0xff]  ;;  %v1527_v4 = vld [vmem:[%s3768_s8 + $0x550] sm:$0xff] }
 0x20f   : > { %8005 = vst [vmem:[#allocation120_spill] sm:$0xff] %v6402_v50  ;;  %v1528_v21 = vld [vmem:[%s3768_s8 + $0x558] sm:$0xff]  ;;  %v1529_v46 = vld [vmem:[%s3768_s8 + $0x560] sm:$0xff]  ;;  %v8010_v45 = vld [vmem:[#allocation124_spill] sm:$0xff] }
 0x210   : > { %8002 = vst [vmem:[#allocation119_spill] sm:$0xff] %v6396_v41  ;;  %8007 = vst [vmem:[#allocation122_spill] sm:$0xff] %v6405_v24  ;;  %v8008_v20 = vld [vmem:[#allocation123_spill] sm:$0xff]  ;;  %v6415_v36 = vmul.f32 %v1507_v62, %v8010_v45  ;;  %v8012_v0 = vld [vmem:[#allocation125_spill] sm:$0xff] }
 0x211   : > { %v6412_v29 = vmul.f32 %v1506_v57, %v8008_v20  ;;  %v6418_v7 = vmul.f32 %v1508_v3, %v8012_v0  ;;  %v8014_v55 = vld [vmem:[#allocation126_spill] sm:$0xff]  ;;  %v1530_v1 = vld [vmem:[%s3768_s8 + $0x568] sm:$0xff]  ;;  %v1531_v24 = vld [vmem:[%s3768_s8 + $0x570] sm:$0xff] }
 0x212   : > { %8011 = vst [vmem:[#allocation124_spill] sm:$0xff] %v6415_v36  ;;  %v6421_v48 = vmul.f32 %v1509_v8, %v8014_v55  ;;  %v1532_v50 = vld [vmem:[%s3768_s8 + $0x578] sm:$0xff]  ;;  %v1533_v10 = vld [vmem:[%s3768_s8 + $0x580] sm:$0xff]  ;;  %v8018_v20 = vld [vmem:[#allocation128_spill] sm:$0xff] }
 0x213   : > { %8009 = vst [vmem:[#allocation123_spill] sm:$0xff] %v6412_v29  ;;  %8013 = vst [vmem:[#allocation125_spill] sm:$0xff] %v6418_v7  ;;  %v8016_v41 = vld [vmem:[#allocation127_spill] sm:$0xff]  ;;  %v6431_v62 = vmul.f32 %v1511_v6, %v8018_v20  ;;  %v8020_v45 = vld [vmem:[#allocation129_spill] sm:$0xff] }
 0x214   : > { %8015 = vst [vmem:[#allocation126_spill] sm:$0xff] %v6421_v48  ;;  %v6428_v57 = vmul.f32 %v1510_v54, %v8016_v41  ;;  %v6434_v3 = vmul.f32 %v1512_v28, %v8020_v45  ;;  %v8022_v0 = vld [vmem:[#allocation131_spill] sm:$0xff]  ;;  %v1534_v55 = vld [vmem:[%s3768_s8 + $0x588] sm:$0xff]  ;;  %v1535_v48 = vld [vmem:[%s3768_s8 + $0x590] sm:$0xff] }
 0x215   : > { %8019 = vst [vmem:[#allocation128_spill] sm:$0xff] %v6431_v62  ;;  %v6437_v8 = vmul.f32 %v1513_v16, %v8022_v0  ;;  %v1536_v7 = vld [vmem:[%s3768_s8 + $0x598] sm:$0xff]  ;;  %v1537_v36 = vld [vmem:[%s3768_s8 + $0x5a0] sm:$0xff]  ;;  %v8024_v29 = vld [vmem:[#allocation132_spill] sm:$0xff] }
 0x216   : > { %8017 = vst [vmem:[#allocation127_spill] sm:$0xff] %v6428_v57  ;;  %8021 = vst [vmem:[#allocation129_spill] sm:$0xff] %v6434_v3  ;;  %v6444_v54 = vmul.f32 %v1514_v34, %v8024_v29  ;;  %v8026_v41 = vld [vmem:[#allocation133_spill] sm:$0xff]  ;;  %v8028_v20 = vld [vmem:[#allocation134_spill] sm:$0xff] }
 0x217   : > { %8023 = vst [vmem:[#allocation131_spill] sm:$0xff] %v6437_v8  ;;  %v6447_v6 = vmul.f32 %v1515_v18, %v8026_v41  ;;  %v6450_v28 = vmul.f32 %v1516_v35, %v8028_v20  ;;  %v8030_v45 = vld [vmem:[#allocation135_spill] sm:$0xff]  ;;  %v1538_v0 = vld [vmem:[%s3768_s8 + $0x5a8] sm:$0xff]  ;;  %v1539_v8 = vld [vmem:[%s3768_s8 + $0x5b0] sm:$0xff] }
 0x218   : > { %8025 = vst [vmem:[#allocation132_spill] sm:$0xff] %v6444_v54  ;;  %v6453_v16 = vmul.f32 %v1517_v14, %v8030_v45  ;;  %v1540_v3 = vld [vmem:[%s3768_s8 + $0x5b8] sm:$0xff]  ;;  %v1541_v62 = vld [vmem:[%s3768_s8 + $0x5c0] sm:$0xff]  ;;  %v8032_v57 = vld [vmem:[#allocation136_spill] sm:$0xff] }
 0x219   : > { %8027 = vst [vmem:[#allocation133_spill] sm:$0xff] %v6447_v6  ;;  %8029 = vst [vmem:[#allocation134_spill] sm:$0xff] %v6450_v28  ;;  %v6460_v34 = vmul.f32 %v1518_v52, %v8032_v57  ;;  %v8034_v29 = vld [vmem:[#allocation137_spill] sm:$0xff]  ;;  %v8036_v41 = vld [vmem:[#allocation138_spill] sm:$0xff] }
 0x21a   : > { %8031 = vst [vmem:[#allocation135_spill] sm:$0xff] %v6453_v16  ;;  %v6463_v18 = vmul.f32 %v1519_v26, %v8034_v29  ;;  %v6466_v35 = vmul.f32 %v1520_v37, %v8036_v41  ;;  %v8038_v20 = vld [vmem:[#allocation140_spill] sm:$0xff]  ;;  %v1543_v16 = vld [vmem:[%s3768_s8 + $0x5d0] sm:$0xff]  ;;  %v1544_v28 = vld [vmem:[%s3768_s8 + $0x5d8] sm:$0xff] }
 0x21b   : > { %8033 = vst [vmem:[#allocation136_spill] sm:$0xff] %v6460_v34  ;;  %v6469_v14 = vmul.f32 %v1521_v44, %v8038_v20  ;;  %v1542_v45 = vld [vmem:[%s3768_s8 + $0x5c8] sm:$0xff]  ;;  %v1545_v6 = vld [vmem:[%s3768_s8 + $0x5e0] sm:$0xff]  ;;  %v8040_v54 = vld [vmem:[#allocation141_spill] sm:$0xff] }
 0x21c   : > { %8035 = vst [vmem:[#allocation137_spill] sm:$0xff] %v6463_v18  ;;  %8037 = vst [vmem:[#allocation138_spill] sm:$0xff] %v6466_v35  ;;  %v6476_v52 = vmul.f32 %v1522_v31, %v8040_v54  ;;  %v8042_v57 = vld [vmem:[#allocation142_spill] sm:$0xff]  ;;  %v8044_v29 = vld [vmem:[#allocation143_spill] sm:$0xff] }
 0x21d   : > { %8039 = vst [vmem:[#allocation140_spill] sm:$0xff] %v6469_v14  ;;  %v6479_v26 = vmul.f32 %v1523_v33, %v8042_v57  ;;  %v6482_v37 = vmul.f32 %v1524_v23, %v8044_v29  ;;  %v8046_v41 = vld [vmem:[#allocation144_spill] sm:$0xff]  ;;  %v1547_v14 = vld [vmem:[%s3768_s8 + $0x5f0] sm:$0xff]  ;;  %v1548_v35 = vld [vmem:[%s3768_s8 + $0x5f8] sm:$0xff] }
 0x21e   : > { %8041 = vst [vmem:[#allocation141_spill] sm:$0xff] %v6476_v52  ;;  %v6485_v44 = vmul.f32 %v1525_v15, %v8046_v41  ;;  %v1546_v20 = vld [vmem:[%s3768_s8 + $0x5e8] sm:$0xff]  ;;  %v1549_v18 = vld [vmem:[%s3768_s8 + $0x600] sm:$0xff]  ;;  %v8048_v34 = vld [vmem:[#allocation145_spill] sm:$0xff] }
 0x21f   : > { %8043 = vst [vmem:[#allocation142_spill] sm:$0xff] %v6479_v26  ;;  %8045 = vst [vmem:[#allocation143_spill] sm:$0xff] %v6482_v37  ;;  %v6492_v31 = vmul.f32 %v1526_v60, %v8048_v34  ;;  %v8050_v54 = vld [vmem:[#allocation146_spill] sm:$0xff]  ;;  %v8052_v57 = vld [vmem:[#allocation147_spill] sm:$0xff] }
 0x220   : > { %8047 = vst [vmem:[#allocation144_spill] sm:$0xff] %v6485_v44  ;;  %v6495_v33 = vmul.f32 %v1527_v4, %v8050_v54  ;;  %v6498_v23 = vmul.f32 %v1528_v21, %v8052_v57  ;;  %v8054_v29 = vld [vmem:[#allocation149_spill] sm:$0xff]  ;;  %v1550_v41 = vld [vmem:[%s3768_s8 + $0x608] sm:$0xff]  ;;  %v1552_v37 = vld [vmem:[%s3768_s8 + $0x618] sm:$0xff] }
 0x221   : > { %8049 = vst [vmem:[#allocation145_spill] sm:$0xff] %v6492_v31  ;;  %v6501_v15 = vmul.f32 %v1529_v46, %v8054_v29  ;;  %v1551_v44 = vld [vmem:[%s3768_s8 + $0x610] sm:$0xff]  ;;  %v1553_v26 = vld [vmem:[%s3768_s8 + $0x620] sm:$0xff]  ;;  %v8056_v52 = vld [vmem:[#allocation150_spill] sm:$0xff] }
 0x222   : > { %8051 = vst [vmem:[#allocation146_spill] sm:$0xff] %v6495_v33  ;;  %8053 = vst [vmem:[#allocation147_spill] sm:$0xff] %v6498_v23  ;;  %v6508_v60 = vmul.f32 %v1530_v1, %v8056_v52  ;;  %v8058_v34 = vld [vmem:[#allocation151_spill] sm:$0xff]  ;;  %v8060_v54 = vld [vmem:[#allocation152_spill] sm:$0xff] }
 0x223   : > { %8055 = vst [vmem:[#allocation149_spill] sm:$0xff] %v6501_v15  ;;  %v6511_v4 = vmul.f32 %v1531_v24, %v8058_v34  ;;  %v6514_v21 = vmul.f32 %v1532_v50, %v8060_v54  ;;  %v8062_v57 = vld [vmem:[#allocation153_spill] sm:$0xff]  ;;  %v1554_v29 = vld [vmem:[%s3768_s8 + $0x628] sm:$0xff]  ;;  %v1556_v23 = vld [vmem:[%s3768_s8 + $0x638] sm:$0xff] }
 0x224   : > { %8057 = vst [vmem:[#allocation150_spill] sm:$0xff] %v6508_v60  ;;  %v6517_v46 = vmul.f32 %v1533_v10, %v8062_v57  ;;  %v1555_v15 = vld [vmem:[%s3768_s8 + $0x630] sm:$0xff]  ;;  %v1557_v33 = vld [vmem:[%s3768_s8 + $0x640] sm:$0xff]  ;;  %v8064_v31 = vld [vmem:[#allocation154_spill] sm:$0xff] }
 0x225   : > { %8059 = vst [vmem:[#allocation151_spill] sm:$0xff] %v6511_v4  ;;  %8061 = vst [vmem:[#allocation152_spill] sm:$0xff] %v6514_v21  ;;  %v6524_v1 = vmul.f32 %v1534_v55, %v8064_v31  ;;  %v8066_v52 = vld [vmem:[#allocation155_spill] sm:$0xff]  ;;  %v8068_v34 = vld [vmem:[#allocation156_spill] sm:$0xff] }
 0x226   : > { %8063 = vst [vmem:[#allocation153_spill] sm:$0xff] %v6517_v46  ;;  %v6527_v24 = vmul.f32 %v1535_v48, %v8066_v52  ;;  %v6530_v50 = vmul.f32 %v1536_v7, %v8068_v34  ;;  %v8070_v54 = vld [vmem:[#allocation158_spill] sm:$0xff]  ;;  %v1558_v57 = vld [vmem:[%s3768_s8 + $0x648] sm:$0xff]  ;;  %v1559_v46 = vld [vmem:[%s3768_s8 + $0x650] sm:$0xff] }
 0x227   : > { %8065 = vst [vmem:[#allocation154_spill] sm:$0xff] %v6524_v1  ;;  %v6533_v10 = vmul.f32 %v1537_v36, %v8070_v54  ;;  %v1560_v21 = vld [vmem:[%s3768_s8 + $0x658] sm:$0xff]  ;;  %v1561_v4 = vld [vmem:[%s3768_s8 + $0x660] sm:$0xff]  ;;  %v8074_v31 = vld [vmem:[#allocation160_spill] sm:$0xff] }
 0x228   : > { %8067 = vst [vmem:[#allocation155_spill] sm:$0xff] %v6527_v24  ;;  %8069 = vst [vmem:[#allocation156_spill] sm:$0xff] %v6530_v50  ;;  %v8072_v60 = vld [vmem:[#allocation159_spill] sm:$0xff]  ;;  %v6543_v48 = vmul.f32 %v1539_v8, %v8074_v31  ;;  %v8076_v52 = vld [vmem:[#allocation161_spill] sm:$0xff] }
 0x229   : > { %8071 = vst [vmem:[#allocation158_spill] sm:$0xff] %v6533_v10  ;;  %v6540_v55 = vmul.f32 %v1538_v0, %v8072_v60  ;;  %v6546_v7 = vmul.f32 %v1540_v3, %v8076_v52  ;;  %v8078_v34 = vld [vmem:[#allocation162_spill] sm:$0xff]  ;;  %v1562_v54 = vld [vmem:[%s3768_s8 + $0x668] sm:$0xff]  ;;  %v1563_v10 = vld [vmem:[%s3768_s8 + $0x670] sm:$0xff] }
 0x22a   : > { %8075 = vst [vmem:[#allocation160_spill] sm:$0xff] %v6543_v48  ;;  %v6549_v36 = vmul.f32 %v1541_v62, %v8078_v34  ;;  %v1564_v50 = vld [vmem:[%s3768_s8 + $0x678] sm:$0xff]  ;;  %v1565_v24 = vld [vmem:[%s3768_s8 + $0x680] sm:$0xff]  ;;  %v8082_v60 = vld [vmem:[#allocation164_spill] sm:$0xff] }
 0x22b   : > { %8073 = vst [vmem:[#allocation159_spill] sm:$0xff] %v6540_v55  ;;  %8077 = vst [vmem:[#allocation161_spill] sm:$0xff] %v6546_v7  ;;  %v8080_v1 = vld [vmem:[#allocation163_spill] sm:$0xff]  ;;  %v6559_v8 = vmul.f32 %v1543_v16, %v8082_v60  ;;  %v8084_v31 = vld [vmem:[#allocation165_spill] sm:$0xff] }
 0x22c   : > { %8079 = vst [vmem:[#allocation162_spill] sm:$0xff] %v6549_v36  ;;  %v6556_v0 = vmul.f32 %v1542_v45, %v8080_v1  ;;  %v6562_v3 = vmul.f32 %v1544_v28, %v8084_v31  ;;  %v8086_v52 = vld [vmem:[#allocation167_spill] sm:$0xff]  ;;  %v1566_v34 = vld [vmem:[%s3768_s8 + $0x688] sm:$0xff]  ;;  %v1567_v36 = vld [vmem:[%s3768_s8 + $0x690] sm:$0xff] }
 0x22d   : > { %8083 = vst [vmem:[#allocation164_spill] sm:$0xff] %v6559_v8  ;;  %v6565_v62 = vmul.f32 %v1545_v6, %v8086_v52  ;;  %v1568_v7 = vld [vmem:[%s3768_s8 + $0x698] sm:$0xff]  ;;  %v1569_v48 = vld [vmem:[%s3768_s8 + $0x6a0] sm:$0xff]  ;;  %v8088_v55 = vld [vmem:[#allocation168_spill] sm:$0xff] }
 0x22e   : > { %8081 = vst [vmem:[#allocation163_spill] sm:$0xff] %v6556_v0  ;;  %8085 = vst [vmem:[#allocation165_spill] sm:$0xff] %v6562_v3  ;;  %v6572_v45 = vmul.f32 %v1546_v20, %v8088_v55  ;;  %v8090_v1 = vld [vmem:[#allocation169_spill] sm:$0xff]  ;;  %v8092_v60 = vld [vmem:[#allocation170_spill] sm:$0xff] }
 0x22f   : > { %8087 = vst [vmem:[#allocation167_spill] sm:$0xff] %v6565_v62  ;;  %v6575_v16 = vmul.f32 %v1547_v14, %v8090_v1  ;;  %v6578_v28 = vmul.f32 %v1548_v35, %v8092_v60  ;;  %v8094_v31 = vld [vmem:[#allocation171_spill] sm:$0xff]  ;;  %v1570_v52 = vld [vmem:[%s3768_s8 + $0x6a8] sm:$0xff]  ;;  %v1571_v62 = vld [vmem:[%s3768_s8 + $0x6b0] sm:$0xff] }
 0x230   : > { %8089 = vst [vmem:[#allocation168_spill] sm:$0xff] %v6572_v45  ;;  %v6581_v6 = vmul.f32 %v1549_v18, %v8094_v31  ;;  %v1572_v3 = vld [vmem:[%s3768_s8 + $0x6b8] sm:$0xff]  ;;  %v1573_v8 = vld [vmem:[%s3768_s8 + $0x6c0] sm:$0xff]  ;;  %v8096_v0 = vld [vmem:[#allocation172_spill] sm:$0xff] }
 0x231   : > { %8091 = vst [vmem:[#allocation169_spill] sm:$0xff] %v6575_v16  ;;  %8093 = vst [vmem:[#allocation170_spill] sm:$0xff] %v6578_v28  ;;  %v6588_v20 = vmul.f32 %v1550_v41, %v8096_v0  ;;  %v8098_v55 = vld [vmem:[#allocation173_spill] sm:$0xff]  ;;  %v8100_v1 = vld [vmem:[#allocation174_spill] sm:$0xff] }
 0x232   : > { %8095 = vst [vmem:[#allocation171_spill] sm:$0xff] %v6581_v6  ;;  %v6591_v14 = vmul.f32 %v1551_v44, %v8098_v55  ;;  %v6594_v35 = vmul.f32 %v1552_v37, %v8100_v1  ;;  %v8102_v60 = vld [vmem:[#allocation176_spill] sm:$0xff]  ;;  %v1575_v6 = vld [vmem:[%s3768_s8 + $0x6d0] sm:$0xff]  ;;  %v1576_v28 = vld [vmem:[%s3768_s8 + $0x6d8] sm:$0xff] }
 0x233   : > { %8097 = vst [vmem:[#allocation172_spill] sm:$0xff] %v6588_v20  ;;  %v6597_v18 = vmul.f32 %v1553_v26, %v8102_v60  ;;  %v1574_v31 = vld [vmem:[%s3768_s8 + $0x6c8] sm:$0xff]  ;;  %v1577_v16 = vld [vmem:[%s3768_s8 + $0x6e0] sm:$0xff]  ;;  %v8104_v45 = vld [vmem:[#allocation177_spill] sm:$0xff] }
 0x234   : > { %8099 = vst [vmem:[#allocation173_spill] sm:$0xff] %v6591_v14  ;;  %8101 = vst [vmem:[#allocation174_spill] sm:$0xff] %v6594_v35  ;;  %v6604_v41 = vmul.f32 %v1554_v29, %v8104_v45  ;;  %v8106_v0 = vld [vmem:[#allocation178_spill] sm:$0xff]  ;;  %v8108_v55 = vld [vmem:[#allocation179_spill] sm:$0xff] }
 0x235   : > { %8103 = vst [vmem:[#allocation176_spill] sm:$0xff] %v6597_v18  ;;  %v6607_v44 = vmul.f32 %v1555_v15, %v8106_v0  ;;  %v6610_v37 = vmul.f32 %v1556_v23, %v8108_v55  ;;  %v8110_v1 = vld [vmem:[#allocation180_spill] sm:$0xff]  ;;  %v1579_v18 = vld [vmem:[%s3768_s8 + $0x6f0] sm:$0xff]  ;;  %v1580_v35 = vld [vmem:[%s3768_s8 + $0x6f8] sm:$0xff] }
 0x236   : > { %8105 = vst [vmem:[#allocation177_spill] sm:$0xff] %v6604_v41  ;;  %v6613_v26 = vmul.f32 %v1557_v33, %v8110_v1  ;;  %v1578_v60 = vld [vmem:[%s3768_s8 + $0x6e8] sm:$0xff]  ;;  %v1581_v14 = vld [vmem:[%s3768_s8 + $0x700] sm:$0xff]  ;;  %v8112_v20 = vld [vmem:[#allocation181_spill] sm:$0xff] }
 0x237   : > { %8107 = vst [vmem:[#allocation178_spill] sm:$0xff] %v6607_v44  ;;  %8109 = vst [vmem:[#allocation179_spill] sm:$0xff] %v6610_v37  ;;  %v6620_v27 = vmul.f32 %v1558_v57, %v8112_v20  ;;  %v8113_v29 = vld [vmem:[#allocation182_spill] sm:$0xff]  ;;  %v8115_v15 = vld [vmem:[#allocation183_spill] sm:$0xff] }
 0x238   : > { %8111 = vst [vmem:[#allocation180_spill] sm:$0xff] %v6613_v26  ;;  %v6623_v45 = vmul.f32 %v1559_v46, %v8113_v29  ;;  %v6626_v0 = vmul.f32 %v1560_v21, %v8115_v15  ;;  %v8117_v23 = vld [vmem:[#allocation185_spill] sm:$0xff]  ;;  %v1582_v33 = vld [vmem:[%s3768_s8 + $0x708] sm:$0xff]  ;;  %v1584_v26 = vld [vmem:[%s3768_s8 + $0x718] sm:$0xff] }
 0x239   : > { %v6629_v55 = vmul.f32 %v1561_v4, %v8117_v23  ;;  %v1583_v1 = vld [vmem:[%s3768_s8 + $0x710] sm:$0xff]  ;;  %v1585_v37 = vld [vmem:[%s3768_s8 + $0x720] sm:$0xff]  ;;  %v8119_v44 = vld [vmem:[#allocation186_spill] sm:$0xff] }
 0x23a   : > { %8114 = vst [vmem:[#allocation181_spill] sm:$0xff] %v6623_v45  ;;  %8116 = vst [vmem:[#allocation182_spill] sm:$0xff] %v6626_v0  ;;  %v6636_v41 = vmul.f32 %v1562_v54, %v8119_v44  ;;  %v8120_v57 = vld [vmem:[#allocation187_spill] sm:$0xff]  ;;  %v8122_v46 = vld [vmem:[#allocation188_spill] sm:$0xff] }
 0x23b   : > { %8118 = vst [vmem:[#allocation183_spill] sm:$0xff] %v6629_v55  ;;  %v6639_v20 = vmul.f32 %v1563_v10, %v8120_v57  ;;  %v6642_v29 = vmul.f32 %v1564_v50, %v8122_v46  ;;  %v8124_v21 = vld [vmem:[#allocation189_spill] sm:$0xff]  ;;  %v1586_v15 = vld [vmem:[%s3768_s8 + $0x728] sm:$0xff]  ;;  %v1588_v55 = vld [vmem:[%s3768_s8 + $0x738] sm:$0xff] }
 0x23c   : > { %v6645_v4 = vmul.f32 %v1565_v24, %v8124_v21  ;;  %v1587_v23 = vld [vmem:[%s3768_s8 + $0x730] sm:$0xff]  ;;  %v8126_v0 = vld [vmem:[#allocation190_spill] sm:$0xff]  ;;  %v8127_v54 = vld [vmem:[#allocation191_spill] sm:$0xff] }
 0x23d   : > { %8121 = vst [vmem:[#allocation185_spill] sm:$0xff] %v6639_v20  ;;  %8123 = vst [vmem:[#allocation186_spill] sm:$0xff] %v6642_v29  ;;  %v6651_v45 = vmul.f32 %v1566_v34, %v8126_v0  ;;  %v6654_v44 = vmul.f32 %v1567_v36, %v8127_v54  ;;  %v8129_v10 = vld [vmem:[#allocation192_spill] sm:$0xff]  ;;  %v8131_v50 = vld [vmem:[#allocation194_spill] sm:$0xff] }
 0x23e   : > { %8125 = vst [vmem:[#allocation187_spill] sm:$0xff] %v6645_v4  ;;  %v6657_v57 = vmul.f32 %v1568_v7, %v8129_v10  ;;  %v6660_v46 = vmul.f32 %v1569_v48, %v8131_v50  ;;  %v1589_v24 = vld [vmem:[%s3768_s8 + $0x740] sm:$0xff]  ;;  %v1590_v21 = vld [vmem:[%s3768_s8 + $0x748] sm:$0xff]  ;;  %v1591_v4 = vld [vmem:[%s3768_s8 + $0x750] sm:$0xff] }
 0x23f   : > { %8128 = vst [vmem:[#allocation188_spill] sm:$0xff] %v6654_v44  ;;  %v8133_v29 = vld [vmem:[#allocation195_spill] sm:$0xff]  ;;  %v8134_v34 = vld [vmem:[#allocation196_spill] sm:$0xff]  ;;  %v8136_v36 = vld [vmem:[#allocation221_spill] sm:$0xff] }
 0x240   : > { %8130 = vst [vmem:[#allocation189_spill] sm:$0xff] %v6657_v57  ;;  %8132 = vst [vmem:[#allocation190_spill] sm:$0xff] %v6660_v46  ;;  %v6666_v20 = vmul.f32 %v1570_v52, %v8133_v29  ;;  %v6669_v0 = vmul.f32 %v1571_v62, %v8134_v34  ;;  %v6672_v54 = vmul.f32 %v1572_v3, %v8136_v36  ;;  %v8138_v7 = vld [vmem:[#allocation197_spill] sm:$0xff]  ;;  %v1592_v48 = vld [vmem:[%s3768_s8 + $0x758] sm:$0xff] }
 0x241   : > { %v6675_v10 = vmul.f32 %v1573_v8, %v8138_v7  ;;  %v1593_v50 = vld [vmem:[%s3768_s8 + $0x760] sm:$0xff]  ;;  %v1594_v46 = vld [vmem:[%s3768_s8 + $0x768] sm:$0xff]  ;;  %v8140_v57 = vld [vmem:[#allocation198_spill] sm:$0xff] }
 0x242   : > { %8135 = vst [vmem:[#allocation191_spill] sm:$0xff] %v6669_v0  ;;  %8137 = vst [vmem:[#allocation192_spill] sm:$0xff] %v6672_v54  ;;  %v6681_v44 = vmul.f32 %v1574_v31, %v8140_v57  ;;  %v8141_v52 = vld [vmem:[#allocation199_spill] sm:$0xff]  ;;  %v8143_v62 = vld [vmem:[#allocation200_spill] sm:$0xff] }
 0x243   : > { %8139 = vst [vmem:[#allocation194_spill] sm:$0xff] %v6675_v10  ;;  %v6684_v29 = vmul.f32 %v1575_v6, %v8141_v52  ;;  %v6687_v34 = vmul.f32 %v1576_v28, %v8143_v62  ;;  %v8145_v3 = vld [vmem:[#allocation201_spill] sm:$0xff]  ;;  %v1596_v7 = vld [vmem:[%s3768_s8 + $0x778] sm:$0xff]  ;;  %v1597_v10 = vld [vmem:[%s3768_s8 + $0x780] sm:$0xff] }
 0x244   : > { %v6690_v36 = vmul.f32 %v1577_v16, %v8145_v3  ;;  %v1595_v8 = vld [vmem:[%s3768_s8 + $0x770] sm:$0xff]  ;;  %v8147_v54 = vld [vmem:[#allocation203_spill] sm:$0xff]  ;;  %v8148_v31 = vld [vmem:[#allocation204_spill] sm:$0xff] }
 0x245   : > { %8142 = vst [vmem:[#allocation195_spill] sm:$0xff] %v6684_v29  ;;  %8144 = vst [vmem:[#allocation196_spill] sm:$0xff] %v6687_v34  ;;  %v6696_v0 = vmul.f32 %v1578_v60, %v8147_v54  ;;  %v6699_v57 = vmul.f32 %v1579_v18, %v8148_v31  ;;  %v8150_v6 = vld [vmem:[#allocation205_spill] sm:$0xff]  ;;  %v8152_v28 = vld [vmem:[#allocation222_spill] sm:$0xff] }
 0x246   : > { %8146 = vst [vmem:[#allocation221_spill] sm:$0xff] %v6690_v36  ;;  %v6702_v52 = vmul.f32 %v1580_v35, %v8150_v6  ;;  %v6705_v62 = vmul.f32 %v1581_v14, %v8152_v28  ;;  %v1598_v16 = vld [vmem:[%s3768_s8 + $0x788] sm:$0xff]  ;;  %v1599_v3 = vld [vmem:[%s3768_s8 + $0x790] sm:$0xff]  ;;  %v1600_v36 = vld [vmem:[%s3768_s8 + $0x798] sm:$0xff] }
 0x247   : > { %8149 = vst [vmem:[#allocation197_spill] sm:$0xff] %v6699_v57  ;;  %v8154_v34 = vld [vmem:[#allocation206_spill] sm:$0xff]  ;;  %v8156_v60 = vld [vmem:[#allocation207_spill] sm:$0xff]  ;;  %v8158_v18 = vld [vmem:[#allocation208_spill] sm:$0xff] }
 0x248   : > { %8151 = vst [vmem:[#allocation198_spill] sm:$0xff] %v6702_v52  ;;  %8153 = vst [vmem:[#allocation199_spill] sm:$0xff] %v6705_v62  ;;  %v6711_v29 = vmul.f32 %v1582_v33, %v8154_v34  ;;  %v6714_v54 = vmul.f32 %v1583_v1, %v8156_v60  ;;  %v6717_v31 = vmul.f32 %v1584_v26, %v8158_v18  ;;  %v8160_v35 = vld [vmem:[#allocation209_spill] sm:$0xff]  ;;  %v1601_v14 = vld [vmem:[%s3768_s8 + $0x7a0] sm:$0xff] }
 0x249   : > { %v6720_v6 = vmul.f32 %v1585_v37, %v8160_v35  ;;  %v1602_v28 = vld [vmem:[%s3768_s8 + $0x7a8] sm:$0xff]  ;;  %v1603_v62 = vld [vmem:[%s3768_s8 + $0x7b0] sm:$0xff]  ;;  %v8162_v52 = vld [vmem:[#allocation210_spill] sm:$0xff] }
 0x24a   : > { %8155 = vst [vmem:[#allocation200_spill] sm:$0xff] %v6711_v29  ;;  %8157 = vst [vmem:[#allocation201_spill] sm:$0xff] %v6714_v54  ;;  %v6726_v57 = vmul.f32 %v1586_v15, %v8162_v52  ;;  %v8164_v33 = vld [vmem:[#allocation212_spill] sm:$0xff]  ;;  %v8166_v1 = vld [vmem:[#allocation213_spill] sm:$0xff] }
 0x24b   : > { %8159 = vst [vmem:[#allocation203_spill] sm:$0xff] %v6717_v31  ;;  %8161 = vst [vmem:[#allocation204_spill] sm:$0xff] %v6720_v6  ;;  %v6729_v34 = vmul.f32 %v1587_v23, %v8164_v33  ;;  %v6732_v60 = vmul.f32 %v1588_v55, %v8166_v1  ;;  %v8168_v26 = vld [vmem:[#allocation214_spill] sm:$0xff]  ;;  %v1605_v35 = vld [vmem:[%s3768_s8 + $0x7c0] sm:$0xff] }
 0x24c   : > { %8163 = vst [vmem:[#allocation205_spill] sm:$0xff] %v6726_v57  ;;  %v6735_v18 = vmul.f32 %v1589_v24, %v8168_v26  ;;  %v1604_v37 = vld [vmem:[%s3768_s8 + $0x7b8] sm:$0xff]  ;;  %v1606_v6 = vld [vmem:[%s3768_s8 + $0x7c8] sm:$0xff]  ;;  %v8170_v31 = vld [vmem:[#allocation215_spill] sm:$0xff] }
 0x24d   : > { %8165 = vst [vmem:[#allocation222_spill] sm:$0xff] %v6729_v34  ;;  %8167 = vst [vmem:[#allocation206_spill] sm:$0xff] %v6732_v60  ;;  %v6741_v54 = vmul.f32 %v1590_v21, %v8170_v31  ;;  %v8171_v15 = vld [vmem:[#allocation216_spill] sm:$0xff]  ;;  %v8173_v23 = vld [vmem:[#allocation217_spill] sm:$0xff] }
 0x24e   : > { %8169 = vst [vmem:[#allocation207_spill] sm:$0xff] %v6735_v18  ;;  %v6744_v52 = vmul.f32 %v1591_v4, %v8171_v15  ;;  %v6747_v33 = vmul.f32 %v1592_v48, %v8173_v23  ;;  %v8175_v55 = vld [vmem:[#allocation223_spill] sm:$0xff]  ;;  %v1607_v60 = vld [vmem:[%s3768_s8 + $0x7d0] sm:$0xff]  ;;  %v1608_v24 = vld [vmem:[%s3768_s8 + $0x7d8] sm:$0xff] }
 0x24f   : > { %v6750_v1 = vmul.f32 %v1593_v50, %v8175_v55  ;;  %v1609_v26 = vld [vmem:[%s3768_s8 + $0x7e0] sm:$0xff]  ;;  %v8177_v18 = vld [vmem:[#allocation224_spill] sm:$0xff]  ;;  %v8178_v57 = vld [vmem:[#allocation218_spill] sm:$0xff] }
 0x250   : > { %8172 = vst [vmem:[#allocation208_spill] sm:$0xff] %v6744_v52  ;;  %8174 = vst [vmem:[#allocation209_spill] sm:$0xff] %v6747_v33  ;;  %v6756_v34 = vmul.f32 %v1594_v46, %v8177_v18  ;;  %v6759_v29 = vmul.f32 %v1595_v8, %v8178_v57  ;;  %v8179_v21 = vld [vmem:[#allocation225_spill] sm:$0xff]  ;;  %v8181_v4 = vld [vmem:[#allocation226_spill] sm:$0xff] }
 0x251   : > { %8176 = vst [vmem:[#allocation210_spill] sm:$0xff] %v6750_v1  ;;  %v6762_v31 = vmul.f32 %v1596_v7, %v8179_v21  ;;  %v6765_v15 = vmul.f32 %v1597_v10, %v8181_v4  ;;  %v1610_v48 = vld [vmem:[%s3768_s8 + $0x7e8] sm:$0xff]  ;;  %v1611_v23 = vld [vmem:[%s3768_s8 + $0x7f0] sm:$0xff]  ;;  %v1612_v33 = vld [vmem:[%s3768_s8 + $0x7f8] sm:$0xff] }
 0x252   : > { %v8183_v50 = vld [vmem:[#allocation220_spill] sm:$0xff]  ;;  %v8184_v1 = vld [vmem:[#allocation227_spill] sm:$0xff]  ;;  %v8186_v8 = vld [vmem:[#allocation229_spill] sm:$0xff] }
 0x253   : > { %8180 = vst [vmem:[#allocation212_spill] sm:$0xff] %v6762_v31  ;;  %8182 = vst [vmem:[#allocation213_spill] sm:$0xff] %v6765_v15  ;;  %v6771_v55 = vmul.f32 %v1598_v16, %v8183_v50  ;;  %v6774_v52 = vmul.f32 %v1599_v3, %v8184_v1  ;;  %v8185_v46 = vld [vmem:[#allocation228_spill] sm:$0xff]  ;;  %v6780_v57 = vmul.f32 %v1601_v14, %v8186_v8  ;;  %v8187_v7 = vld [vmem:[#allocation230_spill] sm:$0xff] }
 0x254   : > { %v6777_v18 = vmul.f32 %v1600_v36, %v8185_v46  ;;  %v6783_v21 = vmul.f32 %v1602_v28, %v8187_v7  ;;  %v8188_v10 = vld [vmem:[#allocation231_spill] sm:$0xff]  ;;  %v8189_v15 = vld [vmem:[#allocation232_spill] sm:$0xff]  ;;  %v8190_v16 = vld [vmem:[#allocation233_spill] sm:$0xff] }
 0x255   : > { %v6786_v4 = vmul.f32 %v1603_v62, %v8188_v10  ;;  %v6789_v31 = vmul.f32 %v1604_v37, %v8189_v15  ;;  %v6792_v50 = vmul.f32 %v1605_v35, %v8190_v16  ;;  %v8192_v3 = vld [vmem:[#allocation234_spill] sm:$0xff]  ;;  %v8194_v36 = vld [vmem:[#allocation235_spill] sm:$0xff]  ;;  %v8196_v14 = vld [vmem:[#allocation236_spill] sm:$0xff] }
 0x256   : > { %v6795_v1 = vmul.f32 %v1606_v6, %v8192_v3  ;;  %v6798_v46 = vmul.f32 %v1607_v60, %v8194_v36  ;;  %v6801_v8 = vmul.f32 %v1608_v24, %v8196_v14  ;;  %v8198_v28 = vld [vmem:[#allocation237_spill] sm:$0xff]  ;;  %v8200_v62 = vld [vmem:[#allocation238_spill] sm:$0xff]  ;;  %v8202_v37 = vld [vmem:[#allocation239_spill] sm:$0xff] }
 0x257   : > { %8191 = vst [vmem:[#allocation214_spill] sm:$0xff] %v6792_v50  ;;  %v6804_v7 = vmul.f32 %v1609_v26, %v8198_v28  ;;  %v6807_v10 = vmul.f32 %v1610_v48, %v8200_v62  ;;  %v6810_v15 = vmul.f32 %v1611_v23, %v8202_v37  ;;  %v8204_v35 = vld [vmem:[#allocation240_spill] sm:$0xff]  ;;  %1874 = sbr.rel (%p3312_p7) target bundleno = 1118 (0x45e), region = 52 }
 0x258   : > { %8193 = vst [vmem:[#allocation215_spill] sm:$0xff] %v6795_v1  ;;  %8195 = vst [vmem:[#allocation216_spill] sm:$0xff] %v6798_v46  ;;  %v6813_v16 = vmul.f32 %v1612_v33, %v8204_v35 }
 0x259   : > { %8197 = vst [vmem:[#allocation217_spill] sm:$0xff] %v6801_v8  ;;  %8199 = vst [vmem:[#allocation223_spill] sm:$0xff] %v6804_v7 }
 0x25a   : > { %8201 = vst [vmem:[#allocation224_spill] sm:$0xff] %v6807_v10  ;;  %8203 = vst [vmem:[#allocation218_spill] sm:$0xff] %v6810_v15 }
 0x25b   : > { %8205 = vst [vmem:[#allocation225_spill] sm:$0xff] %v6813_v16 }
 0x25c   : > { %v8206_v6 = vld [vmem:[#allocation12_spill] sm:$0xff]  ;;  %v8207_v60 = vld [vmem:[#allocation13_spill] sm:$0xff]  ;;  %v8208_v24 = vld [vmem:[#allocation14_spill] sm:$0xff] }
 0x25d   : > { %v1876_v3 = vadd.f32 %v8207_v60, %v8206_v6  ;;  %v8209_v14 = vld [vmem:[#allocation15_spill] sm:$0xff]  ;;  %v8210_v28 = vld [vmem:[#allocation16_spill] sm:$0xff]  ;;  %v8211_v48 = vld [vmem:[#allocation17_spill] sm:$0xff] }
 0x25e   : > { %v8212_v10 = vld [vmem:[#allocation18_spill] sm:$0xff]  ;;  %v8213_v37 = vld [vmem:[#allocation19_spill] sm:$0xff]  ;;  %v8214_v33 = vld [vmem:[#allocation20_spill] sm:$0xff] }
 0x25f   : > { %v1877_v36 = vadd.f32 %v1876_v3, %v8208_v24  ;;  %v8215_v16 = vld [vmem:[#allocation21_spill] sm:$0xff]  ;;  %v8216_v46 = vld [vmem:[#allocation22_spill] sm:$0xff]  ;;  %v8217_v50 = vld [vmem:[#allocation23_spill] sm:$0xff] }
 0x260   : > { %v8218_v60 = vld [vmem:[#allocation24_spill] sm:$0xff]  ;;  %v8219_v24 = vld [vmem:[#allocation27_spill] sm:$0xff] }
 0x261   : > { %v1878_v26 = vadd.f32 %v1877_v36, %v8209_v14  ;;  %v8220_v14 = vld [vmem:[#allocation30_spill] sm:$0xff] }
 0x263   : > { %v1879_v7 = vadd.f32 %v1878_v26, %v8210_v28  ;;  %v8221_v28 = vld [vmem:[#allocation33_spill] sm:$0xff] }
 0x265   : > { %v1880_v62 = vadd.f32 %v1879_v7, %v8211_v48  ;;  %v8222_v48 = vld [vmem:[#allocation36_spill] sm:$0xff] }
 0x267   : > { %v1881_v23 = vadd.f32 %v1880_v62, %v8212_v10  ;;  %v8223_v62 = vld [vmem:[#allocation39_spill] sm:$0xff] }
 0x269   : > { %v1882_v15 = vadd.f32 %v1881_v23, %v8213_v37  ;;  %v8224_v37 = vld [vmem:[#allocation42_spill] sm:$0xff] }
 0x26b   : > { %v1883_v35 = vadd.f32 %v1882_v15, %v8214_v33  ;;  %v8225_v33 = vld [vmem:[#allocation45_spill] sm:$0xff] }
 0x26d   : > { %v1884_v8 = vadd.f32 %v1883_v35, %v8215_v16  ;;  %v8226_v35 = vld [vmem:[#allocation48_spill] sm:$0xff] }
 0x26f   : > { %v1885_v1 = vadd.f32 %v1884_v8, %v8216_v46  ;;  %v8227_v8 = vld [vmem:[#allocation51_spill] sm:$0xff] }
 0x271   : > { %v1886_v6 = vadd.f32 %v1885_v1, %v8217_v50  ;;  %v8228_v1 = vld [vmem:[#allocation54_spill] sm:$0xff] }
 0x273   : > { %v1887_v3 = vadd.f32 %v1886_v6, %v8218_v60  ;;  %v8229_v60 = vld [vmem:[#allocation57_spill] sm:$0xff] }
 0x275   : > { %v1888_v36 = vadd.f32 %v1887_v3, %v8219_v24  ;;  %v8230_v24 = vld [vmem:[#allocation60_spill] sm:$0xff] }
 0x277   : > { %v1889_v26 = vadd.f32 %v1888_v36, %v8220_v14  ;;  %v8231_v14 = vld [vmem:[#allocation63_spill] sm:$0xff] }
 0x279   : > { %v1890_v7 = vadd.f32 %v1889_v26, %v8221_v28  ;;  %v8232_v28 = vld [vmem:[#allocation66_spill] sm:$0xff] }
 0x27b   : > { %v1891_v10 = vadd.f32 %v1890_v7, %v8222_v48  ;;  %v8233_v48 = vld [vmem:[#allocation69_spill] sm:$0xff] }
 0x27d   : > { %v1892_v23 = vadd.f32 %v1891_v10, %v8223_v62  ;;  %v8234_v62 = vld [vmem:[#allocation72_spill] sm:$0xff] }
 0x27f   : > { %v1893_v15 = vadd.f32 %v1892_v23, %v8224_v37  ;;  %v8235_v37 = vld [vmem:[#allocation75_spill] sm:$0xff] }
 0x281   : > { %v1894_v16 = vadd.f32 %v1893_v15, %v8225_v33  ;;  %v8236_v33 = vld [vmem:[#allocation78_spill] sm:$0xff] }
 0x283   : > { %v1895_v46 = vadd.f32 %v1894_v16, %v8226_v35  ;;  %v8237_v35 = vld [vmem:[#allocation81_spill] sm:$0xff] }
 0x285   : > { %v1896_v50 = vadd.f32 %v1895_v46, %v8227_v8  ;;  %v8238_v8 = vld [vmem:[#allocation84_spill] sm:$0xff] }
 0x287   : > { %v1897_v6 = vadd.f32 %v1896_v50, %v8228_v1  ;;  %v8239_v1 = vld [vmem:[#allocation87_spill] sm:$0xff] }
 0x289   : > { %v1898_v3 = vadd.f32 %v1897_v6, %v8229_v60  ;;  %v8240_v60 = vld [vmem:[#allocation90_spill] sm:$0xff] }
 0x28b   : > { %v1899_v36 = vadd.f32 %v1898_v3, %v8230_v24  ;;  %v8241_v24 = vld [vmem:[#allocation93_spill] sm:$0xff] }
 0x28d   : > { %v1900_v26 = vadd.f32 %v1899_v36, %v8231_v14  ;;  %v8242_v14 = vld [vmem:[#allocation96_spill] sm:$0xff] }
 0x28f   : > { %v1901_v7 = vadd.f32 %v1900_v26, %v8232_v28  ;;  %v8243_v28 = vld [vmem:[#allocation99_spill] sm:$0xff] }
 0x291   : > { %v1902_v10 = vadd.f32 %v1901_v7, %v8233_v48  ;;  %v8244_v48 = vld [vmem:[#allocation102_spill] sm:$0xff] }
 0x293   : > { %v1903_v23 = vadd.f32 %v1902_v10, %v8234_v62  ;;  %v8245_v62 = vld [vmem:[#allocation105_spill] sm:$0xff] }
 0x295   : > { %v1904_v15 = vadd.f32 %v1903_v23, %v8235_v37  ;;  %v8246_v37 = vld [vmem:[#allocation108_spill] sm:$0xff] }
 0x297   : > { %v1905_v16 = vadd.f32 %v1904_v15, %v8236_v33  ;;  %v8247_v33 = vld [vmem:[#allocation111_spill] sm:$0xff] }
 0x299   : > { %v1906_v46 = vadd.f32 %v1905_v16, %v8237_v35  ;;  %v8248_v35 = vld [vmem:[#allocation114_spill] sm:$0xff] }
 0x29b   : > { %v1907_v50 = vadd.f32 %v1906_v46, %v8238_v8  ;;  %v8249_v8 = vld [vmem:[#allocation117_spill] sm:$0xff] }
 0x29d   : > { %v1908_v6 = vadd.f32 %v1907_v50, %v8239_v1  ;;  %v8250_v1 = vld [vmem:[#allocation121_spill] sm:$0xff] }
 0x29f   : > { %v1909_v3 = vadd.f32 %v1908_v6, %v8240_v60  ;;  %v8251_v60 = vld [vmem:[#allocation25_spill] sm:$0xff] }
 0x2a1   : > { %v1910_v36 = vadd.f32 %v1909_v3, %v8241_v24  ;;  %v8252_v24 = vld [vmem:[#allocation26_spill] sm:$0xff] }
 0x2a3   : > { %v1911_v26 = vadd.f32 %v1910_v36, %v8242_v14  ;;  %v8253_v14 = vld [vmem:[#allocation130_spill] sm:$0xff] }
 0x2a5   : > { %v1912_v7 = vadd.f32 %v1911_v26, %v8243_v28  ;;  %v8254_v28 = vld [vmem:[#allocation28_spill] sm:$0xff] }
 0x2a7   : > { %v1913_v10 = vadd.f32 %v1912_v7, %v8244_v48  ;;  %v8255_v48 = vld [vmem:[#allocation29_spill] sm:$0xff] }
 0x2a9   : > { %v1914_v23 = vadd.f32 %v1913_v10, %v8245_v62  ;;  %v8256_v62 = vld [vmem:[#allocation139_spill] sm:$0xff] }
 0x2ab   : > { %v1915_v15 = vadd.f32 %v1914_v23, %v8246_v37  ;;  %v8257_v37 = vld [vmem:[#allocation31_spill] sm:$0xff] }
 0x2ad   : > { %v1916_v16 = vadd.f32 %v1915_v15, %v8247_v33  ;;  %v8258_v33 = vld [vmem:[#allocation32_spill] sm:$0xff] }
 0x2af   : > { %v1917_v46 = vadd.f32 %v1916_v16, %v8248_v35  ;;  %v8259_v35 = vld [vmem:[#allocation148_spill] sm:$0xff] }
 0x2b1   : > { %v1918_v50 = vadd.f32 %v1917_v46, %v8249_v8  ;;  %v8260_v8 = vld [vmem:[#allocation34_spill] sm:$0xff] }
 0x2b3   : > { %v1919_v6 = vadd.f32 %v1918_v50, %v8250_v1  ;;  %v8261_v1 = vld [vmem:[#allocation35_spill] sm:$0xff] }
 0x2b5   : > { %v1920_v3 = vadd.f32 %v1919_v6, %v8251_v60  ;;  %v8262_v60 = vld [vmem:[#allocation157_spill] sm:$0xff] }
 0x2b7   : > { %v1921_v36 = vadd.f32 %v1920_v3, %v8252_v24  ;;  %v8263_v24 = vld [vmem:[#allocation37_spill] sm:$0xff] }
 0x2b9   : > { %v1922_v26 = vadd.f32 %v1921_v36, %v8253_v14  ;;  %v8264_v14 = vld [vmem:[#allocation38_spill] sm:$0xff] }
 0x2bb   : > { %v1923_v7 = vadd.f32 %v1922_v26, %v8254_v28  ;;  %v8265_v28 = vld [vmem:[#allocation166_spill] sm:$0xff] }
 0x2bd   : > { %v1924_v10 = vadd.f32 %v1923_v7, %v8255_v48  ;;  %v8266_v48 = vld [vmem:[#allocation40_spill] sm:$0xff] }
 0x2bf   : > { %v1925_v23 = vadd.f32 %v1924_v10, %v8256_v62  ;;  %v8267_v62 = vld [vmem:[#allocation41_spill] sm:$0xff] }
 0x2c1   : > { %v1926_v15 = vadd.f32 %v1925_v23, %v8257_v37  ;;  %v8268_v37 = vld [vmem:[#allocation175_spill] sm:$0xff] }
 0x2c3   : > { %v1927_v16 = vadd.f32 %v1926_v15, %v8258_v33  ;;  %v8269_v33 = vld [vmem:[#allocation43_spill] sm:$0xff] }
 0x2c5   : > { %v1928_v46 = vadd.f32 %v1927_v16, %v8259_v35  ;;  %v8270_v35 = vld [vmem:[#allocation44_spill] sm:$0xff] }
 0x2c7   : > { %v1929_v50 = vadd.f32 %v1928_v46, %v8260_v8  ;;  %v8271_v8 = vld [vmem:[#allocation184_spill] sm:$0xff] }
 0x2c9   : > { %v1930_v6 = vadd.f32 %v1929_v50, %v8261_v1  ;;  %v8272_v1 = vld [vmem:[#allocation46_spill] sm:$0xff] }
 0x2cb   : > { %v1931_v3 = vadd.f32 %v1930_v6, %v8262_v60  ;;  %v8273_v60 = vld [vmem:[#allocation47_spill] sm:$0xff] }
 0x2cd   : > { %v1932_v36 = vadd.f32 %v1931_v3, %v8263_v24  ;;  %v8274_v24 = vld [vmem:[#allocation193_spill] sm:$0xff] }
 0x2cf   : > { %v1933_v26 = vadd.f32 %v1932_v36, %v8264_v14  ;;  %v8275_v14 = vld [vmem:[#allocation49_spill] sm:$0xff] }
 0x2d1   : > { %v1934_v7 = vadd.f32 %v1933_v26, %v8265_v28  ;;  %v8276_v28 = vld [vmem:[#allocation50_spill] sm:$0xff] }
 0x2d3   : > { %v1935_v10 = vadd.f32 %v1934_v7, %v8266_v48  ;;  %v8277_v48 = vld [vmem:[#allocation202_spill] sm:$0xff] }
 0x2d5   : > { %v1936_v23 = vadd.f32 %v1935_v10, %v8267_v62  ;;  %v8278_v62 = vld [vmem:[#allocation52_spill] sm:$0xff] }
 0x2d7   : > { %v1937_v15 = vadd.f32 %v1936_v23, %v8268_v37 }
 0x2d9   : > { %v1938_v16 = vadd.f32 %v1937_v15, %v8269_v33  ;;  %v8279_v33 = vld [vmem:[#allocation53_spill] sm:$0xff] }
 0x2db   : > { %v1939_v46 = vadd.f32 %v1938_v16, %v8270_v35  ;;  %v8280_v35 = vld [vmem:[#allocation211_spill] sm:$0xff] }
 0x2dd   : > { %v1940_v50 = vadd.f32 %v1939_v46, %v8271_v8 }
 0x2df   : > { %v1941_v6 = vadd.f32 %v1940_v50, %v8272_v1 }
 0x2e1   : > { %v1942_v3 = vadd.f32 %v1941_v6, %v8273_v60 }
 0x2e3   : > { %v1943_v36 = vadd.f32 %v1942_v3, %v8274_v24 }
 0x2e5   : > { %v1944_v26 = vadd.f32 %v1943_v36, %v8275_v14 }
 0x2e7   : > { %v1945_v7 = vadd.f32 %v1944_v26, %v8276_v28 }
 0x2e9   : > { %v1946_v10 = vadd.f32 %v1945_v7, %v8277_v48  ;;  %v8281_v7 = vld [vmem:[#allocation55_spill] sm:$0xff] }
 0x2eb   : > { %v1947_v23 = vadd.f32 %v1946_v10, %v8278_v62  ;;  %v8282_v62 = vld [vmem:[#allocation56_spill] sm:$0xff] }
 0x2ed   : > { %v1948_v37 = vadd.f32 %v1947_v23, %v6108_v49 }
 0x2ef   : > { %v1949_v15 = vadd.f32 %v1948_v37, %v6111_v53  ;;  %v8283_v37 = vld [vmem:[#allocation219_spill] sm:$0xff] }
 0x2f1   : > { %v1950_v16 = vadd.f32 %v1949_v15, %v8279_v33  ;;  %v8284_v33 = vld [vmem:[#allocation58_spill] sm:$0xff] }
 0x2f3   : > { %v1951_v46 = vadd.f32 %v1950_v16, %v8280_v35 }
 0x2f5   : > { %v1952_v8 = vadd.f32 %v1951_v46, %v6124_v61 }
 0x2f7   : > { %v1953_v50 = vadd.f32 %v1952_v8, %v6127_v59  ;;  %v8285_v8 = vld [vmem:[#allocation59_spill] sm:$0xff] }
 0x2f9   : > { %v1954_v1 = vadd.f32 %v1953_v50, %v6130_v40 }
 0x2fb   : > { %v1955_v6 = vadd.f32 %v1954_v1, %v6133_v5  ;;  %v8286_v1 = vld [vmem:[#allocation61_spill] sm:$0xff] }
 0x2fd   : > { %v1956_v60 = vadd.f32 %v1955_v6, %v6140_v42 }
 0x2ff   : > { %v1957_v3 = vadd.f32 %v1956_v60, %v6143_v2 }
 0x301   : > { %v1958_v24 = vadd.f32 %v1957_v3, %v6146_v58  ;;  %v8287_v3 = vld [vmem:[#allocation62_spill] sm:$0xff] }
 0x303   : > { %v1959_v36 = vadd.f32 %v1958_v24, %v6149_v51 }
 0x305   : > { %v1960_v14 = vadd.f32 %v1959_v36, %v6156_v19  ;;  %v8288_v36 = vld [vmem:[#allocation64_spill] sm:$0xff] }
 0x307   : > { %v1961_v26 = vadd.f32 %v1960_v14, %v6159_v63 }
 0x309   : > { %v1962_v28 = vadd.f32 %v1961_v26, %v6162_v30  ;;  %v8289_v26 = vld [vmem:[#allocation65_spill] sm:$0xff] }
 0x30b   : > { %v1963_v48 = vadd.f32 %v1962_v28, %v8281_v7 }
 0x30d   : > { %v1964_v10 = vadd.f32 %v1963_v48, %v6172_v22  ;;  %v8290_v48 = vld [vmem:[#allocation67_spill] sm:$0xff] }
 0x30f   : > { %v1965_v23 = vadd.f32 %v1964_v10, %v8282_v62  ;;  %v8291_v62 = vld [vmem:[#allocation68_spill] sm:$0xff] }
 0x311   : > { %v1966_v15 = vadd.f32 %v1965_v23, %v8283_v37  ;;  %v8292_v37 = vld [vmem:[#allocation70_spill] sm:$0xff] }
 0x313   : > { %v1967_v16 = vadd.f32 %v1966_v15, %v8284_v33 }
 0x315   : > { %v1968_v35 = vadd.f32 %v1967_v16, %v6188_v12 }
 0x317   : > { %v1969_v46 = vadd.f32 %v1968_v35, %v6191_v32  ;;  %v8293_v35 = vld [vmem:[#allocation71_spill] sm:$0xff] }
 0x319   : > { %v1970_v50 = vadd.f32 %v1969_v46, %v8285_v8  ;;  %v8294_v8 = vld [vmem:[#allocation73_spill] sm:$0xff] }
 0x31b   : > { %v1971_v6 = vadd.f32 %v1970_v50, %v8286_v1 }
 0x31d   : > { %v1972_v60 = vadd.f32 %v1971_v6, %v6204_v43  ;;  %v8295_v6 = vld [vmem:[#allocation74_spill] sm:$0xff] }
 0x31f   : > { %v1973_v24 = vadd.f32 %v1972_v60, %v8287_v3  ;;  %v8296_v3 = vld [vmem:[#allocation76_spill] sm:$0xff] }
 0x321   : > { %v1974_v14 = vadd.f32 %v1973_v24, %v8288_v36  ;;  %v8297_v36 = vld [vmem:[#allocation77_spill] sm:$0xff] }
 0x323   : > { %v1975_v28 = vadd.f32 %v1974_v14, %v8289_v26 }
 0x325   : > { %v1976_v7 = vadd.f32 %v1975_v28, %v6220_v9  ;;  %v8298_v28 = vld [vmem:[#allocation79_spill] sm:$0xff] }
 0x327   : > { %v1977_v10 = vadd.f32 %v1976_v7, %v8290_v48  ;;  %v8299_v48 = vld [vmem:[#allocation80_spill] sm:$0xff] }
 0x329   : > { %v1978_v23 = vadd.f32 %v1977_v10, %v8291_v62  ;;  %v8300_v62 = vld [vmem:[#allocation82_spill] sm:$0xff] }
 0x32b   : > { %v1979_v15 = vadd.f32 %v1978_v23, %v8292_v37 }
 0x32d   : > { %v1980_v33 = vadd.f32 %v1979_v15, %v6236_v11 }
 0x32f   : > { %v1981_v16 = vadd.f32 %v1980_v33, %v6239_v56  ;;  %v8301_v33 = vld [vmem:[#allocation83_spill] sm:$0xff] }
 0x331   : > { %v1982_v46 = vadd.f32 %v1981_v16, %v8293_v35  ;;  %v8302_v35 = vld [vmem:[#allocation85_spill] sm:$0xff] }
 0x333   : > { %v1983_v50 = vadd.f32 %v1982_v46, %v8294_v8 }
 0x335   : > { %v1984_v1 = vadd.f32 %v1983_v50, %v6252_v39  ;;  %v8303_v50 = vld [vmem:[#allocation86_spill] sm:$0xff] }
 0x337   : > { %v1985_v60 = vadd.f32 %v1984_v1, %v8295_v6  ;;  %v8304_v6 = vld [vmem:[#allocation88_spill] sm:$0xff] }
 0x339   : > { %v1986_v24 = vadd.f32 %v1985_v60, %v8296_v3  ;;  %v8305_v3 = vld [vmem:[#allocation89_spill] sm:$0xff] }
 0x33b   : > { %v1987_v14 = vadd.f32 %v1986_v24, %v8297_v36  ;;  %v8306_v36 = vld [vmem:[#allocation91_spill] sm:$0xff] }
 0x33d   : > { %v1988_v26 = vadd.f32 %v1987_v14, %v6268_v38 }
 0x33f   : > { %v1989_v7 = vadd.f32 %v1988_v26, %v8298_v28  ;;  %v8307_v26 = vld [vmem:[#allocation92_spill] sm:$0xff] }
 0x341   : > { %v1990_v10 = vadd.f32 %v1989_v7, %v8299_v48  ;;  %v8308_v7 = vld [vmem:[#allocation94_spill] sm:$0xff] }
 0x343   : > { %v1991_v23 = vadd.f32 %v1990_v10, %v8300_v62  ;;  %v8309_v10 = vld [vmem:[#allocation95_spill] sm:$0xff] }
 0x345   : > { %v1992_v37 = vadd.f32 %v1991_v23, %v6284_v47 }
 0x347   : > { %v1993_v15 = vadd.f32 %v1992_v37, %v6287_v13  ;;  %v8310_v37 = vld [vmem:[#allocation97_spill] sm:$0xff] }
 0x349   : > { %v1994_v16 = vadd.f32 %v1993_v15, %v8301_v33  ;;  %v8311_v33 = vld [vmem:[#allocation98_spill] sm:$0xff] }
 0x34b   : > { %v1995_v46 = vadd.f32 %v1994_v16, %v8302_v35  ;;  %v8312_v16 = vld [vmem:[#allocation100_spill] sm:$0xff] }
 0x34d   : > { %v1996_v8 = vadd.f32 %v1995_v46, %v6300_v25  ;;  %v8313_v46 = vld [vmem:[#allocation101_spill] sm:$0xff] }
 0x34f   : > { %v1997_v1 = vadd.f32 %v1996_v8, %v8303_v50  ;;  %v8314_v50 = vld [vmem:[#allocation103_spill] sm:$0xff] }
 0x351   : > { %v1998_v60 = vadd.f32 %v1997_v1, %v8304_v6  ;;  %v8315_v6 = vld [vmem:[#allocation104_spill] sm:$0xff] }
 0x353   : > { %v1999_v24 = vadd.f32 %v1998_v60, %v8305_v3  ;;  %v8316_v3 = vld [vmem:[#allocation106_spill] sm:$0xff] }
 0x355   : > { %v2000_v14 = vadd.f32 %v1999_v24, %v8306_v36  ;;  %v8317_v36 = vld [vmem:[#allocation107_spill] sm:$0xff] }
 0x357   : > { %v2001_v28 = vadd.f32 %v2000_v14, %v8307_v26  ;;  %v8318_v26 = vld [vmem:[#allocation109_spill] sm:$0xff] }
 0x359   : > { %v2002_v48 = vadd.f32 %v2001_v28, %v8308_v7  ;;  %v8319_v7 = vld [vmem:[#allocation110_spill] sm:$0xff] }
 0x35b   : > { %v2003_v62 = vadd.f32 %v2002_v48, %v8309_v10  ;;  %v8320_v48 = vld [vmem:[#allocation112_spill] sm:$0xff] }
 0x35d   : > { %v2004_v23 = vadd.f32 %v2003_v62, %v6332_v17  ;;  %v8321_v62 = vld [vmem:[#allocation113_spill] sm:$0xff] }
 0x35f   : > { %v2005_v15 = vadd.f32 %v2004_v23, %v8310_v37  ;;  %v8322_v37 = vld [vmem:[#allocation115_spill] sm:$0xff] }
 0x361   : > { %v2006_v25 = vadd.f32 %v2005_v15, %v8311_v33  ;;  %v8323_v33 = vld [vmem:[#allocation116_spill] sm:$0xff] }
 0x363   : > { %v2007_v35 = vadd.f32 %v2006_v25, %v8312_v16  ;;  %v8324_v16 = vld [vmem:[#allocation118_spill] sm:$0xff] }
 0x365   : > { %v2008_v8 = vadd.f32 %v2007_v35, %v8313_v46  ;;  %v8325_v46 = vld [vmem:[#allocation119_spill] sm:$0xff] }
 0x367   : > { %v2009_v1 = vadd.f32 %v2008_v8, %v8314_v50  ;;  %v8326_v50 = vld [vmem:[#allocation241_spill] sm:$0xff] }
 0x369   : > { %v2010_v60 = vadd.f32 %v2009_v1, %v8315_v6  ;;  %v8327_v6 = vld [vmem:[#allocation120_spill] sm:$0xff] }
 0x36b   : > { %v2011_v24 = vadd.f32 %v2010_v60, %v8316_v3  ;;  %v8328_v3 = vld [vmem:[#allocation122_spill] sm:$0xff] }
 0x36d   : > { %v2012_v14 = vadd.f32 %v2011_v24, %v8317_v36  ;;  %v8329_v36 = vld [vmem:[#allocation123_spill] sm:$0xff] }
 0x36f   : > { %v2013_v28 = vadd.f32 %v2012_v14, %v8318_v26  ;;  %v8330_v26 = vld [vmem:[#allocation124_spill] sm:$0xff] }
 0x371   : > { %v2014_v17 = vadd.f32 %v2013_v28, %v8319_v7  ;;  %v8331_v7 = vld [vmem:[#allocation125_spill] sm:$0xff] }
 0x373   : > { %v2015_v10 = vadd.f32 %v2014_v17, %v8320_v48  ;;  %v8332_v48 = vld [vmem:[#allocation126_spill] sm:$0xff] }
 0x375   : > { %v2016_v23 = vadd.f32 %v2015_v10, %v8321_v62  ;;  %v8333_v62 = vld [vmem:[#allocation127_spill] sm:$0xff] }
 0x377   : > { %v2017_v15 = vadd.f32 %v2016_v23, %v8322_v37  ;;  %v8334_v37 = vld [vmem:[#allocation128_spill] sm:$0xff] }
 0x379   : > { %v2018_v25 = vadd.f32 %v2017_v15, %v8323_v33  ;;  %v8335_v33 = vld [vmem:[#allocation129_spill] sm:$0xff] }
 0x37b   : > { %v2019_v35 = vadd.f32 %v2018_v25, %v8324_v16  ;;  %v8336_v16 = vld [vmem:[#allocation131_spill] sm:$0xff] }
 0x37d   : > { %v2020_v8 = vadd.f32 %v2019_v35, %v8325_v46  ;;  %v8337_v46 = vld [vmem:[#allocation132_spill] sm:$0xff] }
 0x37f   : > { %v2021_v1 = vadd.f32 %v2020_v8, %v8326_v50  ;;  %v8338_v50 = vld [vmem:[#allocation133_spill] sm:$0xff] }
 0x381   : > { %v2022_v60 = vadd.f32 %v2021_v1, %v8327_v6  ;;  %v8339_v6 = vld [vmem:[#allocation134_spill] sm:$0xff] }
 0x383   : > { %v2023_v24 = vadd.f32 %v2022_v60, %v8328_v3  ;;  %v8340_v3 = vld [vmem:[#allocation135_spill] sm:$0xff] }
 0x385   : > { %v2024_v14 = vadd.f32 %v2023_v24, %v8329_v36  ;;  %v8341_v36 = vld [vmem:[#allocation136_spill] sm:$0xff] }
 0x387   : > { %v2025_v28 = vadd.f32 %v2024_v14, %v8330_v26  ;;  %v8342_v26 = vld [vmem:[#allocation137_spill] sm:$0xff] }
 0x389   : > { %v2026_v17 = vadd.f32 %v2025_v28, %v8331_v7  ;;  %v8343_v7 = vld [vmem:[#allocation138_spill] sm:$0xff] }
 0x38b   : > { %v2027_v10 = vadd.f32 %v2026_v17, %v8332_v48  ;;  %v8344_v48 = vld [vmem:[#allocation140_spill] sm:$0xff] }
 0x38d   : > { %v2028_v23 = vadd.f32 %v2027_v10, %v8333_v62  ;;  %v8345_v62 = vld [vmem:[#allocation141_spill] sm:$0xff] }
 0x38f   : > { %v2029_v15 = vadd.f32 %v2028_v23, %v8334_v37  ;;  %v8346_v37 = vld [vmem:[#allocation142_spill] sm:$0xff] }
 0x391   : > { %v2030_v25 = vadd.f32 %v2029_v15, %v8335_v33  ;;  %v8347_v33 = vld [vmem:[#allocation143_spill] sm:$0xff] }
 0x393   : > { %v2031_v35 = vadd.f32 %v2030_v25, %v8336_v16  ;;  %v8348_v16 = vld [vmem:[#allocation144_spill] sm:$0xff] }
 0x395   : > { %v2032_v8 = vadd.f32 %v2031_v35, %v8337_v46  ;;  %v8349_v46 = vld [vmem:[#allocation145_spill] sm:$0xff] }
 0x397   : > { %v2033_v1 = vadd.f32 %v2032_v8, %v8338_v50  ;;  %v8350_v50 = vld [vmem:[#allocation146_spill] sm:$0xff] }
 0x399   : > { %v2034_v60 = vadd.f32 %v2033_v1, %v8339_v6  ;;  %v8351_v6 = vld [vmem:[#allocation147_spill] sm:$0xff] }
 0x39b   : > { %v2035_v24 = vadd.f32 %v2034_v60, %v8340_v3  ;;  %v8352_v3 = vld [vmem:[#allocation149_spill] sm:$0xff] }
 0x39d   : > { %v2036_v14 = vadd.f32 %v2035_v24, %v8341_v36  ;;  %v8353_v36 = vld [vmem:[#allocation150_spill] sm:$0xff] }
 0x39f   : > { %v2037_v28 = vadd.f32 %v2036_v14, %v8342_v26  ;;  %v8354_v26 = vld [vmem:[#allocation151_spill] sm:$0xff] }
 0x3a1   : > { %v2038_v17 = vadd.f32 %v2037_v28, %v8343_v7  ;;  %v8355_v7 = vld [vmem:[#allocation152_spill] sm:$0xff] }
 0x3a3   : > { %v2039_v10 = vadd.f32 %v2038_v17, %v8344_v48  ;;  %v8356_v48 = vld [vmem:[#allocation153_spill] sm:$0xff] }
 0x3a5   : > { %v2040_v23 = vadd.f32 %v2039_v10, %v8345_v62  ;;  %v8357_v62 = vld [vmem:[#allocation154_spill] sm:$0xff] }
 0x3a7   : > { %v2041_v15 = vadd.f32 %v2040_v23, %v8346_v37  ;;  %v8358_v37 = vld [vmem:[#allocation155_spill] sm:$0xff] }
 0x3a9   : > { %v2042_v25 = vadd.f32 %v2041_v15, %v8347_v33  ;;  %v8359_v33 = vld [vmem:[#allocation156_spill] sm:$0xff] }
 0x3ab   : > { %v2043_v35 = vadd.f32 %v2042_v25, %v8348_v16  ;;  %v8360_v16 = vld [vmem:[#allocation158_spill] sm:$0xff] }
 0x3ad   : > { %v2044_v8 = vadd.f32 %v2043_v35, %v8349_v46  ;;  %v8361_v46 = vld [vmem:[#allocation159_spill] sm:$0xff] }
 0x3af   : > { %v2045_v1 = vadd.f32 %v2044_v8, %v8350_v50  ;;  %v8362_v50 = vld [vmem:[#allocation160_spill] sm:$0xff] }
 0x3b1   : > { %v2046_v60 = vadd.f32 %v2045_v1, %v8351_v6  ;;  %v8363_v6 = vld [vmem:[#allocation161_spill] sm:$0xff] }
 0x3b3   : > { %v2047_v24 = vadd.f32 %v2046_v60, %v8352_v3  ;;  %v8364_v3 = vld [vmem:[#allocation162_spill] sm:$0xff] }
 0x3b5   : > { %v2048_v14 = vadd.f32 %v2047_v24, %v8353_v36  ;;  %v8365_v36 = vld [vmem:[#allocation163_spill] sm:$0xff] }
 0x3b7   : > { %v2049_v28 = vadd.f32 %v2048_v14, %v8354_v26  ;;  %v8366_v26 = vld [vmem:[#allocation164_spill] sm:$0xff] }
 0x3b9   : > { %v2050_v17 = vadd.f32 %v2049_v28, %v8355_v7  ;;  %v8367_v7 = vld [vmem:[#allocation165_spill] sm:$0xff] }
 0x3bb   : > { %v2051_v10 = vadd.f32 %v2050_v17, %v8356_v48  ;;  %v8368_v48 = vld [vmem:[#allocation167_spill] sm:$0xff] }
 0x3bd   : > { %v2052_v23 = vadd.f32 %v2051_v10, %v8357_v62  ;;  %v8369_v62 = vld [vmem:[#allocation168_spill] sm:$0xff] }
 0x3bf   : > { %v2053_v15 = vadd.f32 %v2052_v23, %v8358_v37  ;;  %v8370_v37 = vld [vmem:[#allocation169_spill] sm:$0xff] }
 0x3c1   : > { %v2054_v25 = vadd.f32 %v2053_v15, %v8359_v33  ;;  %v8371_v33 = vld [vmem:[#allocation170_spill] sm:$0xff] }
 0x3c3   : > { %v2055_v35 = vadd.f32 %v2054_v25, %v8360_v16  ;;  %v8372_v16 = vld [vmem:[#allocation171_spill] sm:$0xff] }
 0x3c5   : > { %v2056_v8 = vadd.f32 %v2055_v35, %v8361_v46  ;;  %v8373_v46 = vld [vmem:[#allocation172_spill] sm:$0xff] }
 0x3c7   : > { %v2057_v1 = vadd.f32 %v2056_v8, %v8362_v50  ;;  %v8374_v50 = vld [vmem:[#allocation173_spill] sm:$0xff] }
 0x3c9   : > { %v2058_v60 = vadd.f32 %v2057_v1, %v8363_v6  ;;  %v8375_v6 = vld [vmem:[#allocation174_spill] sm:$0xff] }
 0x3cb   : > { %v2059_v24 = vadd.f32 %v2058_v60, %v8364_v3  ;;  %v8376_v3 = vld [vmem:[#allocation176_spill] sm:$0xff] }
 0x3cd   : > { %v2060_v14 = vadd.f32 %v2059_v24, %v8365_v36  ;;  %v8377_v36 = vld [vmem:[#allocation177_spill] sm:$0xff] }
 0x3cf   : > { %v2061_v28 = vadd.f32 %v2060_v14, %v8366_v26  ;;  %v8378_v26 = vld [vmem:[#allocation178_spill] sm:$0xff] }
 0x3d1   : > { %v2062_v17 = vadd.f32 %v2061_v28, %v8367_v7  ;;  %v8379_v7 = vld [vmem:[#allocation179_spill] sm:$0xff] }
 0x3d3   : > { %v2063_v10 = vadd.f32 %v2062_v17, %v8368_v48  ;;  %v8380_v48 = vld [vmem:[#allocation180_spill] sm:$0xff] }
 0x3d5   : > { %v2064_v23 = vadd.f32 %v2063_v10, %v8369_v62 }
 0x3d7   : > { %v2065_v15 = vadd.f32 %v2064_v23, %v8370_v37  ;;  %v8381_v23 = vld [vmem:[#allocation181_spill] sm:$0xff] }
 0x3d9   : > { %v2066_v25 = vadd.f32 %v2065_v15, %v8371_v33  ;;  %v8382_v15 = vld [vmem:[#allocation182_spill] sm:$0xff] }
 0x3db   : > { %v2067_v35 = vadd.f32 %v2066_v25, %v8372_v16  ;;  %v8383_v25 = vld [vmem:[#allocation183_spill] sm:$0xff] }
 0x3dd   : > { %v2068_v8 = vadd.f32 %v2067_v35, %v8373_v46  ;;  %v8384_v46 = vld [vmem:[#allocation185_spill] sm:$0xff] }
 0x3df   : > { %v2069_v1 = vadd.f32 %v2068_v8, %v8374_v50  ;;  %v8385_v50 = vld [vmem:[#allocation186_spill] sm:$0xff] }
 0x3e1   : > { %v2070_v60 = vadd.f32 %v2069_v1, %v8375_v6  ;;  %v8386_v6 = vld [vmem:[#allocation187_spill] sm:$0xff] }
 0x3e3   : > { %v2071_v24 = vadd.f32 %v2070_v60, %v8376_v3 }
 0x3e5   : > { %v2072_v14 = vadd.f32 %v2071_v24, %v8377_v36  ;;  %v8387_v24 = vld [vmem:[#allocation188_spill] sm:$0xff] }
 0x3e7   : > { %v2073_v28 = vadd.f32 %v2072_v14, %v8378_v26  ;;  %v8388_v14 = vld [vmem:[#allocation189_spill] sm:$0xff]  ;;  %v8389_v26 = vld [vmem:[#allocation190_spill] sm:$0xff] }
 0x3e9   : > { %v2074_v17 = vadd.f32 %v2073_v28, %v8379_v7 }
 0x3eb   : > { %v2075_v10 = vadd.f32 %v2074_v17, %v8380_v48  ;;  %v8390_v17 = vld [vmem:[#allocation191_spill] sm:$0xff] }
 0x3ed   : > { %v2076_v62 = vadd.f32 %v2075_v10, %v6620_v27  ;;  %v8391_v10 = vld [vmem:[#allocation192_spill] sm:$0xff] }
 0x3ef   : > { %v2077_v37 = vadd.f32 %v2076_v62, %v8381_v23  ;;  %v8392_v62 = vld [vmem:[#allocation194_spill] sm:$0xff] }
 0x3f1   : > { %v2078_v33 = vadd.f32 %v2077_v37, %v8382_v15  ;;  %v8393_v15 = vld [vmem:[#allocation195_spill] sm:$0xff] }
 0x3f3   : > { %v2079_v16 = vadd.f32 %v2078_v33, %v8383_v25  ;;  %v8394_v25 = vld [vmem:[#allocation196_spill] sm:$0xff] }
 0x3f5   : > { %v2080_v35 = vadd.f32 %v2079_v16, %v6636_v41  ;;  %v8395_v16 = vld [vmem:[#allocation221_spill] sm:$0xff] }
 0x3f7   : > { %v2081_v8 = vadd.f32 %v2080_v35, %v8384_v46 }
 0x3f9   : > { %v2082_v1 = vadd.f32 %v2081_v8, %v8385_v50  ;;  %v8396_v8 = vld [vmem:[#allocation197_spill] sm:$0xff] }
 0x3fb   : > { %v2083_v60 = vadd.f32 %v2082_v1, %v8386_v6  ;;  %v8397_v1 = vld [vmem:[#allocation198_spill] sm:$0xff]  ;;  %v8398_v6 = vld [vmem:[#allocation199_spill] sm:$0xff] }
 0x3fd   : > { %v2084_v3 = vadd.f32 %v2083_v60, %v6651_v45 }
 0x3ff   : > { %v2085_v36 = vadd.f32 %v2084_v3, %v8387_v24  ;;  %v8399_v3 = vld [vmem:[#allocation200_spill] sm:$0xff] }
 0x401   : > { %v2086_v27 = vadd.f32 %v2085_v36, %v8388_v14  ;;  %v8400_v36 = vld [vmem:[#allocation201_spill] sm:$0xff] }
 0x403   : > { %v2087_v28 = vadd.f32 %v2086_v27, %v8389_v26  ;;  %v8401_v27 = vld [vmem:[#allocation203_spill] sm:$0xff]  ;;  %v8402_v26 = vld [vmem:[#allocation204_spill] sm:$0xff] }
 0x405   : > { %v2088_v7 = vadd.f32 %v2087_v28, %v6666_v20 }
 0x407   : > { %v2089_v48 = vadd.f32 %v2088_v7, %v8390_v17  ;;  %v8403_v7 = vld [vmem:[#allocation205_spill] sm:$0xff] }
 0x409   : > { %v2090_v41 = vadd.f32 %v2089_v48, %v8391_v10  ;;  %v8404_v48 = vld [vmem:[#allocation222_spill] sm:$0xff] }
 0x40b   : > { %v2091_v23 = vadd.f32 %v2090_v41, %v8392_v62  ;;  %v8405_v41 = vld [vmem:[#allocation206_spill] sm:$0xff]  ;;  %v8406_v62 = vld [vmem:[#allocation207_spill] sm:$0xff] }
 0x40d   : > { %v2092_v37 = vadd.f32 %v2091_v23, %v6681_v44 }
 0x40f   : > { %v2093_v33 = vadd.f32 %v2092_v37, %v8393_v15  ;;  %v8407_v15 = vld [vmem:[#allocation208_spill] sm:$0xff] }
 0x411   : > { %v2094_v45 = vadd.f32 %v2093_v33, %v8394_v25  ;;  %v8408_v25 = vld [vmem:[#allocation209_spill] sm:$0xff] }
 0x413   : > { %v2095_v35 = vadd.f32 %v2094_v45, %v8395_v16  ;;  %v8409_v16 = vld [vmem:[#allocation210_spill] sm:$0xff] }
 0x415   : > { %v2096_v46 = vadd.f32 %v2095_v35, %v6696_v0 }
 0x417   : > { %v2097_v50 = vadd.f32 %v2096_v46, %v8396_v8 }
 0x419   : > { %v2098_v20 = vadd.f32 %v2097_v50, %v8397_v1  ;;  %v8410_v50 = vld [vmem:[#allocation212_spill] sm:$0xff] }
 0x41b   : > { %v2099_v60 = vadd.f32 %v2098_v20, %v8398_v6  ;;  %v8411_v20 = vld [vmem:[#allocation213_spill] sm:$0xff] }
 0x41d   : > { %v2100_v24 = vadd.f32 %v2099_v60, %v8399_v3 }
 0x41f   : > { %v2101_v14 = vadd.f32 %v2100_v24, %v8400_v36 }
 0x421   : > { %v2102_v44 = vadd.f32 %v2101_v14, %v8401_v27  ;;  %v8412_v27 = vld [vmem:[#allocation214_spill] sm:$0xff] }
 0x423   : > { %v2103_v28 = vadd.f32 %v2102_v44, %v8402_v26  ;;  %v8413_v44 = vld [vmem:[#allocation215_spill] sm:$0xff] }
 0x425   : > { %v2104_v17 = vadd.f32 %v2103_v28, %v8403_v7  ;;  %v8414_v28 = vld [vmem:[#allocation216_spill] sm:$0xff] }
 0x427   : > { %v2105_v10 = vadd.f32 %v2104_v17, %v8404_v48  ;;  %v8415_v17 = vld [vmem:[#allocation217_spill] sm:$0xff]  ;;  %v8416_v48 = vld [vmem:[#allocation223_spill] sm:$0xff] }
 0x429   : > { %v2106_v0 = vadd.f32 %v2105_v10, %v8405_v41  ;;  %v8417_v10 = vld [vmem:[#allocation224_spill] sm:$0xff]  ;;  %v8418_v41 = vld [vmem:[#allocation218_spill] sm:$0xff] }
 0x42b   : > { %v2107_v23 = vadd.f32 %v2106_v0, %v8406_v62  ;;  %v1875_v0 = vld [vmem:[#allocation8] sm:$0xff] }
 0x42d   : > { %v2108_v37 = vadd.f32 %v2107_v23, %v6741_v54 }
 0x42f   : > { %v2109_v33 = vadd.f32 %v2108_v37, %v8407_v15 }
 0x431   : > { %v2110_v45 = vadd.f32 %v2109_v33, %v8408_v25 }
 0x433   : > { %v2111_v35 = vadd.f32 %v2110_v45, %v8409_v16 }
 0x435   : > { %v2112_v46 = vadd.f32 %v2111_v35, %v6756_v34 }
 0x437   : > { %v2113_v8 = vadd.f32 %v2112_v46, %v6759_v29 }
 0x439   : > { %v2114_v1 = vadd.f32 %v2113_v8, %v8410_v50 }
 0x43b   : > { %v2115_v6 = vadd.f32 %v2114_v1, %v8411_v20 }
 0x43d   : > { %v2116_v60 = vadd.f32 %v2115_v6, %v6771_v55 }
 0x43f   : > { %v2117_v3 = vadd.f32 %v2116_v60, %v6774_v52 }
 0x441   : > { %v2118_v54 = vadd.f32 %v2117_v3, %v6777_v18 }
 0x443   : > { %v2119_v24 = vadd.f32 %v2118_v54, %v6780_v57 }
 0x445   : > { %v2120_v36 = vadd.f32 %v2119_v24, %v6783_v21  ;;  %v8419_v21 = vld [vmem:[#allocation225_spill] sm:$0xff] }
 0x447   : > { %v2121_v14 = vadd.f32 %v2120_v36, %v6786_v4 }
 0x449   : > { %v2122_v34 = vadd.f32 %v2121_v14, %v6789_v31 }
 0x44b   : > { %v2123_v29 = vadd.f32 %v2122_v34, %v8412_v27 }
 0x44d   : > { %v2124_v26 = vadd.f32 %v2123_v29, %v8413_v44 }
 0x44f   : > { %v2125_v7 = vadd.f32 %v2124_v26, %v8414_v28 }
 0x451   : > { %v2126_v55 = vadd.f32 %v2125_v7, %v8415_v17 }
 0x453   : > { %v2127_v52 = vadd.f32 %v2126_v55, %v8416_v48 }
 0x455   : > { %v2128_v18 = vadd.f32 %v2127_v52, %v8417_v10 }
 0x457   : > { %v2129_v57 = vadd.f32 %v2128_v18, %v8418_v41 }
 0x459   : > { %v2130_v62 = vadd.f32 %v2129_v57, %v8419_v21 }
 0x45b   : > { %v2131_v4 = vadd.f32 %v2130_v62, %v1875_v0 }
 0x45d   : > { %2132 = vst [vmem:[#allocation8] sm:$0xff] %v2131_v4 }
 0x45e PF: > { %p3313_p4 = scmp.ne.s32.totalorder %s3538_s15, 1 }
 0x460   : > { %2136 = sbr.rel (%p3313_p4) target bundleno = 1365 (0x555), region = 56 }
 0x465   : > { %v8420_v31 = vld [vmem:[#allocation12_spill] sm:$0xff]  ;;  %v8421_v23 = vld [vmem:[#allocation13_spill] sm:$0xff]  ;;  %v8422_v15 = vld [vmem:[#allocation14_spill] sm:$0xff] }
 0x466   : > { %v2907_v37 = vadd.f32 %v8421_v23, %v8420_v31  ;;  %v8423_v25 = vld [vmem:[#allocation15_spill] sm:$0xff]  ;;  %v8424_v16 = vld [vmem:[#allocation16_spill] sm:$0xff]  ;;  %v8425_v46 = vld [vmem:[#allocation17_spill] sm:$0xff] }
 0x467   : > { %v8426_v50 = vld [vmem:[#allocation18_spill] sm:$0xff]  ;;  %v8427_v20 = vld [vmem:[#allocation19_spill] sm:$0xff]  ;;  %v8428_v60 = vld [vmem:[#allocation20_spill] sm:$0xff] }
 0x468   : > { %v2908_v33 = vadd.f32 %v2907_v37, %v8422_v15  ;;  %v8429_v54 = vld [vmem:[#allocation21_spill] sm:$0xff]  ;;  %v8430_v36 = vld [vmem:[#allocation22_spill] sm:$0xff]  ;;  %v8431_v34 = vld [vmem:[#allocation23_spill] sm:$0xff] }
 0x469   : > { %v8432_v29 = vld [vmem:[#allocation24_spill] sm:$0xff]  ;;  %v8433_v26 = vld [vmem:[#allocation27_spill] sm:$0xff]  ;;  %v8434_v7 = vld [vmem:[#allocation30_spill] sm:$0xff] }
 0x46a   : > { %v2909_v45 = vadd.f32 %v2908_v33, %v8423_v25  ;;  %v8435_v55 = vld [vmem:[#allocation33_spill] sm:$0xff]  ;;  %v8436_v52 = vld [vmem:[#allocation36_spill] sm:$0xff]  ;;  %v8437_v18 = vld [vmem:[#allocation39_spill] sm:$0xff] }
 0x46b   : > { %v8438_v57 = vld [vmem:[#allocation42_spill] sm:$0xff]  ;;  %v8439_v21 = vld [vmem:[#allocation45_spill] sm:$0xff]  ;;  %v8440_v4 = vld [vmem:[#allocation48_spill] sm:$0xff] }
 0x46c   : > { %v2910_v35 = vadd.f32 %v2909_v45, %v8424_v16  ;;  %v8441_v23 = vld [vmem:[#allocation51_spill] sm:$0xff]  ;;  %v8442_v15 = vld [vmem:[#allocation54_spill] sm:$0xff]  ;;  %v8443_v25 = vld [vmem:[#allocation57_spill] sm:$0xff] }
 0x46d   : > { %v8444_v16 = vld [vmem:[#allocation60_spill] sm:$0xff] }
 0x46e   : > { %v2911_v8 = vadd.f32 %v2910_v35, %v8425_v46  ;;  %v8445_v46 = vld [vmem:[#allocation63_spill] sm:$0xff] }
 0x470   : > { %v2912_v1 = vadd.f32 %v2911_v8, %v8426_v50  ;;  %v8446_v50 = vld [vmem:[#allocation66_spill] sm:$0xff] }
 0x472   : > { %v2913_v6 = vadd.f32 %v2912_v1, %v8427_v20  ;;  %v8447_v20 = vld [vmem:[#allocation69_spill] sm:$0xff] }
 0x474   : > { %v2914_v3 = vadd.f32 %v2913_v6, %v8428_v60  ;;  %v8448_v60 = vld [vmem:[#allocation72_spill] sm:$0xff] }
 0x476   : > { %v2915_v24 = vadd.f32 %v2914_v3, %v8429_v54  ;;  %v8449_v54 = vld [vmem:[#allocation75_spill] sm:$0xff] }
 0x478   : > { %v2916_v14 = vadd.f32 %v2915_v24, %v8430_v36  ;;  %v8450_v36 = vld [vmem:[#allocation78_spill] sm:$0xff] }
 0x47a   : > { %v2917_v27 = vadd.f32 %v2916_v14, %v8431_v34  ;;  %v8451_v34 = vld [vmem:[#allocation81_spill] sm:$0xff] }
 0x47c   : > { %v2918_v44 = vadd.f32 %v2917_v27, %v8432_v29  ;;  %v8452_v29 = vld [vmem:[#allocation84_spill] sm:$0xff] }
 0x47e   : > { %v2919_v28 = vadd.f32 %v2918_v44, %v8433_v26  ;;  %v8453_v26 = vld [vmem:[#allocation87_spill] sm:$0xff] }
 0x480   : > { %v2920_v17 = vadd.f32 %v2919_v28, %v8434_v7  ;;  %v8454_v7 = vld [vmem:[#allocation90_spill] sm:$0xff] }
 0x482   : > { %v2921_v48 = vadd.f32 %v2920_v17, %v8435_v55  ;;  %v8455_v55 = vld [vmem:[#allocation93_spill] sm:$0xff] }
 0x484   : > { %v2922_v10 = vadd.f32 %v2921_v48, %v8436_v52  ;;  %v8456_v52 = vld [vmem:[#allocation96_spill] sm:$0xff] }
 0x486   : > { %v2923_v41 = vadd.f32 %v2922_v10, %v8437_v18  ;;  %v8457_v18 = vld [vmem:[#allocation99_spill] sm:$0xff] }
 0x488   : > { %v2924_v0 = vadd.f32 %v2923_v41, %v8438_v57  ;;  %v8458_v57 = vld [vmem:[#allocation102_spill] sm:$0xff] }
 0x48a   : > { %v2925_v62 = vadd.f32 %v2924_v0, %v8439_v21  ;;  %v8459_v21 = vld [vmem:[#allocation105_spill] sm:$0xff] }
 0x48c   : > { %v2926_v31 = vadd.f32 %v2925_v62, %v8440_v4  ;;  %v8460_v4 = vld [vmem:[#allocation108_spill] sm:$0xff] }
 0x48e   : > { %v2927_v37 = vadd.f32 %v2926_v31, %v8441_v23  ;;  %v8461_v23 = vld [vmem:[#allocation111_spill] sm:$0xff] }
 0x490   : > { %v2928_v33 = vadd.f32 %v2927_v37, %v8442_v15  ;;  %v8462_v15 = vld [vmem:[#allocation114_spill] sm:$0xff] }
 0x492   : > { %v2929_v45 = vadd.f32 %v2928_v33, %v8443_v25  ;;  %v8463_v25 = vld [vmem:[#allocation117_spill] sm:$0xff] }
 0x494   : > { %v2930_v35 = vadd.f32 %v2929_v45, %v8444_v16  ;;  %v8464_v16 = vld [vmem:[#allocation121_spill] sm:$0xff] }
 0x496   : > { %v2931_v8 = vadd.f32 %v2930_v35, %v8445_v46  ;;  %v8465_v46 = vld [vmem:[#allocation25_spill] sm:$0xff] }
 0x498   : > { %v2932_v1 = vadd.f32 %v2931_v8, %v8446_v50  ;;  %v8466_v50 = vld [vmem:[#allocation26_spill] sm:$0xff] }
 0x49a   : > { %v2933_v6 = vadd.f32 %v2932_v1, %v8447_v20  ;;  %v8467_v20 = vld [vmem:[#allocation130_spill] sm:$0xff] }
 0x49c   : > { %v2934_v3 = vadd.f32 %v2933_v6, %v8448_v60  ;;  %v8468_v60 = vld [vmem:[#allocation28_spill] sm:$0xff] }
 0x49e   : > { %v2935_v24 = vadd.f32 %v2934_v3, %v8449_v54  ;;  %v8469_v54 = vld [vmem:[#allocation29_spill] sm:$0xff] }
 0x4a0   : > { %v2936_v14 = vadd.f32 %v2935_v24, %v8450_v36  ;;  %v8470_v36 = vld [vmem:[#allocation139_spill] sm:$0xff] }
 0x4a2   : > { %v2937_v27 = vadd.f32 %v2936_v14, %v8451_v34  ;;  %v8471_v34 = vld [vmem:[#allocation31_spill] sm:$0xff] }
 0x4a4   : > { %v2938_v44 = vadd.f32 %v2937_v27, %v8452_v29  ;;  %v8472_v29 = vld [vmem:[#allocation32_spill] sm:$0xff] }
 0x4a6   : > { %v2939_v28 = vadd.f32 %v2938_v44, %v8453_v26  ;;  %v8473_v26 = vld [vmem:[#allocation148_spill] sm:$0xff] }
 0x4a8   : > { %v2940_v17 = vadd.f32 %v2939_v28, %v8454_v7  ;;  %v8474_v7 = vld [vmem:[#allocation34_spill] sm:$0xff] }
 0x4aa   : > { %v2941_v48 = vadd.f32 %v2940_v17, %v8455_v55  ;;  %v8475_v55 = vld [vmem:[#allocation35_spill] sm:$0xff] }
 0x4ac   : > { %v2942_v10 = vadd.f32 %v2941_v48, %v8456_v52  ;;  %v8476_v52 = vld [vmem:[#allocation157_spill] sm:$0xff] }
 0x4ae   : > { %v2943_v41 = vadd.f32 %v2942_v10, %v8457_v18  ;;  %v8477_v18 = vld [vmem:[#allocation37_spill] sm:$0xff] }
 0x4b0   : > { %v2944_v0 = vadd.f32 %v2943_v41, %v8458_v57  ;;  %v8478_v57 = vld [vmem:[#allocation38_spill] sm:$0xff] }
 0x4b2   : > { %v2945_v62 = vadd.f32 %v2944_v0, %v8459_v21  ;;  %v8479_v21 = vld [vmem:[#allocation166_spill] sm:$0xff] }
 0x4b4   : > { %v2946_v31 = vadd.f32 %v2945_v62, %v8460_v4  ;;  %v8480_v4 = vld [vmem:[#allocation40_spill] sm:$0xff] }
 0x4b6   : > { %v2947_v37 = vadd.f32 %v2946_v31, %v8461_v23  ;;  %v8481_v23 = vld [vmem:[#allocation41_spill] sm:$0xff] }
 0x4b8   : > { %v2948_v33 = vadd.f32 %v2947_v37, %v8462_v15  ;;  %v8482_v15 = vld [vmem:[#allocation175_spill] sm:$0xff] }
 0x4ba   : > { %v2949_v45 = vadd.f32 %v2948_v33, %v8463_v25  ;;  %v8483_v25 = vld [vmem:[#allocation43_spill] sm:$0xff] }
 0x4bc   : > { %v2950_v35 = vadd.f32 %v2949_v45, %v8464_v16  ;;  %v8484_v16 = vld [vmem:[#allocation44_spill] sm:$0xff] }
 0x4be   : > { %v2951_v8 = vadd.f32 %v2950_v35, %v8465_v46  ;;  %v8485_v46 = vld [vmem:[#allocation184_spill] sm:$0xff] }
 0x4c0   : > { %v2952_v1 = vadd.f32 %v2951_v8, %v8466_v50  ;;  %v8486_v50 = vld [vmem:[#allocation46_spill] sm:$0xff] }
 0x4c2   : > { %v2953_v6 = vadd.f32 %v2952_v1, %v8467_v20  ;;  %v8487_v20 = vld [vmem:[#allocation47_spill] sm:$0xff] }
 0x4c4   : > { %v2954_v3 = vadd.f32 %v2953_v6, %v8468_v60  ;;  %v8488_v60 = vld [vmem:[#allocation193_spill] sm:$0xff] }
 0x4c6   : > { %v2955_v24 = vadd.f32 %v2954_v3, %v8469_v54  ;;  %v8489_v54 = vld [vmem:[#allocation49_spill] sm:$0xff] }
 0x4c8   : > { %v2956_v14 = vadd.f32 %v2955_v24, %v8470_v36  ;;  %v8490_v36 = vld [vmem:[#allocation50_spill] sm:$0xff] }
 0x4ca   : > { %v2957_v27 = vadd.f32 %v2956_v14, %v8471_v34  ;;  %v8491_v34 = vld [vmem:[#allocation202_spill] sm:$0xff] }
 0x4cc   : > { %v2958_v44 = vadd.f32 %v2957_v27, %v8472_v29  ;;  %v8492_v29 = vld [vmem:[#allocation52_spill] sm:$0xff] }
 0x4ce   : > { %v2959_v28 = vadd.f32 %v2958_v44, %v8473_v26 }
 0x4d0   : > { %v2960_v17 = vadd.f32 %v2959_v28, %v8474_v7  ;;  %v8493_v7 = vld [vmem:[#allocation53_spill] sm:$0xff] }
 0x4d2   : > { %v2961_v48 = vadd.f32 %v2960_v17, %v8475_v55  ;;  %v8494_v55 = vld [vmem:[#allocation211_spill] sm:$0xff] }
 0x4d4   : > { %v2962_v10 = vadd.f32 %v2961_v48, %v8476_v52 }
 0x4d6   : > { %v2963_v41 = vadd.f32 %v2962_v10, %v8477_v18 }
 0x4d8   : > { %v2964_v0 = vadd.f32 %v2963_v41, %v8478_v57 }
 0x4da   : > { %v2965_v62 = vadd.f32 %v2964_v0, %v8479_v21 }
 0x4dc   : > { %v2966_v31 = vadd.f32 %v2965_v62, %v8480_v4  ;;  %v8495_v4 = vld [vmem:[#allocation55_spill] sm:$0xff] }
 0x4de   : > { %v2967_v37 = vadd.f32 %v2966_v31, %v8481_v23  ;;  %v8496_v31 = vld [vmem:[#allocation56_spill] sm:$0xff]  ;;  %v8497_v23 = vld [vmem:[#allocation219_spill] sm:$0xff] }
 0x4e0   : > { %v2968_v33 = vadd.f32 %v2967_v37, %v8482_v15  ;;  %v8498_v37 = vld [vmem:[#allocation58_spill] sm:$0xff]  ;;  %v8499_v15 = vld [vmem:[#allocation59_spill] sm:$0xff] }
 0x4e2   : > { %v2969_v45 = vadd.f32 %v2968_v33, %v8483_v25  ;;  %v8500_v33 = vld [vmem:[#allocation61_spill] sm:$0xff]  ;;  %v8501_v25 = vld [vmem:[#allocation62_spill] sm:$0xff] }
 0x4e4   : > { %v2970_v35 = vadd.f32 %v2969_v45, %v8484_v16  ;;  %v8502_v16 = vld [vmem:[#allocation64_spill] sm:$0xff] }
 0x4e6   : > { %v2971_v8 = vadd.f32 %v2970_v35, %v8485_v46  ;;  %v8503_v35 = vld [vmem:[#allocation65_spill] sm:$0xff] }
 0x4e8   : > { %v2972_v1 = vadd.f32 %v2971_v8, %v8486_v50  ;;  %v8504_v50 = vld [vmem:[#allocation67_spill] sm:$0xff] }
 0x4ea   : > { %v2973_v6 = vadd.f32 %v2972_v1, %v8487_v20  ;;  %v8505_v20 = vld [vmem:[#allocation68_spill] sm:$0xff] }
 0x4ec   : > { %v2974_v3 = vadd.f32 %v2973_v6, %v8488_v60  ;;  %v8506_v6 = vld [vmem:[#allocation70_spill] sm:$0xff] }
 0x4ee   : > { %v2975_v24 = vadd.f32 %v2974_v3, %v8489_v54  ;;  %v8507_v54 = vld [vmem:[#allocation71_spill] sm:$0xff] }
 0x4f0   : > { %v2976_v14 = vadd.f32 %v2975_v24, %v8490_v36  ;;  %v8508_v24 = vld [vmem:[#allocation73_spill] sm:$0xff] }
 0x4f2   : > { %v2977_v27 = vadd.f32 %v2976_v14, %v8491_v34  ;;  %v8509_v34 = vld [vmem:[#allocation74_spill] sm:$0xff] }
 0x4f4   : > { %v2978_v44 = vadd.f32 %v2977_v27, %v8492_v29  ;;  %v8510_v29 = vld [vmem:[#allocation76_spill] sm:$0xff] }
 0x4f6   : > { %v2979_v26 = vadd.f32 %v2978_v44, %v6108_v49  ;;  %v8511_v44 = vld [vmem:[#allocation77_spill] sm:$0xff] }
 0x4f8   : > { %v2980_v28 = vadd.f32 %v2979_v26, %v6111_v53 }
 0x4fa   : > { %v2981_v17 = vadd.f32 %v2980_v28, %v8493_v7  ;;  %v8512_v7 = vld [vmem:[#allocation79_spill] sm:$0xff] }
 0x4fc   : > { %v2982_v48 = vadd.f32 %v2981_v17, %v8494_v55  ;;  %v8513_v55 = vld [vmem:[#allocation80_spill] sm:$0xff] }
 0x4fe   : > { %v2983_v52 = vadd.f32 %v2982_v48, %v6124_v61  ;;  %v8514_v48 = vld [vmem:[#allocation82_spill] sm:$0xff] }
 0x500   : > { %v2984_v10 = vadd.f32 %v2983_v52, %v6127_v59 }
 0x502   : > { %v2985_v18 = vadd.f32 %v2984_v10, %v6130_v40  ;;  %v2394_v10 = vld [vmem:[#allocation8] sm:$0xff] }
 0x504   : > { %v2986_v41 = vadd.f32 %v2985_v18, %v6133_v5 }
 0x506   : > { %v2987_v57 = vadd.f32 %v2986_v41, %v6140_v42 }
 0x508   : > { %v2988_v0 = vadd.f32 %v2987_v57, %v6143_v2 }
 0x50a   : > { %v2989_v49 = vadd.f32 %v2988_v0, %v6146_v58 }
 0x50c   : > { %v2990_v53 = vadd.f32 %v2989_v49, %v6149_v51 }
 0x50e   : > { %v2991_v21 = vadd.f32 %v2990_v53, %v6156_v19 }
 0x510   : > { %v2992_v62 = vadd.f32 %v2991_v21, %v6159_v63 }
 0x512   : > { %v2993_v61 = vadd.f32 %v2992_v62, %v6162_v30 }
 0x514   : > { %v2994_v59 = vadd.f32 %v2993_v61, %v8495_v4 }
 0x516   : > { %v2995_v40 = vadd.f32 %v2994_v59, %v6172_v22 }
 0x518   : > { %v2996_v5 = vadd.f32 %v2995_v40, %v8496_v31 }
 0x51a   : > { %v2997_v42 = vadd.f32 %v2996_v5, %v8497_v23 }
 0x51c   : > { %v2998_v2 = vadd.f32 %v2997_v42, %v8498_v37 }
 0x51e   : > { %v2999_v58 = vadd.f32 %v2998_v2, %v6188_v12 }
 0x520   : > { %v3000_v51 = vadd.f32 %v2999_v58, %v6191_v32 }
 0x522   : > { %v3001_v19 = vadd.f32 %v3000_v51, %v8499_v15 }
 0x524   : > { %v3002_v63 = vadd.f32 %v3001_v19, %v8500_v33 }
 0x526   : > { %v3003_v30 = vadd.f32 %v3002_v63, %v6204_v43 }
 0x528   : > { %v3004_v45 = vadd.f32 %v3003_v30, %v8501_v25 }
 0x52a   : > { %v3005_v22 = vadd.f32 %v3004_v45, %v8502_v16 }
 0x52c   : > { %v3006_v46 = vadd.f32 %v3005_v22, %v8503_v35 }
 0x52e   : > { %v3007_v8 = vadd.f32 %v3006_v46, %v6220_v9 }
 0x530   : > { %v3008_v1 = vadd.f32 %v3007_v8, %v8504_v50 }
 0x532   : > { %v3009_v12 = vadd.f32 %v3008_v1, %v8505_v20 }
 0x534   : > { %v3010_v32 = vadd.f32 %v3009_v12, %v8506_v6 }
 0x536   : > { %v3011_v60 = vadd.f32 %v3010_v32, %v6236_v11 }
 0x538   : > { %v3012_v3 = vadd.f32 %v3011_v60, %v6239_v56 }
 0x53a   : > { %v3013_v43 = vadd.f32 %v3012_v3, %v8507_v54 }
 0x53c   : > { %v3014_v36 = vadd.f32 %v3013_v43, %v8508_v24 }
 0x53e   : > { %v3015_v14 = vadd.f32 %v3014_v36, %v6252_v39 }
 0x540   : > { %v3016_v27 = vadd.f32 %v3015_v14, %v8509_v34 }
 0x542   : > { %v3017_v9 = vadd.f32 %v3016_v27, %v8510_v29 }
 0x544   : > { %v3018_v26 = vadd.f32 %v3017_v9, %v8511_v44 }
 0x546   : > { %v3019_v28 = vadd.f32 %v3018_v26, %v6268_v38 }
 0x548   : > { %v3020_v17 = vadd.f32 %v3019_v28, %v8512_v7 }
 0x54a   : > { %v3021_v11 = vadd.f32 %v3020_v17, %v8513_v55 }
 0x54c   : > { %v3022_v56 = vadd.f32 %v3021_v11, %v8514_v48 }
 0x54e   : > { %v3023_v52 = vadd.f32 %v3022_v56, %v6284_v47 }
 0x550   : > { %v3024_v18 = vadd.f32 %v3023_v52, %v6287_v13 }
 0x552   : > { %v3162_v39 = vadd.f32 %v3024_v18, %v2394_v10 }
 0x554   : > { %3163 = vst [vmem:[#allocation8] sm:$0xff] %v3162_v39 }
 0x555 PF: > { %p3328_p5 = scmp.eq.s32.totalorder %s3608_s18, 1  ;;  %s3558_s15 = smov [#allocation8]  }
 0x556   : > { %s3173_s23 = sshll.u32 %s3558_s15, 4  ;;  %s3174_s23 = int_to_ptr.vmem [resolvable:$true] %s3173_s23 }
 0x557   : > { %s3464_s11 = scalar_lea.vmem %s3174_s23, 128  ;;  %p3471_p11 = scmp.lt.s32.totalorder %s3174_s23, %s3174_s23 }
 0x558   : > { %p3465_p6 = scmp.ne.s32.totalorder %s3174_s23, %s3464_s11  ;;  %p3472_p12 = scmp.lt.s32.totalorder %s3464_s11, %s3464_s11 }
 0x55a   : > { %p3466_p8 = pnand %p3465_p6, %p3328_p5  ;;  %p3473_p13 = por %p3472_p12, %p3471_p11 }
 0x55c   : > { %p3467_p9 = pneg %p3466_p8 }
 0x55e   : > { %p3474_p0 = pnand %p3473_p13, %p3467_p9 }
 0x560   : > { %3477 = shalt.err (!%p3474_p0)
}
 0x561   : > { %3325 = dma.vmem_to_hbm [thread:$0]  (%p3328_p5), %s3174_s23, 128, %s7225_s3, [#allocation4]  }
 0x562   : > { %3521 = dma.done.wait (%p3328_p5), [#allocation4], 128  }
 0x563   : > { %3523 = vsyncadd (%p3328_p5), [#allocation4], 4294967168 }
 0x564 PF: > { %s20_s17 = sadd.s32 1, %s3546_s17   ;;  %s8515_s12 = smov %s3530_s13 }
 0x565   : > { %p17_p10 = scmp.ge.s32.totalorder %s20_s17, 4   ;;  %s8516_s13 = smov %s3534_s14 }
 0x566   : > { %s8517_s14 = smov %s3630_s24  ;;  %s8518_s15 = smov %s3542_s16 }
 0x567   : > { %s8519_s16 = smov %s8521_s19  ;;  %19 = sbr.rel (!%p17_p10) target bundleno = 7 (0x7), region = 106 }
 0x56c   :  { %3186 = vsyncpa [#allocation3], 1 }
 0x56d   :  { %3188 = vsyncpa [#allocation3 + $0x1], 1 }
 0x56e   :  { %3189 = vsyncpa [#allocation6], 1 }
 0x56f   :  { %3191 = vsyncpa [#allocation6 + $0x1], 1 }
 0x570   :  { %3192 = vsyncpa [#allocation4], 1 }
 0x571   :  { %3194 = vsyncpa [#allocation4 + $0x1], 1 }

</bundles_post_ra>
